<compile_context>
chip_gen: v7x
topology: tpu7x:2x2x1
jax: 0.10.0
libtpu: 0.0.40
codegen_flags: <defaults>
</compile_context>

<pallas_src>
import functools

import jax
import jax.numpy as jnp
from jax.experimental import pallas as pl
from jax.experimental.pallas import tpu as pltpu

VMEM_SPEC = pl.BlockSpec(memory_space=pltpu.MemorySpace.VMEM)
SMEM_SPEC = pl.BlockSpec(memory_space=pltpu.MemorySpace.SMEM)
VMEM_LIMIT = 48 * 1024 * 1024   # below v7x's 64 MiB/TC, above default scoped limits
BN_EPS = 1e-5


def _round_up(x, m):
    return ((x + m - 1) // m) * m


def _row_tiling(m, max_tile=256):
    """Sublane-dim tiling: tile multiple of 8, M padded to a tile multiple."""
    tile = max_tile if m >= max_tile else _round_up(m, 8)
    return tile, _round_up(m, tile)


def _col_tiling(m, max_tile=512):
    """Lane-dim tiling: tile multiple of 128, M padded to a tile multiple."""
    tile = max_tile if m >= max_tile else _round_up(m, 128)
    return tile, _round_up(m, tile)


# ----------------------------- Pallas kernels ------------------------------ #

def linear_relu_kernel(x_ref, w_ref, b_ref, o_ref):
    # x: (B, n_z) f32, w: (n_z, D) bf16 (columns pre-permuted to NHWC order),
    # b: (1, D) f32 -> o: (B, D) bf16.
    acc = jnp.dot(x_ref[...].astype(jnp.bfloat16), w_ref[...],
                  preferred_element_type=jnp.float32)
    o_ref[...] = jnp.maximum(acc + b_ref[...], 0.0).astype(o_ref.dtype)


def conv_matmul_stats_kernel(taps_ref, w_ref, y_ref, stats_ref):
    # Pass 1: taps (tile_m, K) bf16  x  w (K, Cout) bf16 -> y (tile_m, Cout) f32
    # plus per-tile column sum / sum-of-squares partials (BN pass 1).
    # Conv bias is omitted: it cancels exactly in training-mode BatchNorm.
    y = jnp.dot(taps_ref[...], w_ref[...], preferred_element_type=jnp.float32)
    y_ref[...] = y
    stats_ref[0:1, :] = jnp.sum(y, axis=0, keepdims=True)
    stats_ref[1:2, :] = jnp.sum(y * y, axis=0, keepdims=True)


def bn_relu_kernel(y_ref, stats_ref, gamma_ref, beta_ref, o_ref, *, n_rows, n_tiles):
    # Pass 2: finalize BatchNorm from the per-tile partials, apply the affine
    # and ReLU, emit bf16 for the next layer's MXU.  All math in f32.
    cout = y_ref.shape[1]
    s = jnp.zeros((1, cout), jnp.float32)
    sq = jnp.zeros((1, cout), jnp.float32)
    for t in range(n_tiles):                       # static, tiny (1, C) adds
        s = s + stats_ref[8 * t:8 * t + 1, :]
        sq = sq + stats_ref[8 * t + 1:8 * t + 2, :]
    mean = s * (1.0 / n_rows)
    var = jnp.maximum(sq * (1.0 / n_rows) - mean * mean, 0.0)   # biased variance
    scale = gamma_ref[...] * jax.lax.rsqrt(var + BN_EPS)
    shift = beta_ref[...] - mean * scale
    o_ref[...] = jnp.maximum(y_ref[...] * scale + shift, 0.0).astype(o_ref.dtype)


def phase_matmul_sigmoid_kernel(w_ref, b_ref, taps_ref, o_ref):
    # Final stride-2 deconv, sub-pixel form.
    # w: (4, K) bf16 (one row per output phase), taps: (tile_n, K) bf16,
    # b: (1, 1) f32 scalar in SMEM.  Output (4, tile_n): lane-dense along the
    # flattened pixel axis (avoids the Cout=1 masked-store tail).
    acc = jnp.dot(w_ref[...], taps_ref[...].T, preferred_element_type=jnp.float32)
    acc = acc + b_ref[0, 0]
    y = pl.reciprocal(1.0 + jnp.exp(-acc), approx=True)   # EUP exp + EUP recip
    o_ref[...] = jnp.clip(y, 0.0, 1.0)


# ------------------------------ JAX wrappers -------------------------------- #

def linear_relu(x, w_bf16, b):
    B, n_z = x.shape
    D = w_bf16.shape[1]
    return pl.pallas_call(
        linear_relu_kernel,
        out_shape=jax.ShapeDtypeStruct((B, D), jnp.bfloat16),
        in_specs=[VMEM_SPEC, VMEM_SPEC, VMEM_SPEC],
        out_specs=VMEM_SPEC,
        compiler_params=pltpu.CompilerParams(vmem_limit_bytes=VMEM_LIMIT),
        cost_estimate=pl.CostEstimate(
            flops=2 * B * n_z * D, transcendentals=0,
            bytes_accessed=x.size * 4 + w_bf16.size * 2 + D * 4 + B * D * 2),
    )(x, w_bf16, b.reshape(1, D))


def _fold_taps_s1(x_nhwc, kh, kw):
    """Folded im2col for a stride-1 deconv: (B*Ho*Wo, KH*KW*Cin), bf16."""
    B, H, W, Cin = x_nhwc.shape
    Ho, Wo = H + kh - 1, W + kw - 1
    xp = jnp.pad(x_nhwc, ((0, 0), (kh - 1, kh - 1), (kw - 1, kw - 1), (0, 0)))
    cols = [xp[:, i:i + Ho, j:j + Wo, :].reshape(B * Ho * Wo, Cin)
            for i in range(kh) for j in range(kw)]
    return jnp.concatenate(cols, axis=1), Ho, Wo


def conv_transpose_bn_relu(x_nhwc, w_folded, gamma, beta):
    """ConvTranspose2d(4x4, stride=1, bias folded away) + BatchNorm2d + ReLU."""
    B = x_nhwc.shape[0]
    taps, Ho, Wo = _fold_taps_s1(x_nhwc, 4, 4)
    M, K = taps.shape
    Cout = w_folded.shape[1]
    tile, m_pad = _row_tiling(M)
    if m_pad != M:
        taps = jnp.pad(taps, ((0, m_pad - M), (0, 0)))   # zero rows: no effect on stats
    n_tiles = m_pad // tile

    y, stats = pl.pallas_call(
        conv_matmul_stats_kernel,
        grid=(n_tiles,),
        out_shape=(jax.ShapeDtypeStruct((m_pad, Cout), jnp.float32),
                   jax.ShapeDtypeStruct((n_tiles * 8, Cout), jnp.float32)),
        in_specs=[pl.BlockSpec((tile, K), lambda i: (i, 0)),
                  pl.BlockSpec((K, Cout), lambda i: (0, 0))],
        out_specs=(pl.BlockSpec((tile, Cout), lambda i: (i, 0)),
                   pl.BlockSpec((8, Cout), lambda i: (i, 0))),
        compiler_params=pltpu.CompilerParams(
            dimension_semantics=("parallel",), vmem_limit_bytes=VMEM_LIMIT),
        cost_estimate=pl.CostEstimate(
            flops=2 * m_pad * K * Cout, transcendentals=0,
            bytes_accessed=taps.size * 2 + w_folded.size * 2 + m_pad * Cout * 4),
    )(taps, w_folded)

    out = pl.pallas_call(
        functools.partial(bn_relu_kernel, n_rows=float(M), n_tiles=n_tiles),
        grid=(n_tiles,),
        out_shape=jax.ShapeDtypeStruct((m_pad, Cout), jnp.bfloat16),
        in_specs=[pl.BlockSpec((tile, Cout), lambda i: (i, 0)),
                  pl.BlockSpec((n_tiles * 8, Cout), lambda i: (0, 0)),
                  pl.BlockSpec((1, Cout), lambda i: (0, 0)),
                  pl.BlockSpec((1, Cout), lambda i: (0, 0))],
        out_specs=pl.BlockSpec((tile, Cout), lambda i: (i, 0)),
        compiler_params=pltpu.CompilerParams(
            dimension_semantics=("parallel",), vmem_limit_bytes=VMEM_LIMIT),
        cost_estimate=pl.CostEstimate(
            flops=4 * m_pad * Cout, transcendentals=Cout,
            bytes_accessed=m_pad * Cout * 4 + m_pad * Cout * 2),
    )(y, stats, gamma.reshape(1, Cout), beta.reshape(1, Cout))

    return out[:M].reshape(B, Ho, Wo, Cout)


def _fold_taps_s2_phases(x_nhwc):
    """Sub-pixel taps for the stride-2, K=4 deconv.  All 4 output phases share
    this single undilated slab of shape (B*(H+1)*(W+1), 4*Cin)."""
    B, H, W, Cin = x_nhwc.shape
    Hq, Wq = H + 1, W + 1
    xp = jnp.pad(x_nhwc, ((0, 0), (1, 1), (1, 1), (0, 0)))
    cols = [xp[:, 1 - a:1 - a + Hq, 1 - b:1 - b + Wq, :].reshape(B * Hq * Wq, Cin)
            for a in range(2) for b in range(2)]
    return jnp.concatenate(cols, axis=1), Hq, Wq


def conv_transpose_s2_sigmoid(x_nhwc, w_phases, bias):
    """ConvTranspose2d(Cin, 1, 4, stride=2) + Sigmoid via sub-pixel phases."""
    B = x_nhwc.shape[0]
    taps, Hq, Wq = _fold_taps_s2_phases(x_nhwc)
    M, K = taps.shape
    tile, m_pad = _col_tiling(M)
    if m_pad != M:
        taps = jnp.pad(taps, ((0, m_pad - M), (0, 0)))
    n_tiles = m_pad // tile

    out = pl.pallas_call(
        phase_matmul_sigmoid_kernel,
        grid=(n_tiles,),
        out_shape=jax.ShapeDtypeStruct((4, m_pad), jnp.float32),
        in_specs=[pl.BlockSpec((4, K), lambda i: (0, 0)),
                  SMEM_SPEC,
                  pl.BlockSpec((tile, K), lambda i: (i, 0))],
        out_specs=pl.BlockSpec((4, tile), lambda i: (0, i)),
        compiler_params=pltpu.CompilerParams(
            dimension_semantics=("parallel",), vmem_limit_bytes=VMEM_LIMIT),
        cost_estimate=pl.CostEstimate(
            flops=2 * 4 * m_pad * K, transcendentals=4 * m_pad,
            bytes_accessed=taps.size * 2 + w_phases.size * 2 + 4 * m_pad * 4),
    )(w_phases, bias.reshape(1, 1).astype(jnp.float32), taps)

    out = out[:, :M].reshape(2, 2, B, Hq, Wq)          # (ry, rx, b, qy, qx)
    out = out.transpose(2, 3, 0, 4, 1).reshape(B, 2 * Hq, 2 * Wq)
    return out[:, None, :, :]                          # NCHW (B, 1, 28, 28)


def decoder_forward(kp, x):
    """x: (B, n_z) f32 -> (B, 1, 28, 28) f32, matching PyTorch Decoder.forward
    (BatchNorm in training mode, i.e. batch statistics)."""
    B = x.shape[0]
    h = linear_relu(x, kp["proj_w"], kp["proj_b"])        # (B, 49*8*dim_h) bf16, NHWC order
    h = h.reshape(B, 7, 7, -1)                            # NHWC, no transpose needed
    h = conv_transpose_bn_relu(h, kp["ct1_w"], kp["bn1_g"], kp["bn1_b"])   # (B,10,10,4h)
    h = conv_transpose_bn_relu(h, kp["ct2_w"], kp["bn2_g"], kp["bn2_b"])   # (B,13,13,2h)
    return conv_transpose_s2_sigmoid(h, kp["ct3_w"], kp["ct3_b"])          # (B,1,28,28)


# ------------------------- deterministic parameters ------------------------- #

def init_params(key, n_z, dim_h):
    """Parameters in PyTorch layout (as nn.Linear / nn.ConvTranspose2d store them)."""
    d8, d4, d2 = dim_h * 8, dim_h * 4, dim_h * 2
    ks = jax.random.split(key, 8)
    return {
        "dim_h": dim_h,
        "proj_w": jax.random.normal(ks[0], (d8 * 7 * 7, n_z), jnp.float32) * 0.05,
        "proj_b": jax.random.normal(ks[1], (d8 * 7 * 7,), jnp.float32) * 0.05,
        "ct1_w": jax.random.normal(ks[2], (d8, d4, 4, 4), jnp.float32) * 0.05,
        "ct1_b": jax.random.normal(ks[3], (d4,), jnp.float32) * 0.05,   # cancels in BN
        "bn1_g": jnp.ones((d4,), jnp.float32),
        "bn1_b": jnp.zeros((d4,), jnp.float32),
        "ct2_w": jax.random.normal(ks[4], (d4, d2, 4, 4), jnp.float32) * 0.05,
        "ct2_b": jax.random.normal(ks[5], (d2,), jnp.float32) * 0.05,   # cancels in BN
        "bn2_g": jnp.ones((d2,), jnp.float32),
        "bn2_b": jnp.zeros((d2,), jnp.float32),
        "ct3_w": jax.random.normal(ks[6], (d2, 1, 4, 4), jnp.float32) * 0.05,
        "ct3_b": jax.random.normal(ks[7], (1,), jnp.float32) * 0.05,
    }


def prepare_params(p):
    """One-time offline conversion from PyTorch layout to kernel-ready layout."""
    dim_h = p["dim_h"]
    d8, d2 = dim_h * 8, dim_h * 2

    # Linear: transpose to (n_z, D) and permute columns from (c, h, w) flat
    # order to (h, w, c) so the matmul directly emits an NHWC-flattened slab.
    w = p["proj_w"].T
    n_z = w.shape[0]
    w = w.reshape(n_z, d8, 49).transpose(0, 2, 1).reshape(n_z, 49 * d8)
    b = p["proj_b"].reshape(d8, 49).T.reshape(-1)

    def fold_s1(wt):
        # (Cin, Cout, 4, 4) -> (16*Cin, Cout), row order (kh, kw, ci), flipped taps.
        cin, cout = wt.shape[0], wt.shape[1]
        return (jnp.flip(wt, axis=(2, 3)).transpose(2, 3, 0, 1)
                .reshape(16 * cin, cout).astype(jnp.bfloat16))

    # Final stride-2 deconv -> 4 sub-pixel phase rows, column order (a, b, ci),
    # phase index p = 2*ry + rx, tap weight W[ci, 0, 2a+ry, 2b+rx].
    w3 = p["ct3_w"][:, 0].reshape(d2, 2, 2, 2, 2)       # (ci, a, ry, b, rx)
    w3 = w3.transpose(2, 4, 1, 3, 0).reshape(4, 4 * d2)  # (phase, (a, b, ci))

    return {
        "proj_w": w.astype(jnp.bfloat16),
        "proj_b": b.astype(jnp.float32),
        "ct1_w": fold_s1(p["ct1_w"]),
        "bn1_g": p["bn1_g"], "bn1_b": p["bn1_b"],
        "ct2_w": fold_s1(p["ct2_w"]),
        "bn2_g": p["bn2_g"], "bn2_b": p["bn2_b"],
        "ct3_w": w3.astype(jnp.bfloat16),
        "ct3_b": p["ct3_b"],
    }


if __name__ == "__main__":
    key = jax.random.PRNGKey(0)
    pkey, xkey = jax.random.split(key)
    n_z, dim_h, batch = 8, 4, 2
    params = init_params(pkey, n_z, dim_h)
    kparams = prepare_params(params)
    x = jax.random.normal(xkey, (batch, n_z), jnp.float32)

    fwd = jax.jit(decoder_forward)
    out = jax.block_until_ready(fwd(kparams, x))

    assert out.shape == (batch, 1, 28, 28), out.shape
    assert out.dtype == jnp.float32
    assert bool(jnp.all(jnp.isfinite(out)))
    assert bool(jnp.all((out >= 0.0) & (out <= 1.0)))   # sigmoid output range
    print("KERNEL_OK")
</pallas_src>

<mosaic_0001>
module attributes {stable_mosaic.version = 11 : i64} {
  func.func @linear_relu_kernel(%arg0: memref<2x8xf32, #tpu.memory_space<vmem>>, %arg1: memref<8x1568xbf16, #tpu.memory_space<vmem>>, %arg2: memref<1x1568xf32, #tpu.memory_space<vmem>>, %arg3: memref<2x1568xbf16, #tpu.memory_space<vmem>>) attributes {dimension_semantics = [], scalar_prefetch = 0 : i64, scratch_operands = 0 : i64, tpu.core_type = #tpu.core_type<tc>} {
    %c0 = arith.constant 0 : index
    %c0_0 = arith.constant 0 : index
    %0 = vector.load %arg0[%c0, %c0_0] : memref<2x8xf32, #tpu.memory_space<vmem>>, vector<2x8xf32>
    %1 = arith.truncf %0 : vector<2x8xf32> to vector<2x8xbf16>
    %c0_1 = arith.constant 0 : index
    %c0_2 = arith.constant 0 : index
    %2 = vector.load %arg1[%c0_1, %c0_2] : memref<8x1568xbf16, #tpu.memory_space<vmem>>, vector<8x1568xbf16>
    %cst = arith.constant dense<0.000000e+00> : vector<2x1568xf32>
    %3 = tpu.matmul %1, %2, %cst {dimension_numbers = #tpu.dot_dimension_numbers<[1], [0], [0], [1], [0, 0, 1, 1], [], []>} : vector<2x8xbf16>, vector<8x1568xbf16>, vector<2x1568xf32> -> vector<2x1568xf32>
    %c0_3 = arith.constant 0 : index
    %c0_4 = arith.constant 0 : index
    %4 = vector.load %arg2[%c0_3, %c0_4] : memref<1x1568xf32, #tpu.memory_space<vmem>>, vector<1x1568xf32>
    %5 = vector.broadcast %4 : vector<1x1568xf32> to vector<2x1568xf32>
    %6 = arith.addf %3, %5 : vector<2x1568xf32>
    %cst_5 = arith.constant 0.000000e+00 : f32
    %7 = vector.broadcast %cst_5 : f32 to vector<2x1568xf32>
    %8 = arith.maximumf %6, %7 : vector<2x1568xf32>
    %9 = arith.truncf %8 : vector<2x1568xf32> to vector<2x1568xbf16>
    %c0_6 = arith.constant 0 : index
    %c0_7 = arith.constant 0 : index
    %10 = vector.load %arg3[%c0_6, %c0_7] : memref<2x1568xbf16, #tpu.memory_space<vmem>>, vector<2x1568xbf16>
    tpu.vector_store %arg3[%c0_6, %c0_7], %9 {strides = array<i32>} : memref<2x1568xbf16, #tpu.memory_space<vmem>>, vector<2x1568xbf16>,
    return
  }
}

module attributes {stable_mosaic.version = 11 : i64} {
  func.func @conv_matmul_stats_kernel(%arg0: i32, %arg1: memref<200x512xbf16, #tpu.memory_space<vmem>>, %arg2: memref<512x16xbf16, #tpu.memory_space<vmem>>, %arg3: memref<200x16xf32, #tpu.memory_space<vmem>>, %arg4: memref<8x16xf32, #tpu.memory_space<vmem>>) attributes {dimension_semantics = [#tpu.dimension_semantics<parallel>], iteration_bounds = array<i64: 1>, scalar_prefetch = 0 : i64, scratch_operands = 0 : i64, tpu.core_type = #tpu.core_type<tc>, window_params = [{transform_indices = @transform_0, window_bounds = array<i64: 200, 512>}, {pipeline_mode = #tpu.pipeline_mode<synchronous>, transform_indices = @transform_1, window_bounds = array<i64: 512, 16>}, {transform_indices = @transform_2, window_bounds = array<i64: 200, 16>}, {transform_indices = @transform_3, window_bounds = array<i64: 8, 16>}]} {
    %c0 = arith.constant 0 : index
    %c0_0 = arith.constant 0 : index
    %0 = vector.load %arg1[%c0, %c0_0] : memref<200x512xbf16, #tpu.memory_space<vmem>>, vector<200x512xbf16>
    %c0_1 = arith.constant 0 : index
    %c0_2 = arith.constant 0 : index
    %1 = vector.load %arg2[%c0_1, %c0_2] : memref<512x16xbf16, #tpu.memory_space<vmem>>, vector<512x16xbf16>
    %cst = arith.constant dense<0.000000e+00> : vector<200x16xf32>
    %2 = tpu.matmul %0, %1, %cst {dimension_numbers = #tpu.dot_dimension_numbers<[1], [0], [0], [1], [0, 0, 1, 1], [], []>} : vector<200x512xbf16>, vector<512x16xbf16>, vector<200x16xf32> -> vector<200x16xf32>
    %c0_3 = arith.constant 0 : index
    %c0_4 = arith.constant 0 : index
    %3 = vector.load %arg3[%c0_3, %c0_4] : memref<200x16xf32, #tpu.memory_space<vmem>>, vector<200x16xf32>
    tpu.vector_store %arg3[%c0_3, %c0_4], %2 {strides = array<i32>} : memref<200x16xf32, #tpu.memory_space<vmem>>, vector<200x16xf32>,
    %cst_5 = arith.constant dense<0.000000e+00> : vector<16xf32>
    %4 = vector.multi_reduction <add>, %2, %cst_5 [0] : vector<200x16xf32> to vector<16xf32>
    %5 = vector.shape_cast %4 : vector<16xf32> to vector<1x16xf32>
    %c0_6 = arith.constant 0 : index
    %c0_7 = arith.constant 0 : index
    %6 = vector.load %arg4[%c0_6, %c0_7] : memref<8x16xf32, #tpu.memory_space<vmem>>, vector<1x16xf32>
    tpu.vector_store %arg4[%c0_6, %c0_7], %5 {strides = array<i32>} : memref<8x16xf32, #tpu.memory_space<vmem>>, vector<1x16xf32>,
    %7 = arith.mulf %2, %2 : vector<200x16xf32>
    %cst_8 = arith.constant dense<0.000000e+00> : vector<16xf32>
    %8 = vector.multi_reduction <add>, %7, %cst_8 [0] : vector<200x16xf32> to vector<16xf32>
    %9 = vector.shape_cast %8 : vector<16xf32> to vector<1x16xf32>
    %c1 = arith.constant 1 : index
    %c0_9 = arith.constant 0 : index
    %10 = vector.load %arg4[%c1, %c0_9] : memref<8x16xf32, #tpu.memory_space<vmem>>, vector<1x16xf32>
    tpu.vector_store %arg4[%c1, %c0_9], %9 {strides = array<i32>} : memref<8x16xf32, #tpu.memory_space<vmem>>, vector<1x16xf32>,
    return
  }
  func.func @transform_0(%arg0: i32) -> (i32, i32) {
    %c0_i32 = arith.constant 0 : i32
    %c0_i32_0 = arith.constant 0 : i32
    return %arg0, %c0_i32 : i32, i32
  }
  func.func @transform_1(%arg0: i32) -> (i32, i32) {
    %c0_i32 = arith.constant 0 : i32
    %c0_i32_0 = arith.constant 0 : i32
    %c0_i32_1 = arith.constant 0 : i32
    return %c0_i32, %c0_i32_0 : i32, i32
  }
  func.func @transform_2(%arg0: i32) -> (i32, i32) {
    %c0_i32 = arith.constant 0 : i32
    %c0_i32_0 = arith.constant 0 : i32
    return %arg0, %c0_i32 : i32, i32
  }
  func.func @transform_3(%arg0: i32) -> (i32, i32) {
    %c0_i32 = arith.constant 0 : i32
    %c0_i32_0 = arith.constant 0 : i32
    return %arg0, %c0_i32 : i32, i32
  }
}

module attributes {stable_mosaic.version = 11 : i64} {
  func.func @bn_relu_kernel(%arg0: i32, %arg1: memref<200x16xf32, #tpu.memory_space<vmem>>, %arg2: memref<8x16xf32, #tpu.memory_space<vmem>>, %arg3: memref<1x16xf32, #tpu.memory_space<vmem>>, %arg4: memref<1x16xf32, #tpu.memory_space<vmem>>, %arg5: memref<200x16xbf16, #tpu.memory_space<vmem>>) attributes {dimension_semantics = [#tpu.dimension_semantics<parallel>], iteration_bounds = array<i64: 1>, scalar_prefetch = 0 : i64, scratch_operands = 0 : i64, tpu.core_type = #tpu.core_type<tc>, window_params = [{transform_indices = @transform_0, window_bounds = array<i64: 200, 16>}, {pipeline_mode = #tpu.pipeline_mode<synchronous>, transform_indices = @transform_1, window_bounds = array<i64: 8, 16>}, {pipeline_mode = #tpu.pipeline_mode<synchronous>, transform_indices = @transform_2, window_bounds = array<i64: 1, 16>}, {pipeline_mode = #tpu.pipeline_mode<synchronous>, transform_indices = @transform_3, window_bounds = array<i64: 1, 16>}, {transform_indices = @transform_4, window_bounds = array<i64: 200, 16>}]} {
    %cst = arith.constant 0.000000e+00 : f32
    %0 = vector.broadcast %cst : f32 to vector<1x16xf32>
    %cst_0 = arith.constant 0.000000e+00 : f32
    %1 = vector.broadcast %cst_0 : f32 to vector<1x16xf32>
    %c0 = arith.constant 0 : index
    %c0_1 = arith.constant 0 : index
    %2 = vector.load %arg2[%c0, %c0_1] : memref<8x16xf32, #tpu.memory_space<vmem>>, vector<1x16xf32>
    %3 = arith.addf %0, %2 : vector<1x16xf32>
    %c1 = arith.constant 1 : index
    %c0_2 = arith.constant 0 : index
    %4 = vector.load %arg2[%c1, %c0_2] : memref<8x16xf32, #tpu.memory_space<vmem>>, vector<1x16xf32>
    %5 = arith.addf %1, %4 : vector<1x16xf32>
    %cst_3 = arith.constant 5.000000e-03 : f32
    %6 = vector.broadcast %cst_3 : f32 to vector<1x16xf32>
    %7 = arith.mulf %3, %6 : vector<1x16xf32>
    %cst_4 = arith.constant 5.000000e-03 : f32
    %8 = vector.broadcast %cst_4 : f32 to vector<1x16xf32>
    %9 = arith.mulf %5, %8 : vector<1x16xf32>
    %10 = arith.mulf %7, %7 : vector<1x16xf32>
    %11 = arith.subf %9, %10 : vector<1x16xf32>
    %cst_5 = arith.constant 0.000000e+00 : f32
    %12 = vector.broadcast %cst_5 : f32 to vector<1x16xf32>
    %13 = arith.maximumf %11, %12 : vector<1x16xf32>
    %c0_6 = arith.constant 0 : index
    %c0_7 = arith.constant 0 : index
    %14 = vector.load %arg3[%c0_6, %c0_7] : memref<1x16xf32, #tpu.memory_space<vmem>>, vector<1x16xf32>
    %cst_8 = arith.constant 9.99999974E-6 : f32
    %15 = vector.broadcast %cst_8 : f32 to vector<1x16xf32>
    %16 = arith.addf %13, %15 : vector<1x16xf32>
    %17 = math.rsqrt %16 : vector<1x16xf32>
    %18 = arith.mulf %14, %17 : vector<1x16xf32>
    %c0_9 = arith.constant 0 : index
    %c0_10 = arith.constant 0 : index
    %19 = vector.load %arg4[%c0_9, %c0_10] : memref<1x16xf32, #tpu.memory_space<vmem>>, vector<1x16xf32>
    %20 = arith.mulf %7, %18 : vector<1x16xf32>
    %21 = arith.subf %19, %20 : vector<1x16xf32>
    %c0_11 = arith.constant 0 : index
    %c0_12 = arith.constant 0 : index
    %22 = vector.load %arg1[%c0_11, %c0_12] : memref<200x16xf32, #tpu.memory_space<vmem>>, vector<200x16xf32>
    %23 = vector.broadcast %18 : vector<1x16xf32> to vector<200x16xf32>
    %24 = arith.mulf %22, %23 : vector<200x16xf32>
    %25 = vector.broadcast %21 : vector<1x16xf32> to vector<200x16xf32>
    %26 = arith.addf %24, %25 : vector<200x16xf32>
    %cst_13 = arith.constant 0.000000e+00 : f32
    %27 = vector.broadcast %cst_13 : f32 to vector<200x16xf32>
    %28 = arith.maximumf %26, %27 : vector<200x16xf32>
    %29 = arith.truncf %28 : vector<200x16xf32> to vector<200x16xbf16>
    %c0_14 = arith.constant 0 : index
    %c0_15 = arith.constant 0 : index
    %30 = vector.load %arg5[%c0_14, %c0_15] : memref<200x16xbf16, #tpu.memory_space<vmem>>, vector<200x16xbf16>
    tpu.vector_store %arg5[%c0_14, %c0_15], %29 {strides = array<i32>} : memref<200x16xbf16, #tpu.memory_space<vmem>>, vector<200x16xbf16>,
    return
  }
  func.func @transform_0(%arg0: i32) -> (i32, i32) {
    %c0_i32 = arith.constant 0 : i32
    %c0_i32_0 = arith.constant 0 : i32
    return %arg0, %c0_i32 : i32, i32
  }
  func.func @transform_1(%arg0: i32) -> (i32, i32) {
    %c0_i32 = arith.constant 0 : i32
    %c0_i32_0 = arith.constant 0 : i32
    %c0_i32_1 = arith.constant 0 : i32
    return %c0_i32, %c0_i32_0 : i32, i32
  }
  func.func @transform_2(%arg0: i32) -> (i32, i32) {
    %c0_i32 = arith.constant 0 : i32
    %c0_i32_0 = arith.constant 0 : i32
    %c0_i32_1 = arith.constant 0 : i32
    return %c0_i32, %c0_i32_0 : i32, i32
  }
  func.func @transform_3(%arg0: i32) -> (i32, i32) {
    %c0_i32 = arith.constant 0 : i32
    %c0_i32_0 = arith.constant 0 : i32
    %c0_i32_1 = arith.constant 0 : i32
    return %c0_i32, %c0_i32_0 : i32, i32
  }
  func.func @transform_4(%arg0: i32) -> (i32, i32) {
    %c0_i32 = arith.constant 0 : i32
    %c0_i32_0 = arith.constant 0 : i32
    return %arg0, %c0_i32 : i32, i32
  }
}

module attributes {stable_mosaic.version = 11 : i64} {
  func.func @conv_matmul_stats_kernel(%arg0: i32, %arg1: memref<256x256xbf16, #tpu.memory_space<vmem>>, %arg2: memref<256x8xbf16, #tpu.memory_space<vmem>>, %arg3: memref<256x8xf32, #tpu.memory_space<vmem>>, %arg4: memref<8x8xf32, #tpu.memory_space<vmem>>) attributes {dimension_semantics = [#tpu.dimension_semantics<parallel>], iteration_bounds = array<i64: 2>, scalar_prefetch = 0 : i64, scratch_operands = 0 : i64, tpu.core_type = #tpu.core_type<tc>, window_params = [{transform_indices = @transform_0, window_bounds = array<i64: 256, 256>}, {pipeline_mode = #tpu.pipeline_mode<synchronous>, transform_indices = @transform_1, window_bounds = array<i64: 256, 8>}, {transform_indices = @transform_2, window_bounds = array<i64: 256, 8>}, {transform_indices = @transform_3, window_bounds = array<i64: 8, 8>}]} {
    %c0 = arith.constant 0 : index
    %c0_0 = arith.constant 0 : index
    %0 = vector.load %arg1[%c0, %c0_0] : memref<256x256xbf16, #tpu.memory_space<vmem>>, vector<256x256xbf16>
    %c0_1 = arith.constant 0 : index
    %c0_2 = arith.constant 0 : index
    %1 = vector.load %arg2[%c0_1, %c0_2] : memref<256x8xbf16, #tpu.memory_space<vmem>>, vector<256x8xbf16>
    %cst = arith.constant dense<0.000000e+00> : vector<256x8xf32>
    %2 = tpu.matmul %0, %1, %cst {dimension_numbers = #tpu.dot_dimension_numbers<[1], [0], [0], [1], [0, 0, 1, 1], [], []>} : vector<256x256xbf16>, vector<256x8xbf16>, vector<256x8xf32> -> vector<256x8xf32>
    %c0_3 = arith.constant 0 : index
    %c0_4 = arith.constant 0 : index
    %3 = vector.load %arg3[%c0_3, %c0_4] : memref<256x8xf32, #tpu.memory_space<vmem>>, vector<256x8xf32>
    tpu.vector_store %arg3[%c0_3, %c0_4], %2 {strides = array<i32>} : memref<256x8xf32, #tpu.memory_space<vmem>>, vector<256x8xf32>,
    %cst_5 = arith.constant dense<0.000000e+00> : vector<8xf32>
    %4 = vector.multi_reduction <add>, %2, %cst_5 [0] : vector<256x8xf32> to vector<8xf32>
    %5 = vector.shape_cast %4 : vector<8xf32> to vector<1x8xf32>
    %c0_6 = arith.constant 0 : index
    %c0_7 = arith.constant 0 : index
    %6 = vector.load %arg4[%c0_6, %c0_7] : memref<8x8xf32, #tpu.memory_space<vmem>>, vector<1x8xf32>
    tpu.vector_store %arg4[%c0_6, %c0_7], %5 {strides = array<i32>} : memref<8x8xf32, #tpu.memory_space<vmem>>, vector<1x8xf32>,
    %7 = arith.mulf %2, %2 : vector<256x8xf32>
    %cst_8 = arith.constant dense<0.000000e+00> : vector<8xf32>
    %8 = vector.multi_reduction <add>, %7, %cst_8 [0] : vector<256x8xf32> to vector<8xf32>
    %9 = vector.shape_cast %8 : vector<8xf32> to vector<1x8xf32>
    %c1 = arith.constant 1 : index
    %c0_9 = arith.constant 0 : index
    %10 = vector.load %arg4[%c1, %c0_9] : memref<8x8xf32, #tpu.memory_space<vmem>>, vector<1x8xf32>
    tpu.vector_store %arg4[%c1, %c0_9], %9 {strides = array<i32>} : memref<8x8xf32, #tpu.memory_space<vmem>>, vector<1x8xf32>,
    return
  }
  func.func @transform_0(%arg0: i32) -> (i32, i32) {
    %c0_i32 = arith.constant 0 : i32
    %c0_i32_0 = arith.constant 0 : i32
    return %arg0, %c0_i32 : i32, i32
  }
  func.func @transform_1(%arg0: i32) -> (i32, i32) {
    %c0_i32 = arith.constant 0 : i32
    %c0_i32_0 = arith.constant 0 : i32
    %c0_i32_1 = arith.constant 0 : i32
    return %c0_i32, %c0_i32_0 : i32, i32
  }
  func.func @transform_2(%arg0: i32) -> (i32, i32) {
    %c0_i32 = arith.constant 0 : i32
    %c0_i32_0 = arith.constant 0 : i32
    return %arg0, %c0_i32 : i32, i32
  }
  func.func @transform_3(%arg0: i32) -> (i32, i32) {
    %c0_i32 = arith.constant 0 : i32
    %c0_i32_0 = arith.constant 0 : i32
    return %arg0, %c0_i32 : i32, i32
  }
}

module attributes {stable_mosaic.version = 11 : i64} {
  func.func @bn_relu_kernel(%arg0: i32, %arg1: memref<256x8xf32, #tpu.memory_space<vmem>>, %arg2: memref<16x8xf32, #tpu.memory_space<vmem>>, %arg3: memref<1x8xf32, #tpu.memory_space<vmem>>, %arg4: memref<1x8xf32, #tpu.memory_space<vmem>>, %arg5: memref<256x8xbf16, #tpu.memory_space<vmem>>) attributes {dimension_semantics = [#tpu.dimension_semantics<parallel>], iteration_bounds = array<i64: 2>, scalar_prefetch = 0 : i64, scratch_operands = 0 : i64, tpu.core_type = #tpu.core_type<tc>, window_params = [{transform_indices = @transform_0, window_bounds = array<i64: 256, 8>}, {pipeline_mode = #tpu.pipeline_mode<synchronous>, transform_indices = @transform_1, window_bounds = array<i64: 16, 8>}, {pipeline_mode = #tpu.pipeline_mode<synchronous>, transform_indices = @transform_2, window_bounds = array<i64: 1, 8>}, {pipeline_mode = #tpu.pipeline_mode<synchronous>, transform_indices = @transform_3, window_bounds = array<i64: 1, 8>}, {transform_indices = @transform_4, window_bounds = array<i64: 256, 8>}]} {
    %cst = arith.constant 0.000000e+00 : f32
    %0 = vector.broadcast %cst : f32 to vector<1x8xf32>
    %cst_0 = arith.constant 0.000000e+00 : f32
    %1 = vector.broadcast %cst_0 : f32 to vector<1x8xf32>
    %c0 = arith.constant 0 : index
    %c0_1 = arith.constant 0 : index
    %2 = vector.load %arg2[%c0, %c0_1] : memref<16x8xf32, #tpu.memory_space<vmem>>, vector<1x8xf32>
    %3 = arith.addf %0, %2 : vector<1x8xf32>
    %c1 = arith.constant 1 : index
    %c0_2 = arith.constant 0 : index
    %4 = vector.load %arg2[%c1, %c0_2] : memref<16x8xf32, #tpu.memory_space<vmem>>, vector<1x8xf32>
    %5 = arith.addf %1, %4 : vector<1x8xf32>
    %c8 = arith.constant 8 : index
    %c0_3 = arith.constant 0 : index
    %6 = vector.load %arg2[%c8, %c0_3] : memref<16x8xf32, #tpu.memory_space<vmem>>, vector<1x8xf32>
    %7 = arith.addf %3, %6 : vector<1x8xf32>
    %c9 = arith.constant 9 : index
    %c0_4 = arith.constant 0 : index
    %8 = vector.load %arg2[%c9, %c0_4] : memref<16x8xf32, #tpu.memory_space<vmem>>, vector<1x8xf32>
    %9 = arith.addf %5, %8 : vector<1x8xf32>
    %cst_5 = arith.constant 2.958580e-03 : f32
    %10 = vector.broadcast %cst_5 : f32 to vector<1x8xf32>
    %11 = arith.mulf %7, %10 : vector<1x8xf32>
    %cst_6 = arith.constant 2.958580e-03 : f32
    %12 = vector.broadcast %cst_6 : f32 to vector<1x8xf32>
    %13 = arith.mulf %9, %12 : vector<1x8xf32>
    %14 = arith.mulf %11, %11 : vector<1x8xf32>
    %15 = arith.subf %13, %14 : vector<1x8xf32>
    %cst_7 = arith.constant 0.000000e+00 : f32
    %16 = vector.broadcast %cst_7 : f32 to vector<1x8xf32>
    %17 = arith.maximumf %15, %16 : vector<1x8xf32>
    %c0_8 = arith.constant 0 : index
    %c0_9 = arith.constant 0 : index
    %18 = vector.load %arg3[%c0_8, %c0_9] : memref<1x8xf32, #tpu.memory_space<vmem>>, vector<1x8xf32>
    %cst_10 = arith.constant 9.99999974E-6 : f32
    %19 = vector.broadcast %cst_10 : f32 to vector<1x8xf32>
    %20 = arith.addf %17, %19 : vector<1x8xf32>
    %21 = math.rsqrt %20 : vector<1x8xf32>
    %22 = arith.mulf %18, %21 : vector<1x8xf32>
    %c0_11 = arith.constant 0 : index
    %c0_12 = arith.constant 0 : index
    %23 = vector.load %arg4[%c0_11, %c0_12] : memref<1x8xf32, #tpu.memory_space<vmem>>, vector<1x8xf32>
    %24 = arith.mulf %11, %22 : vector<1x8xf32>
    %25 = arith.subf %23, %24 : vector<1x8xf32>
    %c0_13 = arith.constant 0 : index
    %c0_14 = arith.constant 0 : index
    %26 = vector.load %arg1[%c0_13, %c0_14] : memref<256x8xf32, #tpu.memory_space<vmem>>, vector<256x8xf32>
    %27 = vector.broadcast %22 : vector<1x8xf32> to vector<256x8xf32>
    %28 = arith.mulf %26, %27 : vector<256x8xf32>
    %29 = vector.broadcast %25 : vector<1x8xf32> to vector<256x8xf32>
    %30 = arith.addf %28, %29 : vector<256x8xf32>
    %cst_15 = arith.constant 0.000000e+00 : f32
    %31 = vector.broadcast %cst_15 : f32 to vector<256x8xf32>
    %32 = arith.maximumf %30, %31 : vector<256x8xf32>
    %33 = arith.truncf %32 : vector<256x8xf32> to vector<256x8xbf16>
    %c0_16 = arith.constant 0 : index
    %c0_17 = arith.constant 0 : index
    %34 = vector.load %arg5[%c0_16, %c0_17] : memref<256x8xbf16, #tpu.memory_space<vmem>>, vector<256x8xbf16>
    tpu.vector_store %arg5[%c0_16, %c0_17], %33 {strides = array<i32>} : memref<256x8xbf16, #tpu.memory_space<vmem>>, vector<256x8xbf16>,
    return
  }
  func.func @transform_0(%arg0: i32) -> (i32, i32) {
    %c0_i32 = arith.constant 0 : i32
    %c0_i32_0 = arith.constant 0 : i32
    return %arg0, %c0_i32 : i32, i32
  }
  func.func @transform_1(%arg0: i32) -> (i32, i32) {
    %c0_i32 = arith.constant 0 : i32
    %c0_i32_0 = arith.constant 0 : i32
    %c0_i32_1 = arith.constant 0 : i32
    return %c0_i32, %c0_i32_0 : i32, i32
  }
  func.func @transform_2(%arg0: i32) -> (i32, i32) {
    %c0_i32 = arith.constant 0 : i32
    %c0_i32_0 = arith.constant 0 : i32
    %c0_i32_1 = arith.constant 0 : i32
    return %c0_i32, %c0_i32_0 : i32, i32
  }
  func.func @transform_3(%arg0: i32) -> (i32, i32) {
    %c0_i32 = arith.constant 0 : i32
    %c0_i32_0 = arith.constant 0 : i32
    %c0_i32_1 = arith.constant 0 : i32
    return %c0_i32, %c0_i32_0 : i32, i32
  }
  func.func @transform_4(%arg0: i32) -> (i32, i32) {
    %c0_i32 = arith.constant 0 : i32
    %c0_i32_0 = arith.constant 0 : i32
    return %arg0, %c0_i32 : i32, i32
  }
}

module attributes {stable_mosaic.version = 11 : i64} {
  func.func @phase_matmul_sigmoid_kernel(%arg0: i32, %arg1: memref<4x32xbf16, #tpu.memory_space<vmem>>, %arg2: memref<1x1xf32, #tpu.memory_space<smem>>, %arg3: memref<512x32xbf16, #tpu.memory_space<vmem>>, %arg4: memref<4x512xf32, #tpu.memory_space<vmem>>) attributes {dimension_semantics = [#tpu.dimension_semantics<parallel>], iteration_bounds = array<i64: 1>, scalar_prefetch = 0 : i64, scratch_operands = 0 : i64, tpu.core_type = #tpu.core_type<tc>, window_params = [{pipeline_mode = #tpu.pipeline_mode<synchronous>, transform_indices = @transform_0, window_bounds = array<i64: 4, 32>}, {transform_indices = @transform_1, window_bounds = array<i64: 1, 1>}, {transform_indices = @transform_2, window_bounds = array<i64: 512, 32>}, {transform_indices = @transform_3, window_bounds = array<i64: 4, 512>}]} {
    %c0 = arith.constant 0 : index
    %c0_0 = arith.constant 0 : index
    %0 = vector.load %arg1[%c0, %c0_0] : memref<4x32xbf16, #tpu.memory_space<vmem>>, vector<4x32xbf16>
    %c0_1 = arith.constant 0 : index
    %c0_2 = arith.constant 0 : index
    %1 = vector.load %arg3[%c0_1, %c0_2] : memref<512x32xbf16, #tpu.memory_space<vmem>>, vector<512x32xbf16>
    %2 = tpu.transpose %1, [1, 0] : vector<512x32xbf16> -> vector<32x512xbf16>
    %cst = arith.constant dense<0.000000e+00> : vector<4x512xf32>
    %3 = tpu.matmul %0, %2, %cst {dimension_numbers = #tpu.dot_dimension_numbers<[1], [0], [0], [1], [0, 0, 1, 1], [], []>} : vector<4x32xbf16>, vector<32x512xbf16>, vector<4x512xf32> -> vector<4x512xf32>
    %c0_3 = arith.constant 0 : index
    %c0_4 = arith.constant 0 : index
    %4 = memref.load %arg2[%c0_3, %c0_4] : memref<1x1xf32, #tpu.memory_space<smem>>
    %5 = vector.broadcast %4 : f32 to vector<4x512xf32>
    %6 = arith.addf %3, %5 : vector<4x512xf32>
    %cst_5 = arith.constant 0.000000e+00 : f32
    %7 = vector.broadcast %cst_5 : f32 to vector<4x512xf32>
    %8 = arith.subf %7, %6 : vector<4x512xf32>
    %9 = math.exp %8 : vector<4x512xf32>
    %cst_6 = arith.constant 1.000000e+00 : f32
    %10 = vector.broadcast %cst_6 : f32 to vector<4x512xf32>
    %11 = arith.addf %10, %9 : vector<4x512xf32>
    %12 = tpu.reciprocal %11 {approx = true} : vector<4x512xf32> -> vector<4x512xf32>
    %cst_7 = arith.constant 0.000000e+00 : f32
    %cst_8 = arith.constant 1.000000e+00 : f32
    %13 = vector.broadcast %cst_7 : f32 to vector<4x512xf32>
    %14 = arith.maximumf %13, %12 : vector<4x512xf32>
    %15 = vector.broadcast %cst_8 : f32 to vector<4x512xf32>
    %16 = arith.minimumf %15, %14 : vector<4x512xf32>
    %c0_9 = arith.constant 0 : index
    %c0_10 = arith.constant 0 : index
    %17 = vector.load %arg4[%c0_9, %c0_10] : memref<4x512xf32, #tpu.memory_space<vmem>>, vector<4x512xf32>
    tpu.vector_store %arg4[%c0_9, %c0_10], %16 {strides = array<i32>} : memref<4x512xf32, #tpu.memory_space<vmem>>, vector<4x512xf32>,
    return
  }
  func.func @transform_0(%arg0: i32) -> (i32, i32) {
    %c0_i32 = arith.constant 0 : i32
    %c0_i32_0 = arith.constant 0 : i32
    %c0_i32_1 = arith.constant 0 : i32
    return %c0_i32, %c0_i32_0 : i32, i32
  }
  func.func @transform_1(%arg0: i32) -> (i32, i32) {
    %c0_i32 = arith.constant 0 : i32
    %c0_i32_0 = arith.constant 0 : i32
    %c0_i32_1 = arith.constant 0 : i32
    return %c0_i32, %c0_i32_0 : i32, i32
  }
  func.func @transform_2(%arg0: i32) -> (i32, i32) {
    %c0_i32 = arith.constant 0 : i32
    %c0_i32_0 = arith.constant 0 : i32
    return %arg0, %c0_i32 : i32, i32
  }
  func.func @transform_3(%arg0: i32) -> (i32, i32) {
    %c0_i32 = arith.constant 0 : i32
    %c0_i32_0 = arith.constant 0 : i32
    return %c0_i32, %arg0 : i32, i32
  }
}

</mosaic_0001>

<bundles_post_ra>
// kernel: decoder_forward.6
= control target key start
LH: loop header
LB: loop body
LE: loop exit
PB: predicated region body
PF: predicated region fallthrough
CT: control target
= control target key end

     0   :  { %vm130_vm0 = vcmask 1043456   ;;  %v657_v2 = vmov 0   ;;  %vm126_vm1 = vcmask 64512   ;;  %v658_v28 = vmov 0.0   ;;  %s765_s1 = inlined_call_operand.vmem [shape: bf16[8,1568], index: 1, kind: input, shape index: {}]   ;;  %s766_s0 = inlined_call_operand.vmem [shape: f32[2,8], index: 0, kind: input, shape index: {}]   ;;  %s767_s2 = inlined_call_operand.vmem [shape: f32[1,1568], index: 2, kind: input, shape index: {}]   ;;  %s768_s3 = inlined_call_operand.vmem [shape: bf16[2,1568], index: 3, kind: output, shape index: {}]  }
   0x1   :  { %v17_v0 = vld [vmem:[%s765_s1] sm:$0xff]  ;;  %v18_v1 = vld [vmem:[%s765_s1 + $0x8] sm:$0xff]  ;;  %202 = vmatprep.mubr.bf16.mxu0 %v657_v2  ;;  %243 = vmatprep.mubr.bf16.mxu1 %v657_v2  ;;  %v19_v8 = vld [vmem:[%s765_s1 + $0x10] sm:$0xff]  ;;  %vm659_vm2 = vmmov 0   ;;  %v28_v30 = vlaneseq  ;;  %v660_v37 = vmov 1966171168  }
   0x2   :  { %v15_v3 = vld [vmem:[%s766_s0] sm:$0x3]  ;;  %v601_v4 = vcombine.high %v17_v0, %v17_v0  ;;  %v603_v5 = vcombine.high %v18_v1, %v18_v1  ;;  %v600_v6 = vcombine.low %v17_v0, %v17_v0  ;;  %v602_v7 = vcombine.low %v18_v1, %v18_v1  ;;  %v20_v9 = vld [vmem:[%s765_s1 + $0x18] sm:$0xff]  ;;  %v22_v18 = vld [vmem:[%s765_s1 + $0x28] sm:$0xff] }
   0x3   :  { %v605_v10 = vcombine.high %v19_v8, %v19_v8  ;;  %v604_v11 = vcombine.low %v19_v8, %v19_v8  ;;  %v607_v12 = vcombine.high %v20_v9, %v20_v9  ;;  %v16_v15 = vpack.c.bf16 %v15_v3, %v15_v3  ;;  %v21_v17 = vld [vmem:[%s765_s1 + $0x20] sm:$0xff]  ;;  %v656_v27 = vld [vmem:[%s765_s1 + $0x30] ss:$0 sps:$4 sm:$0xff]  }
   0x4   :  { %613 = vmatprep.subr.msk.bf16.mxu0 %vm130_vm0, %v601_v4  ;;  %615 = vmatprep.subr.msk.bf16.mxu1 %vm130_vm0, %v603_v5  ;;  %v132_v13 = vsel %vm130_vm0, %v600_v6, 0  ;;  %v138_v14 = vsel %vm130_vm0, %v602_v7, 0  ;;  %v606_v16 = vcombine.low %v20_v9, %v20_v9  ;;  %v609_v21 = vcombine.high %v21_v17, %v21_v17  ;;  %v24_v34 = vld [vmem:[%s767_s2] sm:$0xff] }
   0x5   :  { %171 = vmatpush1.bf16.msra.mxu0 %v132_v13  ;;  %212 = vmatpush1.bf16.msra.mxu1 %v138_v14  ;;  %v144_v19 = vsel %vm130_vm0, %v604_v11, 0  ;;  %v611_v22 = vcombine.high %v22_v18, %v22_v18  ;;  %v608_v23 = vcombine.low %v21_v17, %v21_v17  ;;  %v610_v24 = vcombine.low %v22_v18, %v22_v18 }
   0x6   :  { %617 = vmatprep.subr.msk.bf16.mxu0 %vm130_vm0, %v605_v10  ;;  %619 = vmatprep.subr.msk.bf16.mxu1 %vm130_vm0, %v607_v12  ;;  %v150_v20 = vsel %vm130_vm0, %v606_v16, 0  ;;  %v168_v29 = vsel %vm130_vm0, %v656_v27, 0  ;;  %v725_v31 = vshrl.u32 %v28_v30, 7  ;;  %v500_v38 = vunpack.c.l.s4 %v660_v37 }
   0x7   :  { %v156_v25 = vsel %vm130_vm0, %v608_v23, 0  ;;  %v162_v26 = vsel %vm130_vm0, %v610_v24, 0  ;;  %vm586_vm3 = vcmask 1040384   ;;  %vm587_vm4 = vcmask 1041409  }
   0x8   :  { %614 = vmatmul.mubr.msk.bf16.vlgmr.msra.gmra.mrb[0].mxu0 %vm126_vm1, %v16_v15  ;;  %616 = vmatmul.mubr.msk.bf16.vlgmr.msra.gmra.mrb[0].mxu1 %vm126_vm1, %v16_v15  ;;  %v30_v32 = vsub.s32 0, %v725_v31  ;;  %v38_v33 = vsub.s32 2, %v725_v31  ;;  %v34_v35 = vsub.s32 1, %v725_v31  ;;  %v42_v36 = vsub.s32 3, %v725_v31  ;;  %vm588_vm5 = vmor %vm587_vm4, %vm586_vm3 }
   0x9   :  { %253 = vmatpush1.bf16.msra.mxu0 %v144_v19  ;;  %294 = vmatpush1.bf16.msra.mxu1 %v150_v20  ;;  %v501_v45 = vunpack.c.0.s8 %v500_v38  ;;  %v46_v50 = vsub.s32 4, %v725_v31  ;;  %v54_v51 = vsub.s32 6, %v725_v31  ;;  %v50_v56 = vsub.s32 5, %v725_v31  ;;  %v25_v20 = vld [vmem:[%s767_s2 + $0x8] sm:$0x1f] }
   0xa   :  { %284 = vmatprep.mubr.bf16.mxu0 %v657_v2  ;;  %325 = vmatprep.mubr.bf16.mxu1 %v657_v2  ;;  %v31_v39 = vrot.slane %v24_v34, %v30_v32  ;;  %v39_v40 = vrot.slane %v24_v34, %v38_v33  ;;  %v35_v41 = vrot.slane %v24_v34, %v34_v35  ;;  %v58_v57 = vsub.s32 7, %v725_v31 }
   0xb   :  { %621 = vmatprep.subr.msk.bf16.mxu0 %vm130_vm0, %v609_v21  ;;  %623 = vmatprep.subr.msk.bf16.mxu1 %vm130_vm0, %v611_v22  ;;  %v43_v42 = vrot.slane %v24_v34, %v42_v36  ;;  %v739_v63 = vsub.s32 %v501_v45, %v725_v31  ;;  %v47_v1 = vrot.slane %v24_v34, %v46_v50  ;;  %vm589_vm6 = vcmask 1042434  }
   0xc   :  { %v51_v5 = vrot.slane %v24_v34, %v50_v56  ;;  %v59_v6 = vrot.slane %v24_v34, %v58_v57  ;;  %v63_v27 = vrot.slane %v25_v20, %v30_v32  ;;  %v75_v37 = vrot.slane %v25_v20, %v42_v36  ;;  %vm590_vm7 = vmor %vm589_vm6, %vm588_vm5 }
   0xd   :  { %v79_v56 = vrot.slane %v25_v20, %v46_v50  ;;  %vm591_vm8 = vcmask 1043459   ;;  %vm593_vm10 = vcmask 258052  }
   0xe   :  { %vm592_vm9 = vmor %vm591_vm8, %vm590_vm7 }
   0xf   :  { %vm594_vm11 = vmor %vm593_vm10, %vm592_vm9 }
  0x10   :  { %618 = vmatmul.mubr.msk.bf16.vlgmr.msra.gmra.mrb[4].mxu0 %vm126_vm1, %v16_v15  ;;  %620 = vmatmul.mubr.msk.bf16.vlgmr.msra.gmra.mrb[4].mxu1 %vm126_vm1, %v16_v15 }
  0x11   :  { %335 = vmatpush1.bf16.msra.mxu0 %v156_v25  ;;  %376 = vmatpush1.bf16.msra.mxu1 %v162_v26 }
  0x12   :  { %366 = vmatprep.mubr.bf16.mxu0 %v657_v2  ;;  %407 = vmatprep.mubr.bf16.mxu1 %v657_v2  ;;  %v55_v2 = vrot.slane %v24_v34, %v54_v51  ;;  %v67_v34 = vrot.slane %v25_v20, %v34_v35 }
  0x13   :  { %634 = vmatprep.subr.bf16.mxu0 %v658_v28 }
  0x18   :  { %622 = vmatmul.mubr.msk.bf16.vlgmr.msra.gmra.mrb[8].mxu0 %vm126_vm1, %v16_v15  ;;  %624 = vmatmul.mubr.msk.bf16.vlgmr.msra.gmra.mrb[8].mxu1 %vm126_vm1, %v16_v15 }
  0x19   :  { %635 = vmatpush3.bf16.msra.mxu0 %v168_v29  ;;  %636 = vmatprep.mubr.msk.bf16.mxu0 %vm659_vm2, %v658_v28  ;;  %v71_v28 = vrot.slane %v25_v20, %v38_v33 }
  0x20   :  { %637 = vmatmul.mubr.msk.bf16.vlgmr.msra.gmra.mrb[12].mxu0 %vm126_vm1, %v16_v15 }
  0xdb   :  { %v204_v43 = vpop.f32.mrb[0].mxu0  ;;  %v245_v44 = vpop.f32.mrb[0].mxu1 }
  0xdc   :  { %v205_v46 = vadd.f32 %v204_v43, %v31_v39  ;;  %v246_v47 = vadd.f32 %v245_v44, %v39_v40  ;;  %v206_v48 = vpop.f32.mrb[1].mxu0  ;;  %v247_v49 = vpop.f32.mrb[1].mxu1 }
  0xdd   :  { %v207_v52 = vadd.f32 %v206_v48, %v35_v41  ;;  %v248_v53 = vadd.f32 %v247_v49, %v43_v42  ;;  %v208_v54 = vpop.f32.mrb[2].mxu0  ;;  %v249_v55 = vpop.f32.mrb[2].mxu1 }
  0xde   :  { %v456_v58 = vmax.f32 %v205_v46, 0.0  ;;  %v458_v59 = vmax.f32 %v246_v47, 0.0  ;;  %v209_v60 = vpop.f32.mrb[3].mxu0  ;;  %v250_v61 = vpop.f32.mrb[3].mxu1 }
  0xdf   :  { %v457_v62 = vmax.f32 %v207_v52, 0.0  ;;  %v459_v0 = vmax.f32 %v248_v53, 0.0 }
  0xe1   :  { %v626_v3 = vpack.c.bf16 %v457_v62, %v456_v58  ;;  %v627_v4 = vpack.c.bf16 %v459_v0, %v458_v59 }
  0xe3   :  { %v505_v7 = vrot.slane %v626_v3, %v739_v63  ;;  %v512_v8 = vrot.slane %v627_v4, %v739_v63  ;;  %v286_v9 = vpop.f32.mrb[4].mxu0  ;;  %v327_v10 = vpop.f32.mrb[4].mxu1 }
  0xe4   :  { %v287_v11 = vadd.f32 %v286_v9, %v47_v1  ;;  %v328_v12 = vadd.f32 %v327_v10, %v55_v2  ;;  %v288_v13 = vpop.f32.mrb[5].mxu0  ;;  %v329_v14 = vpop.f32.mrb[5].mxu1 }
  0xe5   :  { %v527_v15 = vcombine.low %v505_v7, %v512_v8  ;;  %v289_v16 = vadd.f32 %v288_v13, %v51_v5  ;;  %v330_v17 = vadd.f32 %v329_v14, %v59_v6  ;;  %v290_v18 = vpop.f32.mrb[6].mxu0  ;;  %v331_v19 = vpop.f32.mrb[6].mxu1 }
  0xe6   :  { %v460_v21 = vmax.f32 %v287_v11, 0.0  ;;  %v462_v22 = vmax.f32 %v328_v12, 0.0  ;;  %v291_v23 = vpop.f32.mrb[7].mxu0  ;;  %v332_v24 = vpop.f32.mrb[7].mxu1 }
  0xe7   :  { %v461_v25 = vmax.f32 %v289_v16, 0.0  ;;  %v463_v26 = vmax.f32 %v330_v17, 0.0  ;;  %v535_v36 = vrot.slane %v527_v15, %v739_v63 }
  0xe9   :  { %v628_v29 = vpack.c.bf16 %v461_v25, %v460_v21  ;;  %v629_v30 = vpack.c.bf16 %v463_v26, %v462_v22 }
  0xeb   :  { %v519_v38 = vrot.slane %v628_v29, %v739_v63  ;;  %v526_v39 = vrot.slane %v629_v30, %v739_v63  ;;  %v368_v40 = vpop.f32.mrb[8].mxu0  ;;  %v409_v41 = vpop.f32.mrb[8].mxu1 }
  0xec   :  { %v369_v42 = vadd.f32 %v368_v40, %v63_v27  ;;  %v410_v43 = vadd.f32 %v409_v41, %v71_v28  ;;  %v370_v44 = vpop.f32.mrb[9].mxu0  ;;  %v411_v45 = vpop.f32.mrb[9].mxu1 }
  0xed   :  { %v528_v46 = vcombine.low %v519_v38, %v526_v39  ;;  %v371_v47 = vadd.f32 %v370_v44, %v67_v34  ;;  %v412_v48 = vadd.f32 %v411_v45, %v75_v37  ;;  %v372_v49 = vpop.f32.mrb[10].mxu0  ;;  %v413_v32 = vpop.f32.mrb[10].mxu1 }
  0xee   :  { %v464_v33 = vmax.f32 %v369_v42, 0.0  ;;  %v466_v51 = vmax.f32 %v410_v43, 0.0  ;;  %v373_v52 = vpop.f32.mrb[11].mxu0  ;;  %v414_v35 = vpop.f32.mrb[11].mxu1 }
  0xef   :  { %v542_v53 = vrot.slane %v528_v46, %v739_v63  ;;  %v465_v54 = vmax.f32 %v371_v47, 0.0  ;;  %v467_v55 = vmax.f32 %v412_v48, 0.0 }
  0xf1   :  { %v543_v57 = vcombine.low %v535_v36, %v542_v53  ;;  %v630_v58 = vpack.c.bf16 %v465_v54, %v464_v33  ;;  %v631_v59 = vpack.c.bf16 %v467_v55, %v466_v51 }
  0xf3   :  { %585 = vst [vmem:[%s768_s3] sm:$0xff] %v543_v57  ;;  %v552_v60 = vrot.slane %v630_v58, %v739_v63  ;;  %v559_v61 = vrot.slane %v631_v59, %v739_v63  ;;  %v450_v62 = vpop.f32.mrb[12].mxu0 }
  0xf4   :  { %v451_v0 = vadd.f32 %v450_v62, %v79_v56  ;;  %v638_v1 = vpop.f32.mrb[13].mxu0 }
  0xf5   :  { %v567_v31 = vcombine.low %v552_v60, %v559_v61  ;;  %v453_v50 = vpop.f32.mrb[14].mxu0 }
  0xf6   :  { %v468_v2 = vmax.f32 %v451_v0, 0.0  ;;  %v639_v3 = vpop.f32.mrb[15].mxu0 }
  0xf7   :  { %v574_v6 = vrot.slane %v567_v31, %v739_v63 }
  0xf8   :  { %v481_v4 = vpack.c.bf16 %v468_v2, %v468_v2 }
  0xfa   :  { %v566_v5 = vrot.slane %v481_v4, %v739_v63 }
  0xfc   :  { %v581_v7 = vrot.slane %v566_v5, %v739_v63 }
  0xfe   :  { %v582_v8 = vcombine.low %v574_v6, %v581_v7 }
 0x100   :  { %595 = vst.msk [vmem:[%s768_s3 + $0x8] sm:$0x1f] %vm594_vm11, %v582_v8 }

// kernel: decoder_forward.8
= control target key start
LH: loop header
LB: loop body
LE: loop exit
PB: predicated region body
PF: predicated region fallthrough
CT: control target
= control target key end

     0   :  { %v59_v8 = vlaneseq  ;;  %vm246_vm0 = vcmask 125952   ;;  %s594_s1 = inlined_call_operand.vmem [shape: f32[8,16], index: 1, kind: input, shape index: {}]   ;;  %s595_s2 = inlined_call_operand.vmem [shape: f32[1,16], index: 2, kind: input, shape index: {}]   ;;  %s596_s0 = inlined_call_operand.vmem [shape: f32[200,16], index: 0, kind: input, shape index: {}]   ;;  %s597_s3 = inlined_call_operand.vmem [shape: f32[1,16], index: 3, kind: input, shape index: {}]   ;;  %s598_s4 = inlined_call_operand.vmem [shape: bf16[200,16], index: 4, kind: output, shape index: {}]  }
   0x1   :  { %v17_v0 = vld [vmem:[%s594_s1] sm:$0x1]  ;;  %v19_v1 = vld [vmem:[%s594_s1 + $0x1] sm:$0x1]  ;;  %v34_v16 = vld [vmem:[%s596_s0 + $0x8] sm:$0xff] }
   0x2   :  { %v21_v2 = vmul.f32 0.005, %v17_v0  ;;  %v22_v3 = vmul.f32 0.005, %v19_v1  ;;  %v60_v9 = vshrl.u32 %v59_v8, 7  ;;  %v33_v15 = vld [vmem:[%s596_s0] sm:$0xff] }
   0x3   :  { %v26_v10 = vld [vmem:[%s595_s2] sm:$0x1]  ;;  %v35_v17 = vld [vmem:[%s596_s0 + $0x10] sm:$0xff]  ;;  %v36_v18 = vld [vmem:[%s596_s0 + $0x18] sm:$0xff] }
   0x4   :  { %v23_v4 = vmul.f32 %v21_v2, %v21_v2  ;;  %v61_v11 = vsub.s32 0, %v60_v9  ;;  %v30_v14 = vld [vmem:[%s597_s3] sm:$0x1]  ;;  %v38_v22 = vld [vmem:[%s596_s0 + $0x28] sm:$0xff]  ;;  %v39_v23 = vld [vmem:[%s596_s0 + $0x30] sm:$0xff] }
   0x5   :  { %v37_v19 = vld [vmem:[%s596_s0 + $0x20] sm:$0xff]  ;;  %v40_v24 = vld [vmem:[%s596_s0 + $0x38] sm:$0xff]  ;;  %v42_v26 = vld [vmem:[%s596_s0 + $0x48] sm:$0xff] }
   0x6   :  { %v24_v5 = vsub.f32 %v22_v3, %v23_v4  ;;  %v41_v25 = vld [vmem:[%s596_s0 + $0x40] sm:$0xff]  ;;  %v43_v27 = vld [vmem:[%s596_s0 + $0x50] sm:$0xff]  ;;  %v44_v32 = vld [vmem:[%s596_s0 + $0x58] sm:$0xff] }
   0x7   :  { %v45_v33 = vld [vmem:[%s596_s0 + $0x60] sm:$0xff]  ;;  %v46_v34 = vld [vmem:[%s596_s0 + $0x68] sm:$0xff]  ;;  %v47_v3 = vld [vmem:[%s596_s0 + $0x70] sm:$0xff] }
   0x8   :  { %v25_v6 = vmax.f32 %v24_v5, 0.0  ;;  %v48_v4 = vld [vmem:[%s596_s0 + $0x78] sm:$0xff] }
   0xa   :  { %v27_v7 = vadd.f32 1e-05, %v25_v6 }
   0xc   :  { %326 = vrsqrt.f32 %v27_v7 }
  0x16   :  { %v327_v12 = vpop.eup %326 }
  0x17   :  { %v29_v13 = vmul.f32 %v327_v12, %v26_v10 }
  0x19   :  { %v31_v20 = vmul.f32 %v29_v13, %v21_v2  ;;  %v380_v21 = vrot.slane %v29_v13, %v61_v11 }
  0x1b   :  { %v32_v28 = vsub.f32 %v30_v14, %v31_v20  ;;  %v64_v29 = vmul.f32 %v380_v21, %v33_v15  ;;  %v65_v30 = vmul.f32 %v380_v21, %v34_v16  ;;  %v66_v31 = vmul.f32 %v380_v21, %v35_v17 }
  0x1c   :  { %v67_v35 = vmul.f32 %v380_v21, %v36_v18  ;;  %v68_v36 = vmul.f32 %v380_v21, %v37_v19  ;;  %v69_v37 = vmul.f32 %v380_v21, %v38_v22  ;;  %v70_v38 = vmul.f32 %v380_v21, %v39_v23  ;;  %v49_v22 = vld [vmem:[%s596_s0 + $0x80] sm:$0xff] }
  0x1d   :  { %v416_v39 = vrot.slane %v32_v28, %v61_v11  ;;  %v71_v40 = vmul.f32 %v380_v21, %v40_v24  ;;  %v72_v41 = vmul.f32 %v380_v21, %v41_v25  ;;  %v73_v42 = vmul.f32 %v380_v21, %v42_v26  ;;  %v51_v28 = vld [vmem:[%s596_s0 + $0x90] sm:$0xff] }
  0x1e   :  { %v74_v43 = vmul.f32 %v380_v21, %v43_v27  ;;  %v75_v44 = vmul.f32 %v380_v21, %v44_v32  ;;  %v76_v45 = vmul.f32 %v380_v21, %v45_v33  ;;  %v77_v46 = vmul.f32 %v380_v21, %v46_v34  ;;  %v50_v27 = vld [vmem:[%s596_s0 + $0x88] sm:$0xff]  ;;  %v53_v34 = vld [vmem:[%s596_s0 + $0xa0] sm:$0xff] }
  0x1f   :  { %v95_v47 = vadd.f32 %v416_v39, %v64_v29  ;;  %v96_v48 = vadd.f32 %v416_v39, %v65_v30  ;;  %v97_v49 = vadd.f32 %v416_v39, %v66_v31  ;;  %v98_v50 = vadd.f32 %v416_v39, %v67_v35  ;;  %v52_v29 = vld [vmem:[%s596_s0 + $0x98] sm:$0xff]  ;;  %v54_v35 = vld [vmem:[%s596_s0 + $0xa8] sm:$0xff] }
  0x20   :  { %v99_v51 = vadd.f32 %v416_v39, %v68_v36  ;;  %v100_v52 = vadd.f32 %v416_v39, %v69_v37  ;;  %v101_v53 = vadd.f32 %v416_v39, %v70_v38  ;;  %v102_v54 = vadd.f32 %v416_v39, %v71_v40 }
  0x21   :  { %v120_v55 = vmax.f32 %v95_v47, 0.0  ;;  %v121_v56 = vmax.f32 %v96_v48, 0.0  ;;  %v122_v57 = vmax.f32 %v97_v49, 0.0  ;;  %v123_v58 = vmax.f32 %v98_v50, 0.0 }
  0x22   :  { %v124_v59 = vmax.f32 %v99_v51, 0.0  ;;  %v125_v60 = vmax.f32 %v100_v52, 0.0  ;;  %v126_v61 = vmax.f32 %v101_v53, 0.0  ;;  %v127_v62 = vmax.f32 %v102_v54, 0.0 }
  0x23   :  { %v301_v63 = vpack.c.bf16 %v120_v55, %v120_v55  ;;  %v302_v0 = vpack.c.bf16 %v121_v56, %v121_v56  ;;  %v303_v1 = vpack.c.bf16 %v122_v57, %v122_v57  ;;  %v304_v2 = vpack.c.bf16 %v123_v58, %v123_v58 }
  0x24   :  { %v305_v5 = vpack.c.bf16 %v124_v59, %v124_v59  ;;  %v306_v6 = vpack.c.bf16 %v125_v60, %v125_v60  ;;  %v307_v7 = vpack.c.bf16 %v126_v61, %v126_v61  ;;  %v308_v8 = vpack.c.bf16 %v127_v62, %v127_v62 }
  0x25   :  { %247 = vst.msk [vmem:[%s598_s4] sm:$0xf] %vm246_vm0, %v301_v63  ;;  %248 = vst.msk [vmem:[%s598_s4 + $0x4] sm:$0xf] %vm246_vm0, %v302_v0  ;;  %v103_v9 = vadd.f32 %v416_v39, %v72_v41  ;;  %v104_v10 = vadd.f32 %v416_v39, %v73_v42  ;;  %v105_v11 = vadd.f32 %v416_v39, %v74_v43 }
  0x26   :  { %249 = vst.msk [vmem:[%s598_s4 + $0x8] sm:$0xf] %vm246_vm0, %v303_v1  ;;  %250 = vst.msk [vmem:[%s598_s4 + $0xc] sm:$0xf] %vm246_vm0, %v304_v2  ;;  %v106_v12 = vadd.f32 %v416_v39, %v75_v44  ;;  %v107_v13 = vadd.f32 %v416_v39, %v76_v45  ;;  %v108_v14 = vadd.f32 %v416_v39, %v77_v46  ;;  %v55_v45 = vld [vmem:[%s596_s0 + $0xb0] sm:$0xff]  ;;  %v56_v46 = vld [vmem:[%s596_s0 + $0xb8] sm:$0xff] }
  0x27   :  { %251 = vst.msk [vmem:[%s598_s4 + $0x10] sm:$0xf] %vm246_vm0, %v305_v5  ;;  %252 = vst.msk [vmem:[%s598_s4 + $0x14] sm:$0xf] %vm246_vm0, %v306_v6  ;;  %v78_v15 = vmul.f32 %v380_v21, %v47_v3  ;;  %v79_v16 = vmul.f32 %v380_v21, %v48_v4  ;;  %v128_v17 = vmax.f32 %v103_v9, 0.0  ;;  %v129_v18 = vmax.f32 %v104_v10, 0.0 }
  0x28   :  { %253 = vst.msk [vmem:[%s598_s4 + $0x18] sm:$0xf] %vm246_vm0, %v307_v7  ;;  %254 = vst.msk [vmem:[%s598_s4 + $0x1c] sm:$0xf] %vm246_vm0, %v308_v8  ;;  %v130_v19 = vmax.f32 %v105_v11, 0.0  ;;  %v131_v20 = vmax.f32 %v106_v12, 0.0  ;;  %v80_v41 = vmul.f32 %v380_v21, %v49_v22  ;;  %v81_v42 = vmul.f32 %v380_v21, %v50_v27 }
  0x29   :  { %v132_v23 = vmax.f32 %v107_v13, 0.0  ;;  %v133_v24 = vmax.f32 %v108_v14, 0.0  ;;  %v109_v25 = vadd.f32 %v416_v39, %v78_v15  ;;  %v110_v26 = vadd.f32 %v416_v39, %v79_v16  ;;  %v57_v3 = vld [vmem:[%s596_s0 + $0xc0] sm:$0xff] }
  0x2a   :  { %v309_v30 = vpack.c.bf16 %v128_v17, %v128_v17  ;;  %v310_v31 = vpack.c.bf16 %v129_v18, %v129_v18  ;;  %v311_v32 = vpack.c.bf16 %v130_v19, %v130_v19  ;;  %v312_v33 = vpack.c.bf16 %v131_v20, %v131_v20 }
  0x2b   :  { %v313_v36 = vpack.c.bf16 %v132_v23, %v132_v23  ;;  %v314_v37 = vpack.c.bf16 %v133_v24, %v133_v24  ;;  %v134_v38 = vmax.f32 %v109_v25, 0.0  ;;  %v135_v40 = vmax.f32 %v110_v26, 0.0 }
  0x2c   :  { %255 = vst.msk [vmem:[%s598_s4 + $0x20] sm:$0xf] %vm246_vm0, %v309_v30  ;;  %256 = vst.msk [vmem:[%s598_s4 + $0x24] sm:$0xf] %vm246_vm0, %v310_v31  ;;  %v82_v43 = vmul.f32 %v380_v21, %v51_v28  ;;  %v83_v44 = vmul.f32 %v380_v21, %v52_v29  ;;  %v84_v49 = vmul.f32 %v380_v21, %v53_v34 }
  0x2d   :  { %257 = vst.msk [vmem:[%s598_s4 + $0x28] sm:$0xf] %vm246_vm0, %v311_v32  ;;  %258 = vst.msk [vmem:[%s598_s4 + $0x2c] sm:$0xf] %vm246_vm0, %v312_v33  ;;  %v315_v47 = vpack.c.bf16 %v134_v38, %v134_v38  ;;  %v316_v48 = vpack.c.bf16 %v135_v40, %v135_v40  ;;  %v85_v50 = vmul.f32 %v380_v21, %v54_v35 }
  0x2e   :  { %259 = vst.msk [vmem:[%s598_s4 + $0x30] sm:$0xf] %vm246_vm0, %v313_v36  ;;  %260 = vst.msk [vmem:[%s598_s4 + $0x34] sm:$0xf] %vm246_vm0, %v314_v37  ;;  %v111_v51 = vadd.f32 %v416_v39, %v80_v41  ;;  %v112_v52 = vadd.f32 %v416_v39, %v81_v42  ;;  %v113_v53 = vadd.f32 %v416_v39, %v82_v43 }
  0x2f   :  { %v114_v54 = vadd.f32 %v416_v39, %v83_v44  ;;  %261 = vst.msk [vmem:[%s598_s4 + $0x38] sm:$0xf] %vm246_vm0, %v315_v47  ;;  %262 = vst.msk [vmem:[%s598_s4 + $0x3c] sm:$0xf] %vm246_vm0, %v316_v48  ;;  %v115_v55 = vadd.f32 %v416_v39, %v84_v49  ;;  %v116_v56 = vadd.f32 %v416_v39, %v85_v50 }
  0x30   :  { %v86_v57 = vmul.f32 %v380_v21, %v55_v45  ;;  %v87_v58 = vmul.f32 %v380_v21, %v56_v46  ;;  %v136_v59 = vmax.f32 %v111_v51, 0.0  ;;  %v137_v60 = vmax.f32 %v112_v52, 0.0 }
  0x31   :  { %v138_v61 = vmax.f32 %v113_v53, 0.0  ;;  %v139_v62 = vmax.f32 %v114_v54, 0.0  ;;  %v140_v63 = vmax.f32 %v115_v55, 0.0  ;;  %v141_v0 = vmax.f32 %v116_v56, 0.0 }
  0x32   :  { %v117_v1 = vadd.f32 %v416_v39, %v86_v57  ;;  %v118_v2 = vadd.f32 %v416_v39, %v87_v58  ;;  %v317_v4 = vpack.c.bf16 %v136_v59, %v136_v59  ;;  %v318_v5 = vpack.c.bf16 %v137_v60, %v137_v60 }
  0x33   :  { %v319_v6 = vpack.c.bf16 %v138_v61, %v138_v61  ;;  %v320_v7 = vpack.c.bf16 %v139_v62, %v139_v62  ;;  %v321_v8 = vpack.c.bf16 %v140_v63, %v140_v63  ;;  %v322_v9 = vpack.c.bf16 %v141_v0, %v141_v0 }
  0x34   :  { %v142_v10 = vmax.f32 %v117_v1, 0.0  ;;  %v143_v11 = vmax.f32 %v118_v2, 0.0  ;;  %263 = vst.msk [vmem:[%s598_s4 + $0x40] sm:$0xf] %vm246_vm0, %v317_v4  ;;  %264 = vst.msk [vmem:[%s598_s4 + $0x44] sm:$0xf] %vm246_vm0, %v318_v5  ;;  %v88_v12 = vmul.f32 %v380_v21, %v57_v3 }
  0x35   :  { %265 = vst.msk [vmem:[%s598_s4 + $0x48] sm:$0xf] %vm246_vm0, %v319_v6  ;;  %266 = vst.msk [vmem:[%s598_s4 + $0x4c] sm:$0xf] %vm246_vm0, %v320_v7 }
  0x36   :  { %267 = vst.msk [vmem:[%s598_s4 + $0x50] sm:$0xf] %vm246_vm0, %v321_v8  ;;  %268 = vst.msk [vmem:[%s598_s4 + $0x54] sm:$0xf] %vm246_vm0, %v322_v9  ;;  %v323_v13 = vpack.c.bf16 %v142_v10, %v142_v10  ;;  %v324_v14 = vpack.c.bf16 %v143_v11, %v143_v11  ;;  %v119_v15 = vadd.f32 %v416_v39, %v88_v12 }
  0x38   :  { %269 = vst.msk [vmem:[%s598_s4 + $0x58] sm:$0xf] %vm246_vm0, %v323_v13  ;;  %270 = vst.msk [vmem:[%s598_s4 + $0x5c] sm:$0xf] %vm246_vm0, %v324_v14  ;;  %v144_v21 = vmax.f32 %v119_v15, 0.0 }
  0x3a   :  { %v325_v16 = vpack.c.bf16 %v144_v21, %v144_v21 }
  0x3c   :  { %271 = vst.msk [vmem:[%s598_s4 + $0x60] sm:$0xf] %vm246_vm0, %v325_v16 }

// kernel: decoder_forward.7
= control target key start
LH: loop header
LB: loop body
LE: loop exit
PB: predicated region body
PF: predicated region fallthrough
CT: control target
= control target key end

     0   :  { %vm846_vm0 = vcmask 130048   ;;  %vm927_vm1 = vcmask 122880   ;;  %s1820_s1 = inlined_call_operand.vmem [shape: bf16[512,16], index: 1, kind: input, shape index: {}]   ;;  %s1821_s0 = inlined_call_operand.vmem [shape: bf16[200,512], index: 0, kind: input, shape index: {}]   ;;  %s1822_s2 = inlined_call_operand.vmem [shape: f32[200,16], index: 2, kind: output, shape index: {0}]   ;;  %s1823_s3 = inlined_call_operand.vmem [shape: f32[8,16], index: 3, kind: output, shape index: {1}]  }
   0x1   :  { %v1290_v0 = vld [vmem:[%s1820_s1 + $0x40] sm:$0xff]   ;;  %v1294_v4 = vld [vmem:[%s1820_s1 + $0x48] sm:$0xff]   ;;  %v1298_v8 = vld [vmem:[%s1820_s1 + $0x50] sm:$0xff]  }
   0x2   :  { %v1291_v1 = vld [vmem:[%s1820_s1 + $0xc0] sm:$0xff]   ;;  %1102 = vmatprep.subr.bf16.mxu0 %v1290_v0  ;;  %v1295_v5 = vld [vmem:[%s1820_s1 + $0xc8] sm:$0xff]   ;;  %v1299_v9 = vld [vmem:[%s1820_s1 + $0xd0] sm:$0xff]  }
   0x3   :  { %v1292_v2 = vld [vmem:[%s1820_s1] sm:$0xff]   ;;  %1196 = vmatprep.subr.bf16.mxu1 %v1291_v1  ;;  %v1296_v6 = vld [vmem:[%s1820_s1 + $0x8] sm:$0xff]   ;;  %v1300_v10 = vld [vmem:[%s1820_s1 + $0x10] sm:$0xff]  }
   0x4   :  { %v1293_v3 = vld [vmem:[%s1820_s1 + $0x80] sm:$0xff]   ;;  %1103 = vmatpush3.bf16.msra.mxu0 %v1292_v2  ;;  %v1297_v7 = vld [vmem:[%s1820_s1 + $0x88] sm:$0xff]   ;;  %v1301_v11 = vld [vmem:[%s1820_s1 + $0x90] sm:$0xff]  }
   0x5   :  { %1197 = vmatpush3.bf16.msra.mxu1 %v1293_v3  ;;  %1104 = vmatprep.subr.bf16.mxu0 %v1294_v4  ;;  %v1302_v12 = vld [vmem:[%s1820_s1 + $0x58] sm:$0xff]   ;;  %v1306_v16 = vld [vmem:[%s1820_s1 + $0x60] sm:$0xff]   ;;  %v1310_v20 = vld [vmem:[%s1820_s1 + $0x68] sm:$0xff]  }
   0x6   :  { %1198 = vmatprep.subr.bf16.mxu1 %v1295_v5  ;;  %v1303_v13 = vld [vmem:[%s1820_s1 + $0xd8] sm:$0xff]   ;;  %v1307_v17 = vld [vmem:[%s1820_s1 + $0xe0] sm:$0xff]   ;;  %v1311_v21 = vld [vmem:[%s1820_s1 + $0xe8] sm:$0xff]  }
   0x7   :  { %v1304_v14 = vld [vmem:[%s1820_s1 + $0x18] sm:$0xff]   ;;  %v1308_v18 = vld [vmem:[%s1820_s1 + $0x20] sm:$0xff]   ;;  %v1312_v22 = vld [vmem:[%s1820_s1 + $0x28] sm:$0xff]  }
   0x8   :  { %1105 = vmatpush3.bf16.msra.mxu0 %v1296_v6  ;;  %v1305_v15 = vld [vmem:[%s1820_s1 + $0x98] sm:$0xff]   ;;  %v1309_v19 = vld [vmem:[%s1820_s1 + $0xa0] sm:$0xff]   ;;  %v1313_v23 = vld [vmem:[%s1820_s1 + $0xa8] sm:$0xff]  }
   0x9   :  { %1199 = vmatpush3.bf16.msra.mxu1 %v1297_v7  ;;  %1106 = vmatprep.subr.bf16.mxu0 %v1298_v8  ;;  %v1314_v24 = vld [vmem:[%s1820_s1 + $0x70] sm:$0xff]   ;;  %v1318_v28 = vld [vmem:[%s1820_s1 + $0x78] sm:$0xff]  }
   0xa   :  { %1200 = vmatprep.subr.bf16.mxu1 %v1299_v9  ;;  %v1315_v25 = vld [vmem:[%s1820_s1 + $0xf0] sm:$0xff]   ;;  %v1319_v29 = vld [vmem:[%s1820_s1 + $0xf8] sm:$0xff]  }
   0xb   :  { %v1316_v26 = vld [vmem:[%s1820_s1 + $0x30] sm:$0xff]   ;;  %v1320_v30 = vld [vmem:[%s1820_s1 + $0x38] sm:$0xff]  }
   0xc   :  { %1107 = vmatpush3.bf16.msra.mxu0 %v1300_v10  ;;  %v1317_v27 = vld [vmem:[%s1820_s1 + $0xb0] sm:$0xff]   ;;  %v1321_v31 = vld [vmem:[%s1820_s1 + $0xb8] sm:$0xff]  }
   0xd   :  { %1201 = vmatpush3.bf16.msra.mxu1 %v1301_v11  ;;  %1108 = vmatprep.subr.bf16.mxu0 %v1302_v12  ;;  %v1322_v32 = vld [vmem:[%s1821_s0] ss:$16 sps:$4 sm:$0xff]   ;;  %v1324_v33 = vld [vmem:[%s1821_s0 + $0x4] ss:$16 sps:$4 sm:$0xff]   ;;  %v1325_v34 = vld [vmem:[%s1821_s0 + $0x8] ss:$16 sps:$4 sm:$0xff]  }
   0xe   :  { %1202 = vmatprep.subr.bf16.mxu1 %v1303_v13  ;;  %v1327_v35 = vld [vmem:[%s1821_s0 + $0xc] ss:$16 sps:$4 sm:$0xff]   ;;  %606 = vmatprep.mubr.bf16.mxu0 %v1324_v33  ;;  %v1328_v36 = vld [vmem:[%s1821_s0 + $0x24] ss:$16 sps:$4 sm:$0xff]   ;;  %v1332_v38 = vld [vmem:[%s1821_s0 + $0x20] ss:$16 sps:$4 sm:$0xff]  }
   0xf   :  { %742 = vmatprep.mubr.bf16.mxu1 %v1327_v35  ;;  %v1330_v37 = vld [vmem:[%s1821_s0 + $0x2c] ss:$16 sps:$4 sm:$0xff]   ;;  %v1333_v39 = vld [vmem:[%s1821_s0 + $0x28] ss:$16 sps:$4 sm:$0xff]   ;;  %v1334_v40 = vld [vmem:[%s1821_s0 + $0x44] ss:$16 sps:$4 sm:$0xff]  }
  0x10   :  { %1109 = vmatpush3.bf16.msra.mxu0 %v1304_v14  ;;  %v1336_v41 = vld [vmem:[%s1821_s0 + $0x4c] ss:$16 sps:$4 sm:$0xff]   ;;  %v1338_v42 = vld [vmem:[%s1821_s0 + $0x40] ss:$16 sps:$4 sm:$0xff]   ;;  %v1339_v43 = vld [vmem:[%s1821_s0 + $0x48] ss:$16 sps:$4 sm:$0xff]  }
  0x11   :  { %1203 = vmatpush3.bf16.msra.mxu1 %v1305_v15  ;;  %1110 = vmatprep.subr.bf16.mxu0 %v1306_v16  ;;  %v1340_v44 = vld [vmem:[%s1821_s0 + $0x64] ss:$16 sps:$4 sm:$0xff]   ;;  %v1342_v45 = vld [vmem:[%s1821_s0 + $0x6c] ss:$16 sps:$4 sm:$0xff]   ;;  %v1344_v46 = vld [vmem:[%s1821_s0 + $0x60] ss:$16 sps:$4 sm:$0xff]  }
  0x12   :  { %1204 = vmatprep.subr.bf16.mxu1 %v1307_v17  ;;  %v1345_v47 = vld [vmem:[%s1821_s0 + $0x68] ss:$16 sps:$4 sm:$0xff]   ;;  %v1346_v48 = vld [vmem:[%s1821_s0 + $0x84] ss:$16 sps:$4 sm:$0xff]   ;;  %v1348_v49 = vld [vmem:[%s1821_s0 + $0x8c] ss:$16 sps:$4 sm:$0xff]  }
  0x13   :  { %v1350_v50 = vld [vmem:[%s1821_s0 + $0x80] ss:$16 sps:$4 sm:$0xff]   ;;  %v1351_v51 = vld [vmem:[%s1821_s0 + $0x88] ss:$16 sps:$4 sm:$0xff]   ;;  %v1352_v52 = vld [vmem:[%s1821_s0 + $0xa4] ss:$16 sps:$4 sm:$0xff]  }
  0x14   :  { %1111 = vmatpush3.bf16.msra.mxu0 %v1308_v18  ;;  %v1354_v53 = vld [vmem:[%s1821_s0 + $0xac] ss:$16 sps:$4 sm:$0xff]   ;;  %v1356_v54 = vld [vmem:[%s1821_s0 + $0xa0] ss:$16 sps:$4 sm:$0xff]   ;;  %v1357_v55 = vld [vmem:[%s1821_s0 + $0xa8] ss:$16 sps:$4 sm:$0xff]  }
  0x15   :  { %1205 = vmatpush3.bf16.msra.mxu1 %v1309_v19  ;;  %1112 = vmatprep.subr.bf16.mxu0 %v1310_v20  ;;  %v1358_v56 = vld [vmem:[%s1821_s0 + $0xc4] ss:$16 sps:$4 sm:$0xff]   ;;  %v1360_v57 = vld [vmem:[%s1821_s0 + $0xcc] ss:$16 sps:$4 sm:$0xff]   ;;  %v1362_v58 = vld [vmem:[%s1821_s0 + $0xc0] ss:$16 sps:$4 sm:$0xff]  }
  0x16   :  { %1206 = vmatprep.subr.bf16.mxu1 %v1311_v21  ;;  %v1363_v59 = vld [vmem:[%s1821_s0 + $0xc8] ss:$16 sps:$4 sm:$0xff]   ;;  %v1364_v60 = vld [vmem:[%s1821_s0 + $0xe4] ss:$16 sps:$4 sm:$0xff]   ;;  %v1366_v61 = vld [vmem:[%s1821_s0 + $0xec] ss:$16 sps:$4 sm:$0xff]  }
  0x17   :  { %v1368_v62 = vld [vmem:[%s1821_s0 + $0xe0] ss:$16 sps:$4 sm:$0xff]   ;;  %v1369_v63 = vld [vmem:[%s1821_s0 + $0xe8] ss:$16 sps:$4 sm:$0xff]   ;;  %v1370_v0 = vld [vmem:[%s1821_s0 + $0x104] ss:$16 sps:$4 sm:$0xff]  }
  0x18   :  { %1113 = vmatpush3.bf16.msra.mxu0 %v1312_v22  ;;  %v1372_v1 = vld [vmem:[%s1821_s0 + $0x10c] ss:$16 sps:$4 sm:$0xff]   ;;  %v1374_v2 = vld [vmem:[%s1821_s0 + $0x100] ss:$16 sps:$4 sm:$0xff]   ;;  %v1375_v3 = vld [vmem:[%s1821_s0 + $0x108] ss:$16 sps:$4 sm:$0xff]  }
  0x19   :  { %1207 = vmatpush3.bf16.msra.mxu1 %v1313_v23  ;;  %1114 = vmatprep.subr.bf16.mxu0 %v1314_v24  ;;  %v1376_v4 = vld [vmem:[%s1821_s0 + $0x124] ss:$16 sps:$4 sm:$0xff]   ;;  %v1378_v5 = vld [vmem:[%s1821_s0 + $0x12c] ss:$16 sps:$4 sm:$0xff]   ;;  %v1380_v6 = vld [vmem:[%s1821_s0 + $0x120] ss:$16 sps:$4 sm:$0xff]  }
  0x1a   :  { %1208 = vmatprep.subr.bf16.mxu1 %v1315_v25  ;;  %v1381_v7 = vld [vmem:[%s1821_s0 + $0x128] ss:$16 sps:$4 sm:$0xff]   ;;  %v1382_v8 = vld [vmem:[%s1821_s0 + $0x144] ss:$16 sps:$4 sm:$0xff]   ;;  %v1384_v9 = vld [vmem:[%s1821_s0 + $0x14c] ss:$16 sps:$4 sm:$0xff]  }
  0x1b   :  { %v1386_v10 = vld [vmem:[%s1821_s0 + $0x140] ss:$16 sps:$4 sm:$0xff]   ;;  %v1387_v11 = vld [vmem:[%s1821_s0 + $0x148] ss:$16 sps:$4 sm:$0xff]   ;;  %v1388_v12 = vld [vmem:[%s1821_s0 + $0x164] ss:$16 sps:$4 sm:$0xff]  }
  0x1c   :  { %1115 = vmatpush3.bf16.msra.mxu0 %v1316_v26  ;;  %v1390_v13 = vld [vmem:[%s1821_s0 + $0x16c] ss:$16 sps:$4 sm:$0xff]   ;;  %v62_v14 = vld [vmem:[%s1821_s0 + $0x180] sm:$0xff]  ;;  %v1393_v17 = vld [vmem:[%s1821_s0 + $0x168] ss:$16 sps:$4 sm:$0xff]  }
  0x1d   :  { %1209 = vmatpush3.bf16.msra.mxu1 %v1317_v27  ;;  %1116 = vmatprep.subr.bf16.mxu0 %v1318_v28  ;;  %v63_v15 = vld [vmem:[%s1821_s0 + $0x188] sm:$0xff]  ;;  %v1392_v16 = vld [vmem:[%s1821_s0 + $0x160] ss:$16 sps:$4 sm:$0xff]   ;;  %v1067_v18 = vcombine.high %v62_v14, %v62_v14  ;;  %v1066_v20 = vcombine.low %v62_v14, %v62_v14 }
  0x1e   :  { %1210 = vmatprep.subr.bf16.mxu1 %v1319_v29  ;;  %v1069_v19 = vcombine.high %v63_v15, %v63_v15  ;;  %v1068_v21 = vcombine.low %v63_v15, %v63_v15 }
  0x20   :  { %1117 = vmatpush3.bf16.msra.mxu0 %v1320_v30 }
  0x21   :  { %1211 = vmatpush3.bf16.msra.mxu1 %v1321_v31 }
  0x23   :  { %607 = vmatmul.mubr.bf16.vlgmr.msra.gmra.mrb[0].mxu0 %v1322_v32 }
  0x24   :  { %743 = vmatmul.mubr.bf16.vlgmr.msra.gmra.mrb[0].mxu1 %v1325_v34  ;;  %614 = vmatprep.mubr.bf16.mxu0 %v1328_v36 }
  0x25   :  { %750 = vmatprep.mubr.bf16.mxu1 %v1330_v37 }
  0x2b   :  { %615 = vmatmul.mubr.bf16.gmra.mrb[4].mxu0 %v1332_v38 }
  0x2c   :  { %751 = vmatmul.mubr.bf16.gmra.mrb[4].mxu1 %v1333_v39  ;;  %622 = vmatprep.mubr.bf16.mxu0 %v1334_v40 }
  0x2d   :  { %758 = vmatprep.mubr.bf16.mxu1 %v1336_v41 }
  0x33   :  { %623 = vmatmul.mubr.bf16.gmra.mrb[8].mxu0 %v1338_v42 }
  0x34   :  { %759 = vmatmul.mubr.bf16.gmra.mrb[8].mxu1 %v1339_v43  ;;  %630 = vmatprep.mubr.bf16.mxu0 %v1340_v44 }
  0x35   :  { %766 = vmatprep.mubr.bf16.mxu1 %v1342_v45 }
  0x3b   :  { %631 = vmatmul.mubr.bf16.gmra.mrb[12].mxu0 %v1344_v46 }
  0x3c   :  { %767 = vmatmul.mubr.bf16.gmra.mrb[12].mxu1 %v1345_v47  ;;  %638 = vmatprep.mubr.bf16.mxu0 %v1346_v48 }
  0x3d   :  { %774 = vmatprep.mubr.bf16.mxu1 %v1348_v49 }
  0x43   :  { %639 = vmatmul.mubr.bf16.gmra.mrb[16].mxu0 %v1350_v50 }
  0x44   :  { %775 = vmatmul.mubr.bf16.gmra.mrb[16].mxu1 %v1351_v51  ;;  %646 = vmatprep.mubr.bf16.mxu0 %v1352_v52 }
  0x45   :  { %782 = vmatprep.mubr.bf16.mxu1 %v1354_v53 }
  0x4b   :  { %647 = vmatmul.mubr.bf16.gmra.mrb[20].mxu0 %v1356_v54 }
  0x4c   :  { %783 = vmatmul.mubr.bf16.gmra.mrb[20].mxu1 %v1357_v55  ;;  %654 = vmatprep.mubr.bf16.mxu0 %v1358_v56 }
  0x4d   :  { %790 = vmatprep.mubr.bf16.mxu1 %v1360_v57 }
  0x53   :  { %655 = vmatmul.mubr.bf16.gmra.mrb[24].mxu0 %v1362_v58 }
  0x54   :  { %791 = vmatmul.mubr.bf16.gmra.mrb[24].mxu1 %v1363_v59  ;;  %662 = vmatprep.mubr.bf16.mxu0 %v1364_v60 }
  0x55   :  { %798 = vmatprep.mubr.bf16.mxu1 %v1366_v61 }
  0x5b   :  { %663 = vmatmul.mubr.bf16.gmra.mrb[28].mxu0 %v1368_v62 }
  0x5c   :  { %799 = vmatmul.mubr.bf16.gmra.mrb[28].mxu1 %v1369_v63  ;;  %670 = vmatprep.mubr.bf16.mxu0 %v1370_v0 }
  0x5d   :  { %806 = vmatprep.mubr.bf16.mxu1 %v1372_v1 }
  0x63   :  { %671 = vmatmul.mubr.bf16.gmra.mrb[32].mxu0 %v1374_v2 }
  0x64   :  { %807 = vmatmul.mubr.bf16.gmra.mrb[32].mxu1 %v1375_v3  ;;  %678 = vmatprep.mubr.bf16.mxu0 %v1376_v4 }
  0x65   :  { %814 = vmatprep.mubr.bf16.mxu1 %v1378_v5 }
  0x6b   :  { %679 = vmatmul.mubr.bf16.gmra.mrb[36].mxu0 %v1380_v6 }
  0x6c   :  { %815 = vmatmul.mubr.bf16.gmra.mrb[36].mxu1 %v1381_v7  ;;  %686 = vmatprep.mubr.bf16.mxu0 %v1382_v8 }
  0x6d   :  { %822 = vmatprep.mubr.bf16.mxu1 %v1384_v9 }
  0x73   :  { %687 = vmatmul.mubr.bf16.gmra.mrb[40].mxu0 %v1386_v10 }
  0x74   :  { %823 = vmatmul.mubr.bf16.gmra.mrb[40].mxu1 %v1387_v11  ;;  %694 = vmatprep.mubr.bf16.mxu0 %v1388_v12 }
  0x75   :  { %830 = vmatprep.mubr.bf16.mxu1 %v1390_v13 }
  0x7b   :  { %695 = vmatmul.mubr.bf16.gmra.mrb[44].mxu0 %v1392_v16 }
  0x7c   :  { %831 = vmatmul.mubr.bf16.gmra.mrb[44].mxu1 %v1393_v17  ;;  %702 = vmatprep.mubr.bf16.mxu0 %v1067_v18 }
  0x7d   :  { %838 = vmatprep.mubr.bf16.mxu1 %v1069_v19 }
  0x83   :  { %703 = vmatmul.mubr.bf16.gmra.mrb[48].mxu0 %v1066_v20 }
  0x84   :  { %839 = vmatmul.mubr.bf16.gmra.mrb[48].mxu1 %v1068_v21 }
  0xf6   :  { %v1118_v22 = vpop.f32.mrb[0].mxu0 }
  0xf7   :  { %v1212_v23 = vpop.f32.mrb[0].mxu1  ;;  %v1119_v24 = vpop.f32.mrb[1].mxu0 }
  0xf8   :  { %v1120_v25 = vadd.f32 %v1119_v24, %v1118_v22  ;;  %v1213_v26 = vpop.f32.mrb[1].mxu1  ;;  %v1121_v27 = vpop.f32.mrb[2].mxu0 }
  0xf9   :  { %v1214_v28 = vadd.f32 %v1213_v26, %v1212_v23  ;;  %v1215_v29 = vpop.f32.mrb[2].mxu1  ;;  %v1122_v30 = vpop.f32.mrb[3].mxu0 }
  0xfa   :  { %v1123_v31 = vadd.f32 %v1122_v30, %v1121_v27  ;;  %v1216_v32 = vpop.f32.mrb[3].mxu1 }
  0xfb   :  { %v745_v33 = vadd.f32 %v1214_v28, %v1120_v25  ;;  %v1217_v34 = vadd.f32 %v1216_v32, %v1215_v29 }
  0xfd   :  { %847 = vst.msk [vmem:[%s1822_s2] sm:$0xff] %vm846_vm0, %v745_v33  ;;  %v929_v35 = vmul.f32 %v745_v33, %v745_v33  ;;  %v748_v36 = vadd.f32 %v1217_v34, %v1123_v31  ;;  %v872_v38 = vsel %vm846_vm0, %v745_v33, 0.0 }
  0xfe   :  { %v1124_v37 = vpop.f32.mrb[4].mxu0 }
  0xff   :  { %848 = vst.msk [vmem:[%s1822_s2 + $0x8] sm:$0xff] %vm846_vm0, %v748_v36  ;;  %v873_v39 = vsel %vm846_vm0, %v748_v36, 0.0  ;;  %v930_v40 = vmul.f32 %v748_v36, %v748_v36  ;;  %v1218_v41 = vpop.f32.mrb[4].mxu1  ;;  %v1125_v42 = vpop.f32.mrb[5].mxu0  ;;  %v954_v47 = vsel %vm846_vm0, %v929_v35, 0.0 }
 0x100   :  { %v874_v43 = vadd.f32 %v873_v39, %v872_v38  ;;  %v1126_v44 = vadd.f32 %v1125_v42, %v1124_v37  ;;  %v1219_v45 = vpop.f32.mrb[5].mxu1  ;;  %v1127_v46 = vpop.f32.mrb[6].mxu0 }
 0x101   :  { %v955_v48 = vsel %vm846_vm0, %v930_v40, 0.0  ;;  %v1220_v49 = vadd.f32 %v1219_v45, %v1218_v41  ;;  %v1221_v50 = vpop.f32.mrb[6].mxu1  ;;  %v1128_v51 = vpop.f32.mrb[7].mxu0 }
 0x102   :  { %v956_v52 = vadd.f32 %v955_v48, %v954_v47  ;;  %v1129_v53 = vadd.f32 %v1128_v51, %v1127_v46  ;;  %v1222_v54 = vpop.f32.mrb[7].mxu1 }
 0x103   :  { %v753_v55 = vadd.f32 %v1220_v49, %v1126_v44  ;;  %v1223_v56 = vadd.f32 %v1222_v54, %v1221_v50 }
 0x105   :  { %849 = vst.msk [vmem:[%s1822_s2 + $0x10] sm:$0xff] %vm846_vm0, %v753_v55  ;;  %v875_v57 = vsel %vm846_vm0, %v753_v55, 0.0  ;;  %v931_v58 = vmul.f32 %v753_v55, %v753_v55  ;;  %v756_v59 = vadd.f32 %v1223_v56, %v1129_v53 }
 0x106   :  { %v876_v60 = vadd.f32 %v875_v57, %v874_v43  ;;  %v1130_v61 = vpop.f32.mrb[8].mxu0 }
 0x107   :  { %v957_v62 = vsel %vm846_vm0, %v931_v58, 0.0  ;;  %850 = vst.msk [vmem:[%s1822_s2 + $0x18] sm:$0xff] %vm846_vm0, %v756_v59  ;;  %v877_v63 = vsel %vm846_vm0, %v756_v59, 0.0  ;;  %v932_v0 = vmul.f32 %v756_v59, %v756_v59  ;;  %v1224_v1 = vpop.f32.mrb[8].mxu1  ;;  %v1131_v2 = vpop.f32.mrb[9].mxu0 }
 0x108   :  { %v958_v3 = vadd.f32 %v957_v62, %v956_v52  ;;  %v878_v4 = vadd.f32 %v877_v63, %v876_v60  ;;  %v1132_v5 = vadd.f32 %v1131_v2, %v1130_v61  ;;  %v1225_v6 = vpop.f32.mrb[9].mxu1  ;;  %v1133_v7 = vpop.f32.mrb[10].mxu0 }
 0x109   :  { %v959_v8 = vsel %vm846_vm0, %v932_v0, 0.0  ;;  %v1226_v9 = vadd.f32 %v1225_v6, %v1224_v1  ;;  %v1227_v10 = vpop.f32.mrb[10].mxu1  ;;  %v1134_v11 = vpop.f32.mrb[11].mxu0 }
 0x10a   :  { %v960_v12 = vadd.f32 %v959_v8, %v958_v3  ;;  %v1135_v13 = vadd.f32 %v1134_v11, %v1133_v7  ;;  %v1228_v14 = vpop.f32.mrb[11].mxu1 }
 0x10b   :  { %v761_v15 = vadd.f32 %v1226_v9, %v1132_v5  ;;  %v1229_v16 = vadd.f32 %v1228_v14, %v1227_v10 }
 0x10d   :  { %851 = vst.msk [vmem:[%s1822_s2 + $0x20] sm:$0xff] %vm846_vm0, %v761_v15  ;;  %v879_v17 = vsel %vm846_vm0, %v761_v15, 0.0  ;;  %v933_v18 = vmul.f32 %v761_v15, %v761_v15  ;;  %v764_v19 = vadd.f32 %v1229_v16, %v1135_v13 }
 0x10e   :  { %v880_v20 = vadd.f32 %v879_v17, %v878_v4  ;;  %v1136_v21 = vpop.f32.mrb[12].mxu0 }
 0x10f   :  { %v961_v22 = vsel %vm846_vm0, %v933_v18, 0.0  ;;  %852 = vst.msk [vmem:[%s1822_s2 + $0x28] sm:$0xff] %vm846_vm0, %v764_v19  ;;  %v881_v23 = vsel %vm846_vm0, %v764_v19, 0.0  ;;  %v934_v24 = vmul.f32 %v764_v19, %v764_v19  ;;  %v1230_v25 = vpop.f32.mrb[12].mxu1  ;;  %v1137_v26 = vpop.f32.mrb[13].mxu0 }
 0x110   :  { %v962_v27 = vadd.f32 %v961_v22, %v960_v12  ;;  %v882_v28 = vadd.f32 %v881_v23, %v880_v20  ;;  %v1138_v29 = vadd.f32 %v1137_v26, %v1136_v21  ;;  %v1231_v30 = vpop.f32.mrb[13].mxu1  ;;  %v1139_v31 = vpop.f32.mrb[14].mxu0 }
 0x111   :  { %v963_v32 = vsel %vm846_vm0, %v934_v24, 0.0  ;;  %v1232_v33 = vadd.f32 %v1231_v30, %v1230_v25  ;;  %v1233_v34 = vpop.f32.mrb[14].mxu1  ;;  %v1140_v35 = vpop.f32.mrb[15].mxu0 }
 0x112   :  { %v964_v36 = vadd.f32 %v963_v32, %v962_v27  ;;  %v1141_v37 = vadd.f32 %v1140_v35, %v1139_v31  ;;  %v1234_v38 = vpop.f32.mrb[15].mxu1 }
 0x113   :  { %v769_v39 = vadd.f32 %v1232_v33, %v1138_v29  ;;  %v1235_v40 = vadd.f32 %v1234_v38, %v1233_v34 }
 0x115   :  { %853 = vst.msk [vmem:[%s1822_s2 + $0x30] sm:$0xff] %vm846_vm0, %v769_v39  ;;  %v883_v41 = vsel %vm846_vm0, %v769_v39, 0.0  ;;  %v935_v42 = vmul.f32 %v769_v39, %v769_v39  ;;  %v772_v43 = vadd.f32 %v1235_v40, %v1141_v37 }
 0x116   :  { %v884_v44 = vadd.f32 %v883_v41, %v882_v28  ;;  %v1142_v45 = vpop.f32.mrb[16].mxu0 }
 0x117   :  { %v965_v46 = vsel %vm846_vm0, %v935_v42, 0.0  ;;  %854 = vst.msk [vmem:[%s1822_s2 + $0x38] sm:$0xff] %vm846_vm0, %v772_v43  ;;  %v885_v47 = vsel %vm846_vm0, %v772_v43, 0.0  ;;  %v936_v48 = vmul.f32 %v772_v43, %v772_v43  ;;  %v1236_v49 = vpop.f32.mrb[16].mxu1  ;;  %v1143_v50 = vpop.f32.mrb[17].mxu0 }
 0x118   :  { %v966_v51 = vadd.f32 %v965_v46, %v964_v36  ;;  %v886_v52 = vadd.f32 %v885_v47, %v884_v44  ;;  %v1144_v53 = vadd.f32 %v1143_v50, %v1142_v45  ;;  %v1237_v54 = vpop.f32.mrb[17].mxu1  ;;  %v1145_v55 = vpop.f32.mrb[18].mxu0 }
 0x119   :  { %v967_v56 = vsel %vm846_vm0, %v936_v48, 0.0  ;;  %v1238_v57 = vadd.f32 %v1237_v54, %v1236_v49  ;;  %v1239_v58 = vpop.f32.mrb[18].mxu1  ;;  %v1146_v59 = vpop.f32.mrb[19].mxu0 }
 0x11a   :  { %v968_v60 = vadd.f32 %v967_v56, %v966_v51  ;;  %v1147_v61 = vadd.f32 %v1146_v59, %v1145_v55  ;;  %v1240_v62 = vpop.f32.mrb[19].mxu1 }
 0x11b   :  { %v777_v63 = vadd.f32 %v1238_v57, %v1144_v53  ;;  %v1241_v0 = vadd.f32 %v1240_v62, %v1239_v58 }
 0x11d   :  { %855 = vst.msk [vmem:[%s1822_s2 + $0x40] sm:$0xff] %vm846_vm0, %v777_v63  ;;  %v887_v1 = vsel %vm846_vm0, %v777_v63, 0.0  ;;  %v937_v2 = vmul.f32 %v777_v63, %v777_v63  ;;  %v780_v3 = vadd.f32 %v1241_v0, %v1147_v61 }
 0x11e   :  { %v888_v4 = vadd.f32 %v887_v1, %v886_v52  ;;  %v1148_v5 = vpop.f32.mrb[20].mxu0 }
 0x11f   :  { %v969_v6 = vsel %vm846_vm0, %v937_v2, 0.0  ;;  %856 = vst.msk [vmem:[%s1822_s2 + $0x48] sm:$0xff] %vm846_vm0, %v780_v3  ;;  %v889_v7 = vsel %vm846_vm0, %v780_v3, 0.0  ;;  %v938_v8 = vmul.f32 %v780_v3, %v780_v3  ;;  %v1242_v9 = vpop.f32.mrb[20].mxu1  ;;  %v1149_v10 = vpop.f32.mrb[21].mxu0 }
 0x120   :  { %v970_v11 = vadd.f32 %v969_v6, %v968_v60  ;;  %v890_v12 = vadd.f32 %v889_v7, %v888_v4  ;;  %v1150_v13 = vadd.f32 %v1149_v10, %v1148_v5  ;;  %v1243_v14 = vpop.f32.mrb[21].mxu1  ;;  %v1151_v15 = vpop.f32.mrb[22].mxu0 }
 0x121   :  { %v971_v16 = vsel %vm846_vm0, %v938_v8, 0.0  ;;  %v1244_v17 = vadd.f32 %v1243_v14, %v1242_v9  ;;  %v1245_v18 = vpop.f32.mrb[22].mxu1  ;;  %v1152_v19 = vpop.f32.mrb[23].mxu0 }
 0x122   :  { %v972_v20 = vadd.f32 %v971_v16, %v970_v11  ;;  %v1153_v21 = vadd.f32 %v1152_v19, %v1151_v15  ;;  %v1246_v22 = vpop.f32.mrb[23].mxu1 }
 0x123   :  { %v785_v23 = vadd.f32 %v1244_v17, %v1150_v13  ;;  %v1247_v24 = vadd.f32 %v1246_v22, %v1245_v18 }
 0x125   :  { %857 = vst.msk [vmem:[%s1822_s2 + $0x50] sm:$0xff] %vm846_vm0, %v785_v23  ;;  %v891_v25 = vsel %vm846_vm0, %v785_v23, 0.0  ;;  %v939_v26 = vmul.f32 %v785_v23, %v785_v23  ;;  %v788_v27 = vadd.f32 %v1247_v24, %v1153_v21 }
 0x126   :  { %v892_v28 = vadd.f32 %v891_v25, %v890_v12  ;;  %v1154_v29 = vpop.f32.mrb[24].mxu0 }
 0x127   :  { %v973_v30 = vsel %vm846_vm0, %v939_v26, 0.0  ;;  %858 = vst.msk [vmem:[%s1822_s2 + $0x58] sm:$0xff] %vm846_vm0, %v788_v27  ;;  %v893_v31 = vsel %vm846_vm0, %v788_v27, 0.0  ;;  %v940_v32 = vmul.f32 %v788_v27, %v788_v27  ;;  %v1248_v33 = vpop.f32.mrb[24].mxu1  ;;  %v1155_v34 = vpop.f32.mrb[25].mxu0 }
 0x128   :  { %v974_v35 = vadd.f32 %v973_v30, %v972_v20  ;;  %v894_v36 = vadd.f32 %v893_v31, %v892_v28  ;;  %v1156_v37 = vadd.f32 %v1155_v34, %v1154_v29  ;;  %v1249_v38 = vpop.f32.mrb[25].mxu1  ;;  %v1157_v39 = vpop.f32.mrb[26].mxu0 }
 0x129   :  { %v975_v40 = vsel %vm846_vm0, %v940_v32, 0.0  ;;  %v1250_v41 = vadd.f32 %v1249_v38, %v1248_v33  ;;  %v1251_v42 = vpop.f32.mrb[26].mxu1  ;;  %v1158_v43 = vpop.f32.mrb[27].mxu0 }
 0x12a   :  { %v976_v44 = vadd.f32 %v975_v40, %v974_v35  ;;  %v1159_v45 = vadd.f32 %v1158_v43, %v1157_v39  ;;  %v1252_v46 = vpop.f32.mrb[27].mxu1 }
 0x12b   :  { %v793_v47 = vadd.f32 %v1250_v41, %v1156_v37  ;;  %v1253_v48 = vadd.f32 %v1252_v46, %v1251_v42 }
 0x12d   :  { %859 = vst.msk [vmem:[%s1822_s2 + $0x60] sm:$0xff] %vm846_vm0, %v793_v47  ;;  %v895_v49 = vsel %vm846_vm0, %v793_v47, 0.0  ;;  %v941_v50 = vmul.f32 %v793_v47, %v793_v47  ;;  %v796_v51 = vadd.f32 %v1253_v48, %v1159_v45 }
 0x12e   :  { %v896_v52 = vadd.f32 %v895_v49, %v894_v36  ;;  %v1160_v53 = vpop.f32.mrb[28].mxu0 }
 0x12f   :  { %v977_v54 = vsel %vm846_vm0, %v941_v50, 0.0  ;;  %860 = vst.msk [vmem:[%s1822_s2 + $0x68] sm:$0xff] %vm846_vm0, %v796_v51  ;;  %v897_v55 = vsel %vm846_vm0, %v796_v51, 0.0  ;;  %v942_v56 = vmul.f32 %v796_v51, %v796_v51  ;;  %v1254_v57 = vpop.f32.mrb[28].mxu1  ;;  %v1161_v58 = vpop.f32.mrb[29].mxu0 }
 0x130   :  { %v978_v59 = vadd.f32 %v977_v54, %v976_v44  ;;  %v898_v60 = vadd.f32 %v897_v55, %v896_v52  ;;  %v1162_v61 = vadd.f32 %v1161_v58, %v1160_v53  ;;  %v1255_v62 = vpop.f32.mrb[29].mxu1  ;;  %v1163_v63 = vpop.f32.mrb[30].mxu0 }
 0x131   :  { %v979_v0 = vsel %vm846_vm0, %v942_v56, 0.0  ;;  %v1256_v1 = vadd.f32 %v1255_v62, %v1254_v57  ;;  %v1257_v2 = vpop.f32.mrb[30].mxu1  ;;  %v1164_v3 = vpop.f32.mrb[31].mxu0 }
 0x132   :  { %v980_v4 = vadd.f32 %v979_v0, %v978_v59  ;;  %v1165_v5 = vadd.f32 %v1164_v3, %v1163_v63  ;;  %v1258_v6 = vpop.f32.mrb[31].mxu1 }
 0x133   :  { %v801_v7 = vadd.f32 %v1256_v1, %v1162_v61  ;;  %v1259_v8 = vadd.f32 %v1258_v6, %v1257_v2 }
 0x135   :  { %861 = vst.msk [vmem:[%s1822_s2 + $0x70] sm:$0xff] %vm846_vm0, %v801_v7  ;;  %v899_v9 = vsel %vm846_vm0, %v801_v7, 0.0  ;;  %v943_v10 = vmul.f32 %v801_v7, %v801_v7  ;;  %v804_v11 = vadd.f32 %v1259_v8, %v1165_v5 }
 0x136   :  { %v900_v12 = vadd.f32 %v899_v9, %v898_v60  ;;  %v1166_v13 = vpop.f32.mrb[32].mxu0 }
 0x137   :  { %v981_v14 = vsel %vm846_vm0, %v943_v10, 0.0  ;;  %862 = vst.msk [vmem:[%s1822_s2 + $0x78] sm:$0xff] %vm846_vm0, %v804_v11  ;;  %v901_v15 = vsel %vm846_vm0, %v804_v11, 0.0  ;;  %v944_v16 = vmul.f32 %v804_v11, %v804_v11  ;;  %v1260_v17 = vpop.f32.mrb[32].mxu1  ;;  %v1167_v18 = vpop.f32.mrb[33].mxu0 }
 0x138   :  { %v982_v19 = vadd.f32 %v981_v14, %v980_v4  ;;  %v902_v20 = vadd.f32 %v901_v15, %v900_v12  ;;  %v1168_v21 = vadd.f32 %v1167_v18, %v1166_v13  ;;  %v1261_v22 = vpop.f32.mrb[33].mxu1  ;;  %v1169_v23 = vpop.f32.mrb[34].mxu0 }
 0x139   :  { %v983_v24 = vsel %vm846_vm0, %v944_v16, 0.0  ;;  %v1262_v25 = vadd.f32 %v1261_v22, %v1260_v17  ;;  %v1263_v26 = vpop.f32.mrb[34].mxu1  ;;  %v1170_v27 = vpop.f32.mrb[35].mxu0 }
 0x13a   :  { %v984_v28 = vadd.f32 %v983_v24, %v982_v19  ;;  %v1171_v29 = vadd.f32 %v1170_v27, %v1169_v23  ;;  %v1264_v30 = vpop.f32.mrb[35].mxu1 }
 0x13b   :  { %v809_v31 = vadd.f32 %v1262_v25, %v1168_v21  ;;  %v1265_v32 = vadd.f32 %v1264_v30, %v1263_v26 }
 0x13d   :  { %863 = vst.msk [vmem:[%s1822_s2 + $0x80] sm:$0xff] %vm846_vm0, %v809_v31  ;;  %v903_v33 = vsel %vm846_vm0, %v809_v31, 0.0  ;;  %v945_v34 = vmul.f32 %v809_v31, %v809_v31  ;;  %v812_v35 = vadd.f32 %v1265_v32, %v1171_v29 }
 0x13e   :  { %v904_v36 = vadd.f32 %v903_v33, %v902_v20  ;;  %v1172_v37 = vpop.f32.mrb[36].mxu0 }
 0x13f   :  { %v985_v38 = vsel %vm846_vm0, %v945_v34, 0.0  ;;  %864 = vst.msk [vmem:[%s1822_s2 + $0x88] sm:$0xff] %vm846_vm0, %v812_v35  ;;  %v905_v39 = vsel %vm846_vm0, %v812_v35, 0.0  ;;  %v946_v40 = vmul.f32 %v812_v35, %v812_v35  ;;  %v1266_v41 = vpop.f32.mrb[36].mxu1  ;;  %v1173_v42 = vpop.f32.mrb[37].mxu0 }
 0x140   :  { %v986_v43 = vadd.f32 %v985_v38, %v984_v28  ;;  %v906_v44 = vadd.f32 %v905_v39, %v904_v36  ;;  %v1174_v45 = vadd.f32 %v1173_v42, %v1172_v37  ;;  %v1267_v46 = vpop.f32.mrb[37].mxu1  ;;  %v1175_v47 = vpop.f32.mrb[38].mxu0 }
 0x141   :  { %v987_v48 = vsel %vm846_vm0, %v946_v40, 0.0  ;;  %v1268_v49 = vadd.f32 %v1267_v46, %v1266_v41  ;;  %v1269_v50 = vpop.f32.mrb[38].mxu1  ;;  %v1176_v51 = vpop.f32.mrb[39].mxu0 }
 0x142   :  { %v988_v52 = vadd.f32 %v987_v48, %v986_v43  ;;  %v1177_v53 = vadd.f32 %v1176_v51, %v1175_v47  ;;  %v1270_v54 = vpop.f32.mrb[39].mxu1 }
 0x143   :  { %v817_v55 = vadd.f32 %v1268_v49, %v1174_v45  ;;  %v1271_v56 = vadd.f32 %v1270_v54, %v1269_v50 }
 0x145   :  { %865 = vst.msk [vmem:[%s1822_s2 + $0x90] sm:$0xff] %vm846_vm0, %v817_v55  ;;  %v907_v57 = vsel %vm846_vm0, %v817_v55, 0.0  ;;  %v947_v58 = vmul.f32 %v817_v55, %v817_v55  ;;  %v820_v59 = vadd.f32 %v1271_v56, %v1177_v53 }
 0x146   :  { %v908_v60 = vadd.f32 %v907_v57, %v906_v44  ;;  %v1178_v61 = vpop.f32.mrb[40].mxu0 }
 0x147   :  { %v989_v62 = vsel %vm846_vm0, %v947_v58, 0.0  ;;  %866 = vst.msk [vmem:[%s1822_s2 + $0x98] sm:$0xff] %vm846_vm0, %v820_v59  ;;  %v909_v63 = vsel %vm846_vm0, %v820_v59, 0.0  ;;  %v948_v0 = vmul.f32 %v820_v59, %v820_v59  ;;  %v1272_v1 = vpop.f32.mrb[40].mxu1  ;;  %v1179_v2 = vpop.f32.mrb[41].mxu0 }
 0x148   :  { %v990_v3 = vadd.f32 %v989_v62, %v988_v52  ;;  %v910_v4 = vadd.f32 %v909_v63, %v908_v60  ;;  %v1180_v5 = vadd.f32 %v1179_v2, %v1178_v61  ;;  %v1273_v6 = vpop.f32.mrb[41].mxu1  ;;  %v1181_v7 = vpop.f32.mrb[42].mxu0 }
 0x149   :  { %v991_v8 = vsel %vm846_vm0, %v948_v0, 0.0  ;;  %v1274_v9 = vadd.f32 %v1273_v6, %v1272_v1  ;;  %v1275_v10 = vpop.f32.mrb[42].mxu1  ;;  %v1182_v11 = vpop.f32.mrb[43].mxu0 }
 0x14a   :  { %v992_v12 = vadd.f32 %v991_v8, %v990_v3  ;;  %v1183_v13 = vadd.f32 %v1182_v11, %v1181_v7  ;;  %v1276_v14 = vpop.f32.mrb[43].mxu1 }
 0x14b   :  { %v825_v15 = vadd.f32 %v1274_v9, %v1180_v5  ;;  %v1277_v16 = vadd.f32 %v1276_v14, %v1275_v10 }
 0x14d   :  { %867 = vst.msk [vmem:[%s1822_s2 + $0xa0] sm:$0xff] %vm846_vm0, %v825_v15  ;;  %v911_v17 = vsel %vm846_vm0, %v825_v15, 0.0  ;;  %v949_v18 = vmul.f32 %v825_v15, %v825_v15  ;;  %v828_v19 = vadd.f32 %v1277_v16, %v1183_v13 }
 0x14e   :  { %v912_v20 = vadd.f32 %v911_v17, %v910_v4  ;;  %v1184_v21 = vpop.f32.mrb[44].mxu0 }
 0x14f   :  { %v993_v22 = vsel %vm846_vm0, %v949_v18, 0.0  ;;  %868 = vst.msk [vmem:[%s1822_s2 + $0xa8] sm:$0xff] %vm846_vm0, %v828_v19  ;;  %v913_v23 = vsel %vm846_vm0, %v828_v19, 0.0  ;;  %v950_v24 = vmul.f32 %v828_v19, %v828_v19  ;;  %v1278_v25 = vpop.f32.mrb[44].mxu1  ;;  %v1185_v26 = vpop.f32.mrb[45].mxu0 }
 0x150   :  { %v994_v27 = vadd.f32 %v993_v22, %v992_v12  ;;  %v914_v28 = vadd.f32 %v913_v23, %v912_v20  ;;  %v1186_v29 = vadd.f32 %v1185_v26, %v1184_v21  ;;  %v1279_v30 = vpop.f32.mrb[45].mxu1  ;;  %v1187_v31 = vpop.f32.mrb[46].mxu0 }
 0x151   :  { %v995_v32 = vsel %vm846_vm0, %v950_v24, 0.0  ;;  %v1280_v33 = vadd.f32 %v1279_v30, %v1278_v25  ;;  %v1281_v34 = vpop.f32.mrb[46].mxu1  ;;  %v1188_v35 = vpop.f32.mrb[47].mxu0 }
 0x152   :  { %v996_v36 = vadd.f32 %v995_v32, %v994_v27  ;;  %v1189_v37 = vadd.f32 %v1188_v35, %v1187_v31  ;;  %v1282_v38 = vpop.f32.mrb[47].mxu1 }
 0x153   :  { %v833_v39 = vadd.f32 %v1280_v33, %v1186_v29  ;;  %v1283_v40 = vadd.f32 %v1282_v38, %v1281_v34 }
 0x155   :  { %869 = vst.msk [vmem:[%s1822_s2 + $0xb0] sm:$0xff] %vm846_vm0, %v833_v39  ;;  %v915_v41 = vsel %vm846_vm0, %v833_v39, 0.0  ;;  %v951_v42 = vmul.f32 %v833_v39, %v833_v39  ;;  %v836_v43 = vadd.f32 %v1283_v40, %v1189_v37 }
 0x156   :  { %v916_v44 = vadd.f32 %v915_v41, %v914_v28  ;;  %v1190_v45 = vpop.f32.mrb[48].mxu0 }
 0x157   :  { %v997_v46 = vsel %vm846_vm0, %v951_v42, 0.0  ;;  %870 = vst.msk [vmem:[%s1822_s2 + $0xb8] sm:$0xff] %vm846_vm0, %v836_v43  ;;  %v917_v47 = vsel %vm846_vm0, %v836_v43, 0.0  ;;  %v952_v48 = vmul.f32 %v836_v43, %v836_v43  ;;  %v1284_v49 = vpop.f32.mrb[48].mxu1  ;;  %v1191_v50 = vpop.f32.mrb[49].mxu0 }
 0x158   :  { %v998_v51 = vadd.f32 %v997_v46, %v996_v36  ;;  %v918_v52 = vadd.f32 %v917_v47, %v916_v44  ;;  %v1192_v53 = vadd.f32 %v1191_v50, %v1190_v45  ;;  %v1285_v54 = vpop.f32.mrb[49].mxu1  ;;  %v1193_v55 = vpop.f32.mrb[50].mxu0 }
 0x159   :  { %v999_v56 = vsel %vm846_vm0, %v952_v48, 0.0  ;;  %v1286_v57 = vadd.f32 %v1285_v54, %v1284_v49  ;;  %v1287_v58 = vpop.f32.mrb[50].mxu1  ;;  %v1194_v59 = vpop.f32.mrb[51].mxu0 }
 0x15a   :  { %v1000_v60 = vadd.f32 %v999_v56, %v998_v51  ;;  %v1288_v61 = vpop.f32.mrb[51].mxu1 }
 0x15b   :  { %v841_v62 = vadd.f32 %v1286_v57, %v1192_v53 }
 0x15d   :  { %871 = vst.msk [vmem:[%s1822_s2 + $0xc0] sm:$0xff] %vm846_vm0, %v841_v62  ;;  %v919_v63 = vsel %vm846_vm0, %v841_v62, 0.0  ;;  %v953_v0 = vmul.f32 %v841_v62, %v841_v62 }
 0x15e   :  { %v920_v1 = vadd.f32 %v919_v63, %v918_v52 }
 0x15f   :  { %v1001_v2 = vsel %vm846_vm0, %v953_v0, 0.0 }
 0x160   :  { %v921_v3 = vrot.slane %v920_v1, 4  ;;  %v1002_v4 = vadd.f32 %v1001_v2, %v1000_v60 }
 0x162   :  { %v922_v5 = vadd.f32 %v921_v3, %v920_v1  ;;  %v1003_v6 = vrot.slane %v1002_v4, 4 }
 0x164   :  { %v923_v7 = vrot.slane %v922_v5, 2  ;;  %v1004_v8 = vadd.f32 %v1003_v6, %v1002_v4 }
 0x166   :  { %v924_v9 = vadd.f32 %v923_v7, %v922_v5  ;;  %v1005_v10 = vrot.slane %v1004_v8, 2 }
 0x168   :  { %v925_v11 = vrot.slane %v924_v9, 1  ;;  %v1006_v12 = vadd.f32 %v1005_v10, %v1004_v8 }
 0x16a   :  { %v926_v13 = vadd.f32 %v925_v11, %v924_v9  ;;  %v1007_v14 = vrot.slane %v1006_v12, 1 }
 0x16c   :  { %928 = vst.msk [vmem:[%s1823_s3] sm:$0x1] %vm927_vm1, %v926_v13  ;;  %v1008_v15 = vadd.f32 %v1007_v14, %v1006_v12 }
 0x16e   :  { %1009 = vst.msk [vmem:[%s1823_s3 + $0x1] sm:$0x1] %vm927_vm1, %v1008_v15 }

// kernel: decoder_forward.9
= control target key start
LH: loop header
LB: loop body
LE: loop exit
PB: predicated region body
PF: predicated region fallthrough
CT: control target
= control target key end

     0   :  { %s1253_s12 = smov 0   ;;  %s1581_s0 = inlined_call_operand.vmem [shape: bf16[512,256], index: 0, kind: input, shape index: {}]   ;;  %s1582_s1 = inlined_call_operand.vmem [shape: bf16[256,8], index: 1, kind: input, shape index: {}]   ;;  %s1583_s2 = inlined_call_operand.vmem [shape: f32[512,8], index: 2, kind: output, shape index: {0}]   ;;  %s1584_s3 = inlined_call_operand.vmem [shape: f32[16,8], index: 3, kind: output, shape index: {1}]  }
   0x1 LB: > { %s1259_s13 = sadd.s32 4294967295, %s1231_s12   ;;  %p967_p0 = scmp.ge.s32.totalorder %s1231_s12, 1  ;;  %s1231_s12 = sphi %s1253_s12, %s14_s12  }
   0x2   : > { %p142_p1 = scmp.lt.s32.totalorder %s1231_s12, 3 }
   0x4   : > { %p143_p2 = pnand %p967_p0, %p142_p1 }
   0x5   : > { %v1161_v0 = vld [vmem:[%s1582_s1 + $0x40] sm:$0xff] (!%p143_p2)   ;;  %s968_s16 = sshll.u32 (!%p143_p2), %s1259_s13, 5  ;;  %v1163_v2 = vld [vmem:[%s1582_s1 + $0x48] sm:$0xff] (!%p143_p2)   ;;  %v1165_v4 = vld [vmem:[%s1582_s1 + $0x50] sm:$0xff] (!%p143_p2)   ;;  %vm670_vm0 = vcmask (!%p143_p2), 64512   ;;  %p184_p4 = scmp.lt.s32.totalorder (!%p143_p2), %s1259_s13, 1 }
   0x6   : > { %146 = sbr.rel (%p143_p2) target bundleno = 361 (0x169), region = 28  ;;  %v1162_v1 = vld [vmem:[%s1582_s1] sm:$0xff] (!%p143_p2)   ;;  %1025 = vmatprep.subr.bf16.mxu0 (!%p143_p2), %v1161_v0  ;;  %1137 = vmatprep.subr.bf16.mxu1 (!%p143_p2), %v1161_v0  ;;  %v1164_v3 = vld [vmem:[%s1582_s1 + $0x8] sm:$0xff] (!%p143_p2)   ;;  %p172_p3 = scmp.lt.s32.totalorder (!%p143_p2), %s968_s16, 63  ;;  %v1166_v5 = vld [vmem:[%s1582_s1 + $0x10] sm:$0xff] (!%p143_p2)   ;;  %vm772_vm1 = vcmask (!%p143_p2), 57344  }
   0x7   : > { %1026 = vmatpush3.bf16.msra.mxu0 (!%p143_p2), %v1162_v1  ;;  %1145 = vmatpush3.bf16.msra.mxu1 (!%p143_p2), %v1162_v1  ;;  %v1167_v6 = vld [vmem:[%s1582_s1 + $0x58] sm:$0xff] (!%p143_p2)   ;;  %v1169_v8 = vld [vmem:[%s1582_s1 + $0x60] sm:$0xff] (!%p143_p2)   ;;  %v1171_v10 = vld [vmem:[%s1582_s1 + $0x68] sm:$0xff] (!%p143_p2)  }
   0x8   : > { %1027 = vmatprep.subr.bf16.mxu0 (!%p143_p2), %v1163_v2  ;;  %1138 = vmatprep.subr.bf16.mxu1 (!%p143_p2), %v1163_v2  ;;  %v1168_v7 = vld [vmem:[%s1582_s1 + $0x18] sm:$0xff] (!%p143_p2)   ;;  %v1170_v9 = vld [vmem:[%s1582_s1 + $0x20] sm:$0xff] (!%p143_p2)   ;;  %v1172_v12 = vld [vmem:[%s1582_s1 + $0x28] sm:$0xff] (!%p143_p2)  }
   0x9   : > { %v1173_v13 = vld [vmem:[%s1582_s1 + $0x70] sm:$0xff] (!%p143_p2)   ;;  %v1175_v16 = vld [vmem:[%s1582_s1 + $0x78] sm:$0xff] (!%p143_p2)  }
   0xa   : > { %v1174_v15 = vld [vmem:[%s1582_s1 + $0x30] sm:$0xff] (!%p143_p2)   ;;  %v1176_v17 = vld [vmem:[%s1582_s1 + $0x38] sm:$0xff] (!%p143_p2)  }
   0xb   : > { %1028 = vmatpush3.bf16.msra.mxu0 (!%p143_p2), %v1164_v3  ;;  %1146 = vmatpush3.bf16.msra.mxu1 (!%p143_p2), %v1164_v3 }
   0xc   : > { %1029 = vmatprep.subr.bf16.mxu0 (!%p143_p2), %v1165_v4  ;;  %1139 = vmatprep.subr.bf16.mxu1 (!%p143_p2), %v1165_v4 }
   0xd   : > { %s1586_s16 = smov (!%p172_p3, %s968_s16), 63  ;;  %s1588_s13 = smov (!%p184_p4, %s1259_s13), 1 }
   0xe   : > { %s1024_s4 = sshll.u32 %s1586_s16, 3  ;;  %s973_s16 = sshll.u32 %s1588_s13, 3 }
   0xf   : > { %1030 = vmatpush3.bf16.msra.mxu0 %v1166_v5  ;;  %1147 = vmatpush3.bf16.msra.mxu1 %v1166_v5  ;;  %s1299_s9 = scalar_lea.vmem %s1581_s0, %s1024_s4  ;;  %s1359_s29 = scalar_lea.vmem %s1583_s2, %s1024_s4 }
  0x10   : > { %1031 = vmatprep.subr.bf16.mxu0 %v1167_v6  ;;  %1140 = vmatprep.subr.bf16.mxu1 %v1167_v6  ;;  %v1179_v11 = vld [vmem:[%s1299_s9 + $0x4] ss:$8 sps:$4 sm:$0xff]   ;;  %v1177_v18 = vld [vmem:[%s1299_s9] ss:$8 sps:$4 sm:$0xff]   ;;  %v1180_v19 = vld [vmem:[%s1299_s9 + $0x14] ss:$8 sps:$4 sm:$0xff]   ;;  %s187_s5 = scalar_lea.vmem %s1584_s3, %s973_s16 }
  0x11   : > { %541 = vmatprep.mubr.bf16.mxu0 %v1179_v11  ;;  %v1191_v14 = vld [vmem:[%s1299_s9 + $0x84] ss:$8 sps:$4 sm:$0xff]   ;;  %v1189_v20 = vld [vmem:[%s1299_s9 + $0x80] ss:$8 sps:$4 sm:$0xff]   ;;  %v1195_v21 = vld [vmem:[%s1299_s9 + $0x94] ss:$8 sps:$4 sm:$0xff]  }
  0x12   : > { %605 = vmatprep.mubr.bf16.mxu1 %v1191_v14  ;;  %v1182_v22 = vld [vmem:[%s1299_s9 + $0x10] ss:$8 sps:$4 sm:$0xff]   ;;  %v1183_v23 = vld [vmem:[%s1299_s9 + $0x24] ss:$8 sps:$4 sm:$0xff]   ;;  %v1185_v26 = vld [vmem:[%s1299_s9 + $0x20] ss:$8 sps:$4 sm:$0xff]  }
  0x13   : > { %1032 = vmatpush3.bf16.msra.mxu0 %v1168_v7  ;;  %1148 = vmatpush3.bf16.msra.mxu1 %v1168_v7  ;;  %v1197_v24 = vld [vmem:[%s1299_s9 + $0x90] ss:$8 sps:$4 sm:$0xff]   ;;  %v1201_v25 = vld [vmem:[%s1299_s9 + $0xa4] ss:$8 sps:$4 sm:$0xff]   ;;  %v1186_v27 = vld [vmem:[%s1299_s9 + $0x34] ss:$8 sps:$4 sm:$0xff]  }
  0x14   : > { %1033 = vmatprep.subr.bf16.mxu0 %v1169_v8  ;;  %1141 = vmatprep.subr.bf16.mxu1 %v1169_v8  ;;  %v1203_v28 = vld [vmem:[%s1299_s9 + $0xa0] ss:$8 sps:$4 sm:$0xff]   ;;  %v1207_v29 = vld [vmem:[%s1299_s9 + $0xb4] ss:$8 sps:$4 sm:$0xff]   ;;  %v1188_v30 = vld [vmem:[%s1299_s9 + $0x30] ss:$8 sps:$4 sm:$0xff]  }
  0x15   : > { %v1192_v31 = vld [vmem:[%s1299_s9 + $0x44] ss:$8 sps:$4 sm:$0xff]   ;;  %v1209_v32 = vld [vmem:[%s1299_s9 + $0xb0] ss:$8 sps:$4 sm:$0xff]   ;;  %v1194_v34 = vld [vmem:[%s1299_s9 + $0x40] ss:$8 sps:$4 sm:$0xff]  }
  0x16   : > { %v1213_v33 = vld [vmem:[%s1299_s9 + $0xc4] ss:$8 sps:$4 sm:$0xff]   ;;  %v1198_v35 = vld [vmem:[%s1299_s9 + $0x54] ss:$8 sps:$4 sm:$0xff]   ;;  %v1215_v36 = vld [vmem:[%s1299_s9 + $0xc0] ss:$8 sps:$4 sm:$0xff]  }
  0x17   : > { %1034 = vmatpush3.bf16.msra.mxu0 %v1170_v9  ;;  %1149 = vmatpush3.bf16.msra.mxu1 %v1170_v9  ;;  %v1216_v37 = vld [vmem:[%s1299_s9 + $0xd4] ss:$8 sps:$4 sm:$0xff]   ;;  %v1200_v38 = vld [vmem:[%s1299_s9 + $0x50] ss:$8 sps:$4 sm:$0xff]   ;;  %v1204_v39 = vld [vmem:[%s1299_s9 + $0x64] ss:$8 sps:$4 sm:$0xff]  }
  0x18   : > { %1035 = vmatprep.subr.bf16.mxu0 %v1171_v10  ;;  %1142 = vmatprep.subr.bf16.mxu1 %v1171_v10  ;;  %v1218_v40 = vld [vmem:[%s1299_s9 + $0xd0] ss:$8 sps:$4 sm:$0xff]   ;;  %v1219_v41 = vld [vmem:[%s1299_s9 + $0xe4] ss:$8 sps:$4 sm:$0xff]   ;;  %v1206_v42 = vld [vmem:[%s1299_s9 + $0x60] ss:$8 sps:$4 sm:$0xff]  }
  0x19   : > { %v1210_v43 = vld [vmem:[%s1299_s9 + $0x74] ss:$8 sps:$4 sm:$0xff]   ;;  %v1221_v44 = vld [vmem:[%s1299_s9 + $0xe0] ss:$8 sps:$4 sm:$0xff]   ;;  %v1212_v46 = vld [vmem:[%s1299_s9 + $0x70] ss:$8 sps:$4 sm:$0xff]  }
  0x1a   : > { %v1222_v45 = vld [vmem:[%s1299_s9 + $0xf4] ss:$8 sps:$4 sm:$0xff]   ;;  %v1224_v47 = vld [vmem:[%s1299_s9 + $0xf0] ss:$8 sps:$4 sm:$0xff]  }
  0x1b   : > { %1036 = vmatpush3.bf16.msra.mxu0 %v1172_v12  ;;  %1150 = vmatpush3.bf16.msra.mxu1 %v1172_v12 }
  0x1c   : > { %1037 = vmatprep.subr.bf16.mxu0 %v1173_v13  ;;  %1143 = vmatprep.subr.bf16.mxu1 %v1173_v13 }
  0x1f   : > { %1038 = vmatpush3.bf16.msra.mxu0 %v1174_v15  ;;  %1151 = vmatpush3.bf16.msra.mxu1 %v1174_v15 }
  0x20   : > { %1039 = vmatprep.subr.bf16.mxu0 %v1175_v16  ;;  %1144 = vmatprep.subr.bf16.mxu1 %v1175_v16 }
  0x23   : > { %1040 = vmatpush3.bf16.msra.mxu0 %v1176_v17  ;;  %1152 = vmatpush3.bf16.msra.mxu1 %v1176_v17 }
  0x26   : > { %542 = vmatmul.mubr.bf16.vlgmr.msra.gmra.mrb[0].mxu0 %v1177_v18  ;;  %606 = vmatmul.mubr.bf16.vlgmr.msra.gmra.mrb[0].mxu1 %v1189_v20 }
  0x27   : > { %549 = vmatprep.mubr.bf16.mxu0 %v1180_v19  ;;  %613 = vmatprep.mubr.bf16.mxu1 %v1195_v21 }
  0x2e   : > { %550 = vmatmul.mubr.bf16.gmra.mrb[4].mxu0 %v1182_v22  ;;  %614 = vmatmul.mubr.bf16.gmra.mrb[4].mxu1 %v1197_v24 }
  0x2f   : > { %557 = vmatprep.mubr.bf16.mxu0 %v1183_v23  ;;  %621 = vmatprep.mubr.bf16.mxu1 %v1201_v25 }
  0x36   : > { %558 = vmatmul.mubr.bf16.gmra.mrb[8].mxu0 %v1185_v26  ;;  %622 = vmatmul.mubr.bf16.gmra.mrb[8].mxu1 %v1203_v28 }
  0x37   : > { %565 = vmatprep.mubr.bf16.mxu0 %v1186_v27  ;;  %629 = vmatprep.mubr.bf16.mxu1 %v1207_v29 }
  0x3e   : > { %566 = vmatmul.mubr.bf16.gmra.mrb[12].mxu0 %v1188_v30  ;;  %630 = vmatmul.mubr.bf16.gmra.mrb[12].mxu1 %v1209_v32 }
  0x3f   : > { %573 = vmatprep.mubr.bf16.mxu0 %v1192_v31  ;;  %637 = vmatprep.mubr.bf16.mxu1 %v1213_v33 }
  0x46   : > { %574 = vmatmul.mubr.bf16.gmra.mrb[16].mxu0 %v1194_v34  ;;  %638 = vmatmul.mubr.bf16.gmra.mrb[16].mxu1 %v1215_v36 }
  0x47   : > { %581 = vmatprep.mubr.bf16.mxu0 %v1198_v35  ;;  %645 = vmatprep.mubr.bf16.mxu1 %v1216_v37 }
  0x4e   : > { %582 = vmatmul.mubr.bf16.gmra.mrb[20].mxu0 %v1200_v38  ;;  %646 = vmatmul.mubr.bf16.gmra.mrb[20].mxu1 %v1218_v40 }
  0x4f   : > { %589 = vmatprep.mubr.bf16.mxu0 %v1204_v39  ;;  %653 = vmatprep.mubr.bf16.mxu1 %v1219_v41 }
  0x56   : > { %590 = vmatmul.mubr.bf16.gmra.mrb[24].mxu0 %v1206_v42  ;;  %654 = vmatmul.mubr.bf16.gmra.mrb[24].mxu1 %v1221_v44 }
  0x57   : > { %597 = vmatprep.mubr.bf16.mxu0 %v1210_v43  ;;  %661 = vmatprep.mubr.bf16.mxu1 %v1222_v45 }
  0x5e   : > { %598 = vmatmul.mubr.bf16.gmra.mrb[28].mxu0 %v1212_v46  ;;  %662 = vmatmul.mubr.bf16.gmra.mrb[28].mxu1 %v1224_v47 }
  0xf9   : > { %v1041_v48 = vpop.f32.mrb[0].mxu0  ;;  %v1089_v50 = vpop.f32.mrb[0].mxu1 }
  0xfa   : > { %v1042_v49 = vpop.f32.mrb[1].mxu0  ;;  %v1090_v53 = vpop.f32.mrb[1].mxu1 }
  0xfb   : > { %v1043_v51 = vadd.f32 %v1042_v49, %v1041_v48  ;;  %v1044_v52 = vpop.f32.mrb[2].mxu0  ;;  %v1361_v55 = vadd.f32 %v1090_v53, %v1089_v50  ;;  %v1092_v56 = vpop.f32.mrb[2].mxu1 }
  0xfc   : > { %v1045_v54 = vpop.f32.mrb[3].mxu0  ;;  %v1093_v59 = vpop.f32.mrb[3].mxu1 }
  0xfd   : > { %671 = vst.msk [vmem:[%s1359_s29] sm:$0xff] %vm670_vm0, %v1043_v51  ;;  %v774_v57 = vmul.f32 %v1043_v51, %v1043_v51  ;;  %v1046_v58 = vadd.f32 %v1045_v54, %v1044_v52  ;;  %687 = vst.msk [vmem:[%s1359_s29 + $0x80] sm:$0xff] %vm670_vm0, %v1361_v55  ;;  %v1368_v60 = vadd.f32 %v1093_v59, %v1092_v56  ;;  %v703_v61 = vsel %vm670_vm0, %v1043_v51, 0.0 }
  0xff   : > { %672 = vst.msk [vmem:[%s1359_s29 + $0x8] sm:$0xff] %vm670_vm0, %v1046_v58  ;;  %v704_v62 = vsel %vm670_vm0, %v1046_v58, 0.0  ;;  %v775_v63 = vmul.f32 %v1046_v58, %v1046_v58  ;;  %688 = vst.msk [vmem:[%s1359_s29 + $0x88] sm:$0xff] %vm670_vm0, %v1368_v60  ;;  %v791_v1 = vmul.f32 %v1368_v60, %v1368_v60  ;;  %v806_v2 = vsel %vm670_vm0, %v774_v57, 0.0 }
 0x100   : > { %v705_v0 = vadd.f32 %v704_v62, %v703_v61 }
 0x101   : > { %v807_v3 = vsel %vm670_vm0, %v775_v63, 0.0  ;;  %v1047_v4 = vpop.f32.mrb[4].mxu0  ;;  %v1382_v7 = vsel %vm670_vm0, %v791_v1, 0.0  ;;  %v1095_v8 = vpop.f32.mrb[4].mxu1 }
 0x102   : > { %v808_v5 = vadd.f32 %v807_v3, %v806_v2  ;;  %v1048_v6 = vpop.f32.mrb[5].mxu0  ;;  %v1096_v11 = vpop.f32.mrb[5].mxu1 }
 0x103   : > { %v1049_v9 = vadd.f32 %v1048_v6, %v1047_v4  ;;  %v1050_v10 = vpop.f32.mrb[6].mxu0  ;;  %v1097_v13 = vadd.f32 %v1096_v11, %v1095_v8  ;;  %v1098_v14 = vpop.f32.mrb[6].mxu1 }
 0x104   : > { %v1051_v12 = vpop.f32.mrb[7].mxu0  ;;  %v1099_v18 = vpop.f32.mrb[7].mxu1 }
 0x105   : > { %673 = vst.msk [vmem:[%s1359_s29 + $0x10] sm:$0xff] %vm670_vm0, %v1049_v9  ;;  %v706_v15 = vsel %vm670_vm0, %v1049_v9, 0.0  ;;  %v776_v16 = vmul.f32 %v1049_v9, %v1049_v9  ;;  %v1052_v17 = vadd.f32 %v1051_v12, %v1050_v10  ;;  %689 = vst.msk [vmem:[%s1359_s29 + $0x90] sm:$0xff] %vm670_vm0, %v1097_v13  ;;  %v1390_v20 = vsel %vm670_vm0, %v1097_v13, 0.0 }
 0x106   : > { %v707_v19 = vadd.f32 %v706_v15, %v705_v0  ;;  %v792_v21 = vmul.f32 %v1097_v13, %v1097_v13  ;;  %v1100_v22 = vadd.f32 %v1099_v18, %v1098_v14 }
 0x107   : > { %v809_v23 = vsel %vm670_vm0, %v776_v16, 0.0  ;;  %674 = vst.msk [vmem:[%s1359_s29 + $0x18] sm:$0xff] %vm670_vm0, %v1052_v17  ;;  %v708_v24 = vsel %vm670_vm0, %v1052_v17, 0.0  ;;  %v777_v25 = vmul.f32 %v1052_v17, %v1052_v17 }
 0x108   : > { %v810_v26 = vadd.f32 %v809_v23, %v808_v5  ;;  %v709_v27 = vadd.f32 %v708_v24, %v707_v19  ;;  %v1397_v28 = vsel %vm670_vm0, %v792_v21, 0.0  ;;  %690 = vst.msk [vmem:[%s1359_s29 + $0x98] sm:$0xff] %vm670_vm0, %v1100_v22  ;;  %v1402_v29 = vsel %vm670_vm0, %v1100_v22, 0.0 }
 0x109   : > { %v811_v30 = vsel %vm670_vm0, %v777_v25, 0.0  ;;  %v1053_v31 = vpop.f32.mrb[8].mxu0  ;;  %v793_v32 = vmul.f32 %v1100_v22, %v1100_v22  ;;  %v1101_v35 = vpop.f32.mrb[8].mxu1 }
 0x10a   : > { %v812_v33 = vadd.f32 %v811_v30, %v810_v26  ;;  %v1054_v34 = vpop.f32.mrb[9].mxu0  ;;  %v1102_v39 = vpop.f32.mrb[9].mxu1 }
 0x10b   : > { %v1055_v36 = vadd.f32 %v1054_v34, %v1053_v31  ;;  %v1056_v37 = vpop.f32.mrb[10].mxu0  ;;  %v1406_v38 = vsel %vm670_vm0, %v793_v32, 0.0  ;;  %v1103_v41 = vadd.f32 %v1102_v39, %v1101_v35  ;;  %v1104_v42 = vpop.f32.mrb[10].mxu1 }
 0x10c   : > { %v1057_v40 = vpop.f32.mrb[11].mxu0  ;;  %v1105_v46 = vpop.f32.mrb[11].mxu1 }
 0x10d   : > { %675 = vst.msk [vmem:[%s1359_s29 + $0x20] sm:$0xff] %vm670_vm0, %v1055_v36  ;;  %v710_v43 = vsel %vm670_vm0, %v1055_v36, 0.0  ;;  %v778_v44 = vmul.f32 %v1055_v36, %v1055_v36  ;;  %v1058_v45 = vadd.f32 %v1057_v40, %v1056_v37  ;;  %691 = vst.msk [vmem:[%s1359_s29 + $0xa0] sm:$0xff] %vm670_vm0, %v1103_v41  ;;  %v1414_v48 = vsel %vm670_vm0, %v1103_v41, 0.0 }
 0x10e   : > { %v711_v47 = vadd.f32 %v710_v43, %v709_v27  ;;  %v794_v49 = vmul.f32 %v1103_v41, %v1103_v41  ;;  %v1106_v50 = vadd.f32 %v1105_v46, %v1104_v42 }
 0x10f   : > { %v813_v51 = vsel %vm670_vm0, %v778_v44, 0.0  ;;  %676 = vst.msk [vmem:[%s1359_s29 + $0x28] sm:$0xff] %vm670_vm0, %v1058_v45  ;;  %v712_v52 = vsel %vm670_vm0, %v1058_v45, 0.0  ;;  %v779_v53 = vmul.f32 %v1058_v45, %v1058_v45 }
 0x110   : > { %v814_v54 = vadd.f32 %v813_v51, %v812_v33  ;;  %v713_v56 = vadd.f32 %v712_v52, %v711_v47  ;;  %v1421_v57 = vsel %vm670_vm0, %v794_v49, 0.0  ;;  %692 = vst.msk [vmem:[%s1359_s29 + $0xa8] sm:$0xff] %vm670_vm0, %v1106_v50  ;;  %v1426_v58 = vsel %vm670_vm0, %v1106_v50, 0.0 }
 0x111   : > { %v815_v59 = vsel %vm670_vm0, %v779_v53, 0.0  ;;  %v1059_v61 = vpop.f32.mrb[12].mxu0  ;;  %v795_v62 = vmul.f32 %v1106_v50, %v1106_v50  ;;  %v1107_v1 = vpop.f32.mrb[12].mxu1 }
 0x112   : > { %v816_v63 = vadd.f32 %v815_v59, %v814_v54  ;;  %v1060_v0 = vpop.f32.mrb[13].mxu0  ;;  %v1108_v5 = vpop.f32.mrb[13].mxu1 }
 0x113   : > { %v1061_v2 = vadd.f32 %v1060_v0, %v1059_v61  ;;  %v1062_v3 = vpop.f32.mrb[14].mxu0  ;;  %v1430_v4 = vsel %vm670_vm0, %v795_v62, 0.0  ;;  %v1109_v8 = vadd.f32 %v1108_v5, %v1107_v1  ;;  %v1110_v9 = vpop.f32.mrb[14].mxu1 }
 0x114   : > { %v1063_v6 = vpop.f32.mrb[15].mxu0  ;;  %v1111_v13 = vpop.f32.mrb[15].mxu1 }
 0x115   : > { %677 = vst.msk [vmem:[%s1359_s29 + $0x30] sm:$0xff] %vm670_vm0, %v1061_v2  ;;  %v714_v10 = vsel %vm670_vm0, %v1061_v2, 0.0  ;;  %v780_v11 = vmul.f32 %v1061_v2, %v1061_v2  ;;  %v1064_v12 = vadd.f32 %v1063_v6, %v1062_v3  ;;  %693 = vst.msk [vmem:[%s1359_s29 + $0xb0] sm:$0xff] %vm670_vm0, %v1109_v8  ;;  %v1438_v15 = vsel %vm670_vm0, %v1109_v8, 0.0 }
 0x116   : > { %v715_v14 = vadd.f32 %v714_v10, %v713_v56  ;;  %v796_v16 = vmul.f32 %v1109_v8, %v1109_v8  ;;  %v1112_v17 = vadd.f32 %v1111_v13, %v1110_v9 }
 0x117   : > { %v817_v18 = vsel %vm670_vm0, %v780_v11, 0.0  ;;  %678 = vst.msk [vmem:[%s1359_s29 + $0x38] sm:$0xff] %vm670_vm0, %v1064_v12  ;;  %v716_v19 = vsel %vm670_vm0, %v1064_v12, 0.0  ;;  %v781_v21 = vmul.f32 %v1064_v12, %v1064_v12 }
 0x118   : > { %v818_v22 = vadd.f32 %v817_v18, %v816_v63  ;;  %v717_v23 = vadd.f32 %v716_v19, %v715_v14  ;;  %v1445_v24 = vsel %vm670_vm0, %v796_v16, 0.0  ;;  %694 = vst.msk [vmem:[%s1359_s29 + $0xb8] sm:$0xff] %vm670_vm0, %v1112_v17  ;;  %v1450_v25 = vsel %vm670_vm0, %v1112_v17, 0.0 }
 0x119   : > { %v819_v26 = vsel %vm670_vm0, %v781_v21, 0.0  ;;  %v1065_v27 = vpop.f32.mrb[16].mxu0  ;;  %v797_v30 = vmul.f32 %v1112_v17, %v1112_v17  ;;  %v1113_v33 = vpop.f32.mrb[16].mxu1 }
 0x11a   : > { %v820_v31 = vadd.f32 %v819_v26, %v818_v22  ;;  %v1066_v32 = vpop.f32.mrb[17].mxu0  ;;  %v1114_v37 = vpop.f32.mrb[17].mxu1 }
 0x11b   : > { %v1067_v34 = vadd.f32 %v1066_v32, %v1065_v27  ;;  %v1068_v35 = vpop.f32.mrb[18].mxu0  ;;  %v1454_v36 = vsel %vm670_vm0, %v797_v30, 0.0  ;;  %v1115_v40 = vadd.f32 %v1114_v37, %v1113_v33  ;;  %v1116_v41 = vpop.f32.mrb[18].mxu1 }
 0x11c   : > { %v1069_v39 = vpop.f32.mrb[19].mxu0  ;;  %v1117_v45 = vpop.f32.mrb[19].mxu1 }
 0x11d   : > { %679 = vst.msk [vmem:[%s1359_s29 + $0x40] sm:$0xff] %vm670_vm0, %v1067_v34  ;;  %v718_v42 = vsel %vm670_vm0, %v1067_v34, 0.0  ;;  %v782_v43 = vmul.f32 %v1067_v34, %v1067_v34  ;;  %v1070_v44 = vadd.f32 %v1069_v39, %v1068_v35  ;;  %695 = vst.msk [vmem:[%s1359_s29 + $0xc0] sm:$0xff] %vm670_vm0, %v1115_v40  ;;  %v1462_v47 = vsel %vm670_vm0, %v1115_v40, 0.0 }
 0x11e   : > { %v719_v46 = vadd.f32 %v718_v42, %v717_v23  ;;  %v798_v49 = vmul.f32 %v1115_v40, %v1115_v40  ;;  %v1118_v50 = vadd.f32 %v1117_v45, %v1116_v41 }
 0x11f   : > { %v821_v51 = vsel %vm670_vm0, %v782_v43, 0.0  ;;  %680 = vst.msk [vmem:[%s1359_s29 + $0x48] sm:$0xff] %vm670_vm0, %v1070_v44  ;;  %v720_v52 = vsel %vm670_vm0, %v1070_v44, 0.0  ;;  %v783_v53 = vmul.f32 %v1070_v44, %v1070_v44 }
 0x120   : > { %v822_v54 = vadd.f32 %v821_v51, %v820_v31  ;;  %v721_v56 = vadd.f32 %v720_v52, %v719_v46  ;;  %v1469_v59 = vsel %vm670_vm0, %v798_v49, 0.0  ;;  %696 = vst.msk [vmem:[%s1359_s29 + $0xc8] sm:$0xff] %vm670_vm0, %v1118_v50  ;;  %v1474_v61 = vsel %vm670_vm0, %v1118_v50, 0.0 }
 0x121   : > { %v823_v62 = vsel %vm670_vm0, %v783_v53, 0.0  ;;  %v1071_v63 = vpop.f32.mrb[20].mxu0  ;;  %v799_v0 = vmul.f32 %v1118_v50, %v1118_v50  ;;  %v1119_v3 = vpop.f32.mrb[20].mxu1 }
 0x122   : > { %v824_v1 = vadd.f32 %v823_v62, %v822_v54  ;;  %v1072_v2 = vpop.f32.mrb[21].mxu0  ;;  %v1120_v9 = vpop.f32.mrb[21].mxu1 }
 0x123   : > { %v1073_v5 = vadd.f32 %v1072_v2, %v1071_v63  ;;  %v1074_v6 = vpop.f32.mrb[22].mxu0  ;;  %v1478_v8 = vsel %vm670_vm0, %v799_v0, 0.0  ;;  %v1121_v11 = vadd.f32 %v1120_v9, %v1119_v3  ;;  %v1122_v12 = vpop.f32.mrb[22].mxu1 }
 0x124   : > { %v1075_v10 = vpop.f32.mrb[23].mxu0  ;;  %v1123_v17 = vpop.f32.mrb[23].mxu1 }
 0x125   : > { %681 = vst.msk [vmem:[%s1359_s29 + $0x50] sm:$0xff] %vm670_vm0, %v1073_v5  ;;  %v722_v13 = vsel %vm670_vm0, %v1073_v5, 0.0  ;;  %v784_v14 = vmul.f32 %v1073_v5, %v1073_v5  ;;  %v1076_v16 = vadd.f32 %v1075_v10, %v1074_v6  ;;  %697 = vst.msk [vmem:[%s1359_s29 + $0xd0] sm:$0xff] %vm670_vm0, %v1121_v11  ;;  %v1486_v19 = vsel %vm670_vm0, %v1121_v11, 0.0 }
 0x126   : > { %v723_v18 = vadd.f32 %v722_v13, %v721_v56  ;;  %v800_v21 = vmul.f32 %v1121_v11, %v1121_v11  ;;  %v1124_v22 = vadd.f32 %v1123_v17, %v1122_v12 }
 0x127   : > { %v825_v23 = vsel %vm670_vm0, %v784_v14, 0.0  ;;  %682 = vst.msk [vmem:[%s1359_s29 + $0x58] sm:$0xff] %vm670_vm0, %v1076_v16  ;;  %v724_v26 = vsel %vm670_vm0, %v1076_v16, 0.0  ;;  %v785_v27 = vmul.f32 %v1076_v16, %v1076_v16 }
 0x128   : > { %v826_v30 = vadd.f32 %v825_v23, %v824_v1  ;;  %v725_v31 = vadd.f32 %v724_v26, %v723_v18  ;;  %v1493_v32 = vsel %vm670_vm0, %v800_v21, 0.0  ;;  %698 = vst.msk [vmem:[%s1359_s29 + $0xd8] sm:$0xff] %vm670_vm0, %v1124_v22  ;;  %v1498_v33 = vsel %vm670_vm0, %v1124_v22, 0.0 }
 0x129   : > { %v827_v34 = vsel %vm670_vm0, %v785_v27, 0.0  ;;  %v1077_v35 = vpop.f32.mrb[24].mxu0  ;;  %v801_v37 = vmul.f32 %v1124_v22, %v1124_v22  ;;  %v1125_v41 = vpop.f32.mrb[24].mxu1 }
 0x12a   : > { %v828_v39 = vadd.f32 %v827_v34, %v826_v30  ;;  %v1078_v40 = vpop.f32.mrb[25].mxu0  ;;  %v1126_v45 = vpop.f32.mrb[25].mxu1 }
 0x12b   : > { %v1079_v42 = vadd.f32 %v1078_v40, %v1077_v35  ;;  %v1080_v43 = vpop.f32.mrb[26].mxu0  ;;  %v1502_v44 = vsel %vm670_vm0, %v801_v37, 0.0  ;;  %v1127_v49 = vadd.f32 %v1126_v45, %v1125_v41  ;;  %v1128_v50 = vpop.f32.mrb[26].mxu1 }
 0x12c   : > { %v1081_v46 = vpop.f32.mrb[27].mxu0  ;;  %v1129_v54 = vpop.f32.mrb[27].mxu1 }
 0x12d   : > { %683 = vst.msk [vmem:[%s1359_s29 + $0x60] sm:$0xff] %vm670_vm0, %v1079_v42  ;;  %v726_v51 = vsel %vm670_vm0, %v1079_v42, 0.0  ;;  %v786_v52 = vmul.f32 %v1079_v42, %v1079_v42  ;;  %v1082_v53 = vadd.f32 %v1081_v46, %v1080_v43  ;;  %699 = vst.msk [vmem:[%s1359_s29 + $0xe0] sm:$0xff] %vm670_vm0, %v1127_v49  ;;  %v1510_v62 = vsel %vm670_vm0, %v1127_v49, 0.0 }
 0x12e   : > { %v727_v56 = vadd.f32 %v726_v51, %v725_v31  ;;  %v802_v63 = vmul.f32 %v1127_v49, %v1127_v49  ;;  %v1130_v0 = vadd.f32 %v1129_v54, %v1128_v50  ;;  %v790_v43 = vmul.f32 %v1361_v55, %v1361_v55 }
 0x12f   : > { %v829_v1 = vsel %vm670_vm0, %v786_v52, 0.0  ;;  %684 = vst.msk [vmem:[%s1359_s29 + $0x68] sm:$0xff] %vm670_vm0, %v1082_v53  ;;  %v728_v2 = vsel %vm670_vm0, %v1082_v53, 0.0  ;;  %v787_v3 = vmul.f32 %v1082_v53, %v1082_v53  ;;  %v734_v54 = vsel %vm670_vm0, %v1361_v55, 0.0 }
 0x130   : > { %v830_v5 = vadd.f32 %v829_v1, %v828_v39  ;;  %v729_v6 = vadd.f32 %v728_v2, %v727_v56  ;;  %v1517_v9 = vsel %vm670_vm0, %v802_v63, 0.0  ;;  %700 = vst.msk [vmem:[%s1359_s29 + $0xe8] sm:$0xff] %vm670_vm0, %v1130_v0  ;;  %v1522_v10 = vsel %vm670_vm0, %v1130_v0, 0.0 }
 0x131   : > { %v831_v11 = vsel %vm670_vm0, %v787_v3, 0.0  ;;  %v1083_v12 = vpop.f32.mrb[28].mxu0  ;;  %v803_v13 = vmul.f32 %v1130_v0, %v1130_v0  ;;  %v1131_v17 = vpop.f32.mrb[28].mxu1  ;;  %v837_v2 = vsel %vm670_vm0, %v790_v43, 0.0  ;;  %v736_v3 = vsel %vm670_vm0, %v1368_v60, 0.0 }
 0x132   : > { %v832_v14 = vadd.f32 %v831_v11, %v830_v5  ;;  %v1084_v16 = vpop.f32.mrb[29].mxu0  ;;  %v1132_v23 = vpop.f32.mrb[29].mxu1 }
 0x133   : > { %v1085_v18 = vadd.f32 %v1084_v16, %v1083_v12  ;;  %v1086_v21 = vpop.f32.mrb[30].mxu0  ;;  %v863_v22 = vsel %vm670_vm0, %v803_v13, 0.0  ;;  %v1133_v27 = vadd.f32 %v1132_v23, %v1131_v17  ;;  %v1134_v30 = vpop.f32.mrb[30].mxu1 }
 0x134   : > { %v1087_v26 = vpop.f32.mrb[31].mxu0  ;;  %v1135_v37 = vpop.f32.mrb[31].mxu1 }
 0x135   : > { %685 = vst.msk [vmem:[%s1359_s29 + $0x70] sm:$0xff] %vm670_vm0, %v1085_v18  ;;  %v730_v31 = vsel %vm670_vm0, %v1085_v18, 0.0  ;;  %v788_v34 = vmul.f32 %v1085_v18, %v1085_v18  ;;  %v1088_v35 = vadd.f32 %v1087_v26, %v1086_v21  ;;  %701 = vst.msk [vmem:[%s1359_s29 + $0xf0] sm:$0xff] %vm670_vm0, %v1133_v27  ;;  %v762_v40 = vsel %vm670_vm0, %v1133_v27, 0.0 }
 0x136   : > { %v731_v39 = vadd.f32 %v730_v31, %v729_v6  ;;  %v804_v41 = vmul.f32 %v1133_v27, %v1133_v27  ;;  %v1136_v42 = vadd.f32 %v1135_v37, %v1134_v30 }
 0x137   : > { %v833_v45 = vsel %vm670_vm0, %v788_v34, 0.0  ;;  %686 = vst.msk [vmem:[%s1359_s29 + $0x78] sm:$0xff] %vm670_vm0, %v1088_v35  ;;  %v732_v46 = vsel %vm670_vm0, %v1088_v35, 0.0  ;;  %v789_v49 = vmul.f32 %v1088_v35, %v1088_v35 }
 0x138   : > { %v834_v50 = vadd.f32 %v833_v45, %v832_v14  ;;  %v733_v51 = vadd.f32 %v732_v46, %v731_v39  ;;  %v865_v52 = vsel %vm670_vm0, %v804_v41, 0.0  ;;  %702 = vst.msk [vmem:[%s1359_s29 + $0xf8] sm:$0xff] %vm670_vm0, %v1136_v42  ;;  %v764_v53 = vsel %vm670_vm0, %v1136_v42, 0.0 }
 0x139   : > { %v835_v56 = vsel %vm670_vm0, %v789_v49, 0.0  ;;  %v805_v63 = vmul.f32 %v1136_v42, %v1136_v42 }
 0x13a   : > { %v735_v0 = vadd.f32 %v734_v54, %v733_v51  ;;  %v836_v1 = vadd.f32 %v835_v56, %v834_v50 }
 0x13b   : > { %v867_v5 = vsel %vm670_vm0, %v805_v63, 0.0 }
 0x13c   : > { %v737_v6 = vadd.f32 %v736_v3, %v735_v0  ;;  %v838_v11 = vadd.f32 %v837_v2, %v836_v1 }
 0x13e   : > { %v739_v12 = vadd.f32 %v1390_v20, %v737_v6  ;;  %v840_v13 = vadd.f32 %v1382_v7, %v838_v11 }
 0x140   : > { %v741_v55 = vadd.f32 %v1402_v29, %v739_v12  ;;  %v842_v14 = vadd.f32 %v1397_v28, %v840_v13 }
 0x142   : > { %v844_v16 = vadd.f32 %v1406_v38, %v842_v14  ;;  %v743_v17 = vadd.f32 %v1414_v48, %v741_v55 }
 0x144   : > { %v745_v18 = vadd.f32 %v1426_v58, %v743_v17  ;;  %v846_v60 = vadd.f32 %v1421_v57, %v844_v16 }
 0x146   : > { %v747_v21 = vadd.f32 %v1438_v15, %v745_v18  ;;  %v848_v23 = vadd.f32 %v1430_v4, %v846_v60 }
 0x148   : > { %v749_v20 = vadd.f32 %v1450_v25, %v747_v21  ;;  %v850_v7 = vadd.f32 %v1445_v24, %v848_v23 }
 0x14a   : > { %v751_v29 = vadd.f32 %v1462_v47, %v749_v20  ;;  %v852_v28 = vadd.f32 %v1454_v36, %v850_v7 }
 0x14c   : > { %v854_v38 = vadd.f32 %v1469_v59, %v852_v28  ;;  %v753_v48 = vadd.f32 %v1474_v61, %v751_v29 }
 0x14e   : > { %v856_v57 = vadd.f32 %v1478_v8, %v854_v38  ;;  %v755_v58 = vadd.f32 %v1486_v19, %v753_v48 }
 0x150   : > { %v858_v4 = vadd.f32 %v1493_v32, %v856_v57  ;;  %v757_v15 = vadd.f32 %v1498_v33, %v755_v58 }
 0x152   : > { %v860_v24 = vadd.f32 %v1502_v44, %v858_v4  ;;  %v759_v25 = vadd.f32 %v1510_v62, %v757_v15 }
 0x154   : > { %v862_v47 = vadd.f32 %v1517_v9, %v860_v24  ;;  %v761_v36 = vadd.f32 %v1522_v10, %v759_v25 }
 0x156   : > { %v864_v59 = vadd.f32 %v863_v22, %v862_v47  ;;  %v763_v26 = vadd.f32 %v762_v40, %v761_v36 }
 0x158   : > { %v866_v61 = vadd.f32 %v865_v52, %v864_v59  ;;  %v765_v27 = vadd.f32 %v764_v53, %v763_v26 }
 0x15a   : > { %v766_v8 = vrot.slane %v765_v27, 4  ;;  %v868_v30 = vadd.f32 %v867_v5, %v866_v61 }
 0x15c   : > { %v767_v19 = vadd.f32 %v766_v8, %v765_v27  ;;  %v869_v32 = vrot.slane %v868_v30, 4 }
 0x15e   : > { %v768_v31 = vrot.slane %v767_v19, 2  ;;  %v870_v33 = vadd.f32 %v869_v32, %v868_v30 }
 0x160   : > { %v769_v44 = vadd.f32 %v768_v31, %v767_v19  ;;  %v871_v34 = vrot.slane %v870_v33, 2 }
 0x162   : > { %v770_v62 = vrot.slane %v769_v44, 1  ;;  %v872_v35 = vadd.f32 %v871_v34, %v870_v33 }
 0x164   : > { %v771_v9 = vadd.f32 %v770_v62, %v769_v44  ;;  %v873_v10 = vrot.slane %v872_v35, 1 }
 0x166   : > { %773 = vst.msk [vmem:[%s187_s5] sm:$0x1] %vm772_vm1, %v771_v9  ;;  %v874_v22 = vadd.f32 %v873_v10, %v872_v35 }
 0x168   : > { %875 = vst.msk [vmem:[%s187_s5 + $0x1] sm:$0x1] %vm772_vm1, %v874_v22 }
 0x169 PF: > { %s14_s12 = sadd.s32 1, %s1231_s12  }
 0x16a   : > { %p11_p5 = scmp.ge.s32.totalorder %s14_s12, 4  }
 0x16c   :  { %13 = sbr.rel (!%p11_p5) target bundleno = 1 (0x1), region = 70 }

// kernel: decoder_forward.10
= control target key start
LH: loop header
LB: loop body
LE: loop exit
PB: predicated region body
PF: predicated region fallthrough
CT: control target
= control target key end

     0   :  { %s696_s15 = smov 0   ;;  %s903_s0 = inlined_call_operand.vmem [shape: f32[512,8], index: 0, kind: input, shape index: {}]   ;;  %s904_s1 = inlined_call_operand.vmem [shape: f32[16,8], index: 1, kind: input, shape index: {}]   ;;  %s905_s2 = inlined_call_operand.vmem [shape: f32[1,8], index: 2, kind: input, shape index: {}]   ;;  %s906_s3 = inlined_call_operand.vmem [shape: f32[1,8], index: 3, kind: input, shape index: {}]   ;;  %s907_s4 = inlined_call_operand.vmem [shape: bf16[512,8], index: 4, kind: output, shape index: {}]  }
   0x1 LB: > { %s578_s16 = sadd.s32 4294967295, %s669_s15   ;;  %p582_p0 = scmp.ge.s32.totalorder %s669_s15, 1  ;;  %s669_s15 = sphi %s696_s15, %s14_s15  }
   0x2   : > { %p163_p1 = scmp.lt.s32.totalorder %s669_s15, 3 }
   0x4   : > { %p164_p2 = pnand %p582_p0, %p163_p1 }
   0x5   : > { %v201_v0 = vld [vmem:[%s904_s1] sm:$0x1] (!%p164_p2)  ;;  %v203_v1 = vld [vmem:[%s904_s1 + $0x1] sm:$0x1] (!%p164_p2)  ;;  %v205_v2 = vld [vmem:[%s904_s1 + $0x8] sm:$0x1] (!%p164_p2)  ;;  %v254_v12 = vlaneseq (!%p164_p2) }
   0x6   : > { %167 = sbr.rel (%p164_p2) target bundleno = 72 (0x48), region = 36  ;;  %v207_v3 = vld [vmem:[%s904_s1 + $0x9] sm:$0x1] (!%p164_p2)  ;;  %v206_v4 = vadd.f32 (!%p164_p2), %v205_v2, %v201_v0  ;;  %s583_s25 = sshll.u32 (!%p164_p2), %s578_s16, 5  ;;  %v214_v14 = vld [vmem:[%s905_s2] sm:$0x1] (!%p164_p2) }
   0x7   : > { %v208_v5 = vadd.f32 (!%p164_p2), %v207_v3, %v203_v1  ;;  %p190_p3 = scmp.lt.s32.totalorder (!%p164_p2), %s583_s25, 63  ;;  %v255_v13 = vshrl.u32 (!%p164_p2), %v254_v12, 7  ;;  %v218_v18 = vld [vmem:[%s906_s3] sm:$0x1] (!%p164_p2)  ;;  %vm489_vm0 = vcmask (!%p164_p2), 60416  }
   0x8   : > { %v209_v6 = vmul.f32 (!%p164_p2), 0.00295858, %v206_v4 }
   0x9   : > { %v210_v7 = vmul.f32 (!%p164_p2), 0.00295858, %v208_v5  ;;  %v256_v15 = vsub.s32 (!%p164_p2), 0, %v255_v13 }
   0xa   : > { %v211_v8 = vmul.f32 (!%p164_p2), %v209_v6, %v209_v6 }
   0xc   : > { %v212_v9 = vsub.f32 (!%p164_p2), %v210_v7, %v211_v8 }
   0xd   : > { %s909_s25 = smov (!%p190_p3, %s583_s25), 63 }
   0xe   : > { %v213_v10 = vmax.f32 %v212_v9, 0.0  ;;  %s584_s26 = sshll.u32 %s909_s25, 3  ;;  %s586_s8 = sshll.u32 %s909_s25, 2 }
   0xf   : > { %s722_s29 = scalar_lea.vmem %s903_s0, %s584_s26  ;;  %s774_s11 = scalar_lea.vmem %s907_s4, %s586_s8 }
  0x10   : > { %v215_v11 = vadd.f32 1e-05, %v213_v10  ;;  %v221_v19 = vld [vmem:[%s722_s29] sm:$0xff]  ;;  %v222_v20 = vld [vmem:[%s722_s29 + $0x8] sm:$0xff]  ;;  %v223_v21 = vld [vmem:[%s722_s29 + $0x10] sm:$0xff] }
  0x11   : > { %v224_v22 = vld [vmem:[%s722_s29 + $0x18] sm:$0xff]  ;;  %v225_v23 = vld [vmem:[%s722_s29 + $0x20] sm:$0xff]  ;;  %v226_v26 = vld [vmem:[%s722_s29 + $0x28] sm:$0xff] }
  0x12   : > { %661 = vrsqrt.f32 %v215_v11  ;;  %v227_v27 = vld [vmem:[%s722_s29 + $0x30] sm:$0xff]  ;;  %v228_v28 = vld [vmem:[%s722_s29 + $0x38] sm:$0xff]  ;;  %v229_v29 = vld [vmem:[%s722_s29 + $0x40] sm:$0xff] }
  0x13   : > { %v230_v30 = vld [vmem:[%s722_s29 + $0x48] sm:$0xff]  ;;  %v231_v31 = vld [vmem:[%s722_s29 + $0x50] sm:$0xff]  ;;  %v232_v36 = vld [vmem:[%s722_s29 + $0x58] sm:$0xff] }
  0x14   : > { %v233_v37 = vld [vmem:[%s722_s29 + $0x60] sm:$0xff]  ;;  %v234_v38 = vld [vmem:[%s722_s29 + $0x68] sm:$0xff]  ;;  %v235_v7 = vld [vmem:[%s722_s29 + $0x70] sm:$0xff] }
  0x15   : > { %v236_v8 = vld [vmem:[%s722_s29 + $0x78] sm:$0xff] }
  0x1c   : > { %v662_v16 = vpop.eup %661 }
  0x1d   : > { %v217_v17 = vmul.f32 %v662_v16, %v214_v14 }
  0x1f   : > { %v219_v24 = vmul.f32 %v217_v17, %v209_v6  ;;  %v735_v25 = vrot.slane %v217_v17, %v256_v15 }
  0x21   : > { %v220_v32 = vsub.f32 %v218_v18, %v219_v24  ;;  %v259_v33 = vmul.f32 %v735_v25, %v221_v19  ;;  %v260_v34 = vmul.f32 %v735_v25, %v222_v20  ;;  %v261_v35 = vmul.f32 %v735_v25, %v223_v21 }
  0x22   : > { %v262_v39 = vmul.f32 %v735_v25, %v224_v22  ;;  %v263_v40 = vmul.f32 %v735_v25, %v225_v23  ;;  %v264_v41 = vmul.f32 %v735_v25, %v226_v26  ;;  %v265_v42 = vmul.f32 %v735_v25, %v227_v27  ;;  %v237_v26 = vld [vmem:[%s722_s29 + $0x80] sm:$0xff] }
  0x23   : > { %v753_v43 = vrot.slane %v220_v32, %v256_v15  ;;  %v266_v44 = vmul.f32 %v735_v25, %v228_v28  ;;  %v267_v45 = vmul.f32 %v735_v25, %v229_v29  ;;  %v268_v46 = vmul.f32 %v735_v25, %v230_v30  ;;  %v239_v32 = vld [vmem:[%s722_s29 + $0x90] sm:$0xff] }
  0x24   : > { %v269_v47 = vmul.f32 %v735_v25, %v231_v31  ;;  %v270_v48 = vmul.f32 %v735_v25, %v232_v36  ;;  %v271_v49 = vmul.f32 %v735_v25, %v233_v37  ;;  %v272_v50 = vmul.f32 %v735_v25, %v234_v38  ;;  %v238_v31 = vld [vmem:[%s722_s29 + $0x88] sm:$0xff]  ;;  %v241_v38 = vld [vmem:[%s722_s29 + $0xa0] sm:$0xff] }
  0x25   : > { %v297_v51 = vadd.f32 %v753_v43, %v259_v33  ;;  %v298_v52 = vadd.f32 %v753_v43, %v260_v34  ;;  %v299_v53 = vadd.f32 %v753_v43, %v261_v35  ;;  %v300_v54 = vadd.f32 %v753_v43, %v262_v39  ;;  %v240_v33 = vld [vmem:[%s722_s29 + $0x98] sm:$0xff]  ;;  %v242_v39 = vld [vmem:[%s722_s29 + $0xa8] sm:$0xff] }
  0x26   : > { %v301_v55 = vadd.f32 %v753_v43, %v263_v40  ;;  %v302_v56 = vadd.f32 %v753_v43, %v264_v41  ;;  %v303_v57 = vadd.f32 %v753_v43, %v265_v42  ;;  %v304_v58 = vadd.f32 %v753_v43, %v266_v44 }
  0x27   : > { %v329_v59 = vmax.f32 %v297_v51, 0.0  ;;  %v330_v60 = vmax.f32 %v298_v52, 0.0  ;;  %v331_v61 = vmax.f32 %v299_v53, 0.0  ;;  %v332_v62 = vmax.f32 %v300_v54, 0.0 }
  0x28   : > { %v333_v63 = vmax.f32 %v301_v55, 0.0  ;;  %v334_v0 = vmax.f32 %v302_v56, 0.0  ;;  %v335_v1 = vmax.f32 %v303_v57, 0.0  ;;  %v336_v2 = vmax.f32 %v304_v58, 0.0 }
  0x29   : > { %v621_v3 = vpack.c.bf16 %v329_v59, %v329_v59  ;;  %v622_v4 = vpack.c.bf16 %v330_v60, %v330_v60  ;;  %v623_v5 = vpack.c.bf16 %v331_v61, %v331_v61  ;;  %v624_v6 = vpack.c.bf16 %v332_v62, %v332_v62 }
  0x2a   : > { %v625_v9 = vpack.c.bf16 %v333_v63, %v333_v63  ;;  %v626_v10 = vpack.c.bf16 %v334_v0, %v334_v0  ;;  %v627_v11 = vpack.c.bf16 %v335_v1, %v335_v1  ;;  %v628_v12 = vpack.c.bf16 %v336_v2, %v336_v2 }
  0x2b   : > { %490 = vst.msk [vmem:[%s774_s11] sm:$0xf] %vm489_vm0, %v621_v3  ;;  %491 = vst.msk [vmem:[%s774_s11 + $0x4] sm:$0xf] %vm489_vm0, %v622_v4  ;;  %v305_v13 = vadd.f32 %v753_v43, %v267_v45  ;;  %v306_v14 = vadd.f32 %v753_v43, %v268_v46  ;;  %v307_v15 = vadd.f32 %v753_v43, %v269_v47  ;;  %v245_v3 = vld [vmem:[%s722_s29 + $0xc0] sm:$0xff] }
  0x2c   : > { %492 = vst.msk [vmem:[%s774_s11 + $0x8] sm:$0xf] %vm489_vm0, %v623_v5  ;;  %493 = vst.msk [vmem:[%s774_s11 + $0xc] sm:$0xf] %vm489_vm0, %v624_v6  ;;  %v308_v16 = vadd.f32 %v753_v43, %v270_v48  ;;  %v309_v17 = vadd.f32 %v753_v43, %v271_v49  ;;  %v310_v18 = vadd.f32 %v753_v43, %v272_v50  ;;  %v243_v49 = vld [vmem:[%s722_s29 + $0xb0] sm:$0xff]  ;;  %v244_v50 = vld [vmem:[%s722_s29 + $0xb8] sm:$0xff] }
  0x2d   : > { %494 = vst.msk [vmem:[%s774_s11 + $0x10] sm:$0xf] %vm489_vm0, %v625_v9  ;;  %495 = vst.msk [vmem:[%s774_s11 + $0x14] sm:$0xf] %vm489_vm0, %v626_v10  ;;  %v273_v19 = vmul.f32 %v735_v25, %v235_v7  ;;  %v274_v20 = vmul.f32 %v735_v25, %v236_v8  ;;  %v337_v21 = vmax.f32 %v305_v13, 0.0  ;;  %v338_v22 = vmax.f32 %v306_v14, 0.0 }
  0x2e   : > { %496 = vst.msk [vmem:[%s774_s11 + $0x18] sm:$0xf] %vm489_vm0, %v627_v11  ;;  %497 = vst.msk [vmem:[%s774_s11 + $0x1c] sm:$0xf] %vm489_vm0, %v628_v12  ;;  %v339_v23 = vmax.f32 %v307_v15, 0.0  ;;  %v340_v24 = vmax.f32 %v308_v16, 0.0  ;;  %v275_v45 = vmul.f32 %v735_v25, %v237_v26  ;;  %v276_v46 = vmul.f32 %v735_v25, %v238_v31 }
  0x2f   : > { %v341_v27 = vmax.f32 %v309_v17, 0.0  ;;  %v342_v28 = vmax.f32 %v310_v18, 0.0  ;;  %v311_v29 = vadd.f32 %v753_v43, %v273_v19  ;;  %v312_v30 = vadd.f32 %v753_v43, %v274_v20  ;;  %v246_v8 = vld [vmem:[%s722_s29 + $0xc8] sm:$0xff]  ;;  %v247_v9 = vld [vmem:[%s722_s29 + $0xd0] sm:$0xff]  ;;  %v248_v10 = vld [vmem:[%s722_s29 + $0xd8] sm:$0xff] }
  0x30   : > { %v629_v34 = vpack.c.bf16 %v337_v21, %v337_v21  ;;  %v630_v35 = vpack.c.bf16 %v338_v22, %v338_v22  ;;  %v631_v36 = vpack.c.bf16 %v339_v23, %v339_v23  ;;  %v632_v37 = vpack.c.bf16 %v340_v24, %v340_v24  ;;  %v249_v15 = vld [vmem:[%s722_s29 + $0xe0] sm:$0xff]  ;;  %v250_v16 = vld [vmem:[%s722_s29 + $0xe8] sm:$0xff]  ;;  %v251_v26 = vld [vmem:[%s722_s29 + $0xf0] sm:$0xff] }
  0x31   : > { %v633_v40 = vpack.c.bf16 %v341_v27, %v341_v27  ;;  %v634_v41 = vpack.c.bf16 %v342_v28, %v342_v28  ;;  %v343_v42 = vmax.f32 %v311_v29, 0.0  ;;  %v344_v44 = vmax.f32 %v312_v30, 0.0  ;;  %v252_v27 = vld [vmem:[%s722_s29 + $0xf8] sm:$0xff] }
  0x32   : > { %498 = vst.msk [vmem:[%s774_s11 + $0x20] sm:$0xf] %vm489_vm0, %v629_v34  ;;  %499 = vst.msk [vmem:[%s774_s11 + $0x24] sm:$0xf] %vm489_vm0, %v630_v35  ;;  %v277_v47 = vmul.f32 %v735_v25, %v239_v32  ;;  %v278_v48 = vmul.f32 %v735_v25, %v240_v33  ;;  %v279_v53 = vmul.f32 %v735_v25, %v241_v38 }
  0x33   : > { %500 = vst.msk [vmem:[%s774_s11 + $0x28] sm:$0xf] %vm489_vm0, %v631_v36  ;;  %501 = vst.msk [vmem:[%s774_s11 + $0x2c] sm:$0xf] %vm489_vm0, %v632_v37  ;;  %v635_v51 = vpack.c.bf16 %v343_v42, %v343_v42  ;;  %v636_v52 = vpack.c.bf16 %v344_v44, %v344_v44  ;;  %v280_v54 = vmul.f32 %v735_v25, %v242_v39 }
  0x34   : > { %502 = vst.msk [vmem:[%s774_s11 + $0x30] sm:$0xf] %vm489_vm0, %v633_v40  ;;  %503 = vst.msk [vmem:[%s774_s11 + $0x34] sm:$0xf] %vm489_vm0, %v634_v41  ;;  %v313_v55 = vadd.f32 %v753_v43, %v275_v45  ;;  %v314_v56 = vadd.f32 %v753_v43, %v276_v46  ;;  %v315_v57 = vadd.f32 %v753_v43, %v277_v47 }
  0x35   : > { %v316_v58 = vadd.f32 %v753_v43, %v278_v48  ;;  %504 = vst.msk [vmem:[%s774_s11 + $0x38] sm:$0xf] %vm489_vm0, %v635_v51  ;;  %505 = vst.msk [vmem:[%s774_s11 + $0x3c] sm:$0xf] %vm489_vm0, %v636_v52  ;;  %v317_v59 = vadd.f32 %v753_v43, %v279_v53  ;;  %v318_v60 = vadd.f32 %v753_v43, %v280_v54 }
  0x36   : > { %v281_v61 = vmul.f32 %v735_v25, %v243_v49  ;;  %v282_v62 = vmul.f32 %v735_v25, %v244_v50  ;;  %v345_v63 = vmax.f32 %v313_v55, 0.0  ;;  %v346_v0 = vmax.f32 %v314_v56, 0.0 }
  0x37   : > { %v347_v1 = vmax.f32 %v315_v57, 0.0  ;;  %v348_v2 = vmax.f32 %v316_v58, 0.0  ;;  %v349_v4 = vmax.f32 %v317_v59, 0.0  ;;  %v350_v5 = vmax.f32 %v318_v60, 0.0 }
  0x38   : > { %v319_v6 = vadd.f32 %v753_v43, %v281_v61  ;;  %v320_v7 = vadd.f32 %v753_v43, %v282_v62  ;;  %v637_v11 = vpack.c.bf16 %v345_v63, %v345_v63  ;;  %v638_v12 = vpack.c.bf16 %v346_v0, %v346_v0 }
  0x39   : > { %v639_v13 = vpack.c.bf16 %v347_v1, %v347_v1  ;;  %v640_v14 = vpack.c.bf16 %v348_v2, %v348_v2  ;;  %v641_v17 = vpack.c.bf16 %v349_v4, %v349_v4  ;;  %v642_v18 = vpack.c.bf16 %v350_v5, %v350_v5 }
  0x3a   : > { %v351_v19 = vmax.f32 %v319_v6, 0.0  ;;  %v352_v20 = vmax.f32 %v320_v7, 0.0  ;;  %506 = vst.msk [vmem:[%s774_s11 + $0x40] sm:$0xf] %vm489_vm0, %v637_v11  ;;  %507 = vst.msk [vmem:[%s774_s11 + $0x44] sm:$0xf] %vm489_vm0, %v638_v12  ;;  %v283_v21 = vmul.f32 %v735_v25, %v245_v3  ;;  %v284_v22 = vmul.f32 %v735_v25, %v246_v8 }
  0x3b   : > { %508 = vst.msk [vmem:[%s774_s11 + $0x48] sm:$0xf] %vm489_vm0, %v639_v13  ;;  %509 = vst.msk [vmem:[%s774_s11 + $0x4c] sm:$0xf] %vm489_vm0, %v640_v14  ;;  %v285_v23 = vmul.f32 %v735_v25, %v247_v9  ;;  %v286_v24 = vmul.f32 %v735_v25, %v248_v10  ;;  %v287_v30 = vmul.f32 %v735_v25, %v249_v15 }
  0x3c   : > { %510 = vst.msk [vmem:[%s774_s11 + $0x50] sm:$0xf] %vm489_vm0, %v641_v17  ;;  %511 = vst.msk [vmem:[%s774_s11 + $0x54] sm:$0xf] %vm489_vm0, %v642_v18  ;;  %v643_v28 = vpack.c.bf16 %v351_v19, %v351_v19  ;;  %v644_v29 = vpack.c.bf16 %v352_v20, %v352_v20  ;;  %v288_v31 = vmul.f32 %v735_v25, %v250_v16 }
  0x3d   : > { %v321_v32 = vadd.f32 %v753_v43, %v283_v21  ;;  %v322_v33 = vadd.f32 %v753_v43, %v284_v22  ;;  %v323_v34 = vadd.f32 %v753_v43, %v285_v23  ;;  %v324_v35 = vadd.f32 %v753_v43, %v286_v24 }
  0x3e   : > { %512 = vst.msk [vmem:[%s774_s11 + $0x58] sm:$0xf] %vm489_vm0, %v643_v28  ;;  %513 = vst.msk [vmem:[%s774_s11 + $0x5c] sm:$0xf] %vm489_vm0, %v644_v29  ;;  %v325_v36 = vadd.f32 %v753_v43, %v287_v30  ;;  %v326_v37 = vadd.f32 %v753_v43, %v288_v31  ;;  %v289_v38 = vmul.f32 %v735_v25, %v251_v26 }
  0x3f   : > { %v290_v39 = vmul.f32 %v735_v25, %v252_v27  ;;  %v353_v40 = vmax.f32 %v321_v32, 0.0  ;;  %v354_v41 = vmax.f32 %v322_v33, 0.0  ;;  %v355_v42 = vmax.f32 %v323_v34, 0.0 }
  0x40   : > { %v356_v44 = vmax.f32 %v324_v35, 0.0  ;;  %v357_v45 = vmax.f32 %v325_v36, 0.0  ;;  %v358_v46 = vmax.f32 %v326_v37, 0.0  ;;  %v327_v47 = vadd.f32 %v753_v43, %v289_v38 }
  0x41   : > { %v328_v48 = vadd.f32 %v753_v43, %v290_v39  ;;  %v645_v49 = vpack.c.bf16 %v353_v40, %v353_v40  ;;  %v646_v50 = vpack.c.bf16 %v354_v41, %v354_v41  ;;  %v647_v25 = vpack.c.bf16 %v355_v42, %v355_v42 }
  0x42   : > { %v648_v51 = vpack.c.bf16 %v356_v44, %v356_v44  ;;  %v649_v52 = vpack.c.bf16 %v357_v45, %v357_v45  ;;  %v650_v53 = vpack.c.bf16 %v358_v46, %v358_v46  ;;  %v359_v54 = vmax.f32 %v327_v47, 0.0 }
  0x43   : > { %v360_v55 = vmax.f32 %v328_v48, 0.0  ;;  %514 = vst.msk [vmem:[%s774_s11 + $0x60] sm:$0xf] %vm489_vm0, %v645_v49  ;;  %515 = vst.msk [vmem:[%s774_s11 + $0x64] sm:$0xf] %vm489_vm0, %v646_v50 }
  0x44   : > { %516 = vst.msk [vmem:[%s774_s11 + $0x68] sm:$0xf] %vm489_vm0, %v647_v25  ;;  %517 = vst.msk [vmem:[%s774_s11 + $0x6c] sm:$0xf] %vm489_vm0, %v648_v51  ;;  %v651_v43 = vpack.c.bf16 %v359_v54, %v359_v54 }
  0x45   : > { %518 = vst.msk [vmem:[%s774_s11 + $0x70] sm:$0xf] %vm489_vm0, %v649_v52  ;;  %519 = vst.msk [vmem:[%s774_s11 + $0x74] sm:$0xf] %vm489_vm0, %v650_v53  ;;  %v652_v56 = vpack.c.bf16 %v360_v55, %v360_v55 }
  0x46   : > { %520 = vst.msk [vmem:[%s774_s11 + $0x78] sm:$0xf] %vm489_vm0, %v651_v43 }
  0x47   : > { %521 = vst.msk [vmem:[%s774_s11 + $0x7c] sm:$0xf] %vm489_vm0, %v652_v56 }
  0x48 PF: > { %s14_s15 = sadd.s32 1, %s669_s15  }
  0x49   : > { %p11_p4 = scmp.ge.s32.totalorder %s14_s15, 4  }
  0x4b   :  { %13 = sbr.rel (!%p11_p4) target bundleno = 1 (0x1), region = 66 }

// kernel: decoder_forward.11
= control target key start
LH: loop header
LB: loop body
LE: loop exit
PB: predicated region body
PF: predicated region fallthrough
CT: control target
= control target key end

     0   :  { %vm243_vm0 = vcmask 261120   ;;  %s765_s2 = inlined_call_operand.vmem [shape: bf16[512,32], index: 2, kind: input, shape index: {}]   ;;  %s766_s0 = inlined_call_operand.vmem [shape: bf16[4,32], index: 0, kind: input, shape index: {}]   ;;  %s767_s1 = inlined_call_operand.<no memory space> [shape: f32[1,1], index: 1, kind: input, shape index: {}]   ;;  %s768_s3 = inlined_call_operand.vmem [shape: f32[4,512], index: 3, kind: output, shape index: {}]  }
   0x1   :  { %v553_v0 = vld [vmem:[%s765_s2 + $0x40] sm:$0xff]   ;;  %v557_v5 = vld [vmem:[%s765_s2 + $0x48] sm:$0xff]   ;;  %v561_v11 = vld [vmem:[%s765_s2 + $0x50] sm:$0xff]   ;;  %v82_v49 = vstv %s767_s1 }
   0x2   :  { %v554_v1 = vld [vmem:[%s765_s2 + $0xc0] sm:$0xff]   ;;  %537 = vmatprep.subr.msk.bf16.mxu0 %vm243_vm0, %v553_v0  ;;  %v558_v7 = vld [vmem:[%s765_s2 + $0xc8] sm:$0xff]   ;;  %v562_v13 = vld [vmem:[%s765_s2 + $0xd0] sm:$0xff]  }
   0x3   :  { %v555_v2 = vld [vmem:[%s765_s2] sm:$0xff]   ;;  %545 = vmatprep.subr.msk.bf16.mxu1 %vm243_vm0, %v554_v1  ;;  %v559_v8 = vld [vmem:[%s765_s2 + $0x8] sm:$0xff]   ;;  %v563_v14 = vld [vmem:[%s765_s2 + $0x10] sm:$0xff]  }
   0x4   :  { %v556_v3 = vld [vmem:[%s765_s2 + $0x80] sm:$0xff]   ;;  %v248_v4 = vsel %vm243_vm0, %v555_v2, 0  ;;  %v560_v9 = vld [vmem:[%s765_s2 + $0x88] sm:$0xff]   ;;  %v251_v10 = vsel %vm243_vm0, %v559_v8, 0  ;;  %v564_v15 = vld [vmem:[%s765_s2 + $0x90] sm:$0xff]   ;;  %v254_v16 = vsel %vm243_vm0, %v563_v14, 0 }
   0x5   :  { %502 = vmatpush3.bf16.xpose.msra.mxu0 %v248_v4  ;;  %v296_v6 = vsel %vm243_vm0, %v556_v3, 0  ;;  %v299_v12 = vsel %vm243_vm0, %v560_v9, 0  ;;  %v565_v17 = vld [vmem:[%s765_s2 + $0x58] sm:$0xff]   ;;  %v302_v18 = vsel %vm243_vm0, %v564_v15, 0  ;;  %v569_v23 = vld [vmem:[%s765_s2 + $0x60] sm:$0xff]   ;;  %v573_v30 = vld [vmem:[%s765_s2 + $0x68] sm:$0xff]  }
   0x6   :  { %520 = vmatpush3.bf16.xpose.msra.mxu1 %v296_v6  ;;  %538 = vmatprep.subr.msk.bf16.mxu0 %vm243_vm0, %v557_v5  ;;  %v566_v19 = vld [vmem:[%s765_s2 + $0xd8] sm:$0xff]   ;;  %v570_v25 = vld [vmem:[%s765_s2 + $0xe0] sm:$0xff]   ;;  %v574_v32 = vld [vmem:[%s765_s2 + $0xe8] sm:$0xff]  }
   0x7   :  { %546 = vmatprep.subr.msk.bf16.mxu1 %vm243_vm0, %v558_v7  ;;  %v567_v20 = vld [vmem:[%s765_s2 + $0x18] sm:$0xff]   ;;  %v571_v26 = vld [vmem:[%s765_s2 + $0x20] sm:$0xff]   ;;  %v575_v33 = vld [vmem:[%s765_s2 + $0x28] sm:$0xff]  }
   0x8   :  { %v568_v21 = vld [vmem:[%s765_s2 + $0x98] sm:$0xff]   ;;  %v257_v22 = vsel %vm243_vm0, %v567_v20, 0  ;;  %v572_v27 = vld [vmem:[%s765_s2 + $0xa0] sm:$0xff]   ;;  %v260_v29 = vsel %vm243_vm0, %v571_v26, 0  ;;  %v576_v34 = vld [vmem:[%s765_s2 + $0xa8] sm:$0xff]   ;;  %v263_v35 = vsel %vm243_vm0, %v575_v33, 0 }
   0x9   :  { %v305_v24 = vsel %vm243_vm0, %v568_v21, 0  ;;  %v16_v28 = vld [vmem:[%s766_s0] sm:$0x3]  ;;  %v308_v31 = vsel %vm243_vm0, %v572_v27, 0  ;;  %v577_v36 = vld [vmem:[%s765_s2 + $0x70] sm:$0xff]   ;;  %v311_v37 = vsel %vm243_vm0, %v576_v34, 0 }
   0xa   :  { %517 = vmatprep.mubr.msk.bf16.mxu0 %vm243_vm0, %v16_v28  ;;  %535 = vmatprep.mubr.msk.bf16.mxu1 %vm243_vm0, %v16_v28  ;;  %v578_v38 = vld [vmem:[%s765_s2 + $0xf0] sm:$0xff]   ;;  %v581_v42 = vld [vmem:[%s765_s2 + $0x78] sm:$0xff]  }
   0xb   :  { %v579_v39 = vld [vmem:[%s765_s2 + $0x30] sm:$0xff]   ;;  %v582_v44 = vld [vmem:[%s765_s2 + $0xf8] sm:$0xff]  }
   0xc   :  { %v580_v40 = vld [vmem:[%s765_s2 + $0xb0] sm:$0xff]   ;;  %v266_v41 = vsel %vm243_vm0, %v579_v39, 0  ;;  %v583_v45 = vld [vmem:[%s765_s2 + $0x38] sm:$0xff]  }
   0xd   :  { %504 = vmatpush3.bf16.xpose.msra.mxu0 %v251_v10  ;;  %v314_v43 = vsel %vm243_vm0, %v580_v40, 0  ;;  %v584_v46 = vld [vmem:[%s765_s2 + $0xb8] sm:$0xff]   ;;  %v269_v47 = vsel %vm243_vm0, %v583_v45, 0 }
   0xe   :  { %522 = vmatpush3.bf16.xpose.msra.mxu1 %v299_v12  ;;  %539 = vmatprep.subr.msk.bf16.mxu0 %vm243_vm0, %v561_v11  ;;  %v317_v48 = vsel %vm243_vm0, %v584_v46, 0 }
   0xf   :  { %547 = vmatprep.subr.msk.bf16.mxu1 %vm243_vm0, %v562_v13 }
  0x15   :  { %506 = vmatpush3.bf16.xpose.msra.mxu0 %v254_v16 }
  0x16   :  { %524 = vmatpush3.bf16.xpose.msra.mxu1 %v302_v18  ;;  %540 = vmatprep.subr.msk.bf16.mxu0 %vm243_vm0, %v565_v17 }
  0x17   :  { %548 = vmatprep.subr.msk.bf16.mxu1 %vm243_vm0, %v566_v19 }
  0x1d   :  { %508 = vmatpush3.bf16.xpose.msra.mxu0 %v257_v22 }
  0x1e   :  { %526 = vmatpush3.bf16.xpose.msra.mxu1 %v305_v24  ;;  %541 = vmatprep.subr.msk.bf16.mxu0 %vm243_vm0, %v569_v23 }
  0x1f   :  { %549 = vmatprep.subr.msk.bf16.mxu1 %vm243_vm0, %v570_v25 }
  0x25   :  { %510 = vmatpush3.bf16.xpose.msra.mxu0 %v260_v29 }
  0x26   :  { %528 = vmatpush3.bf16.xpose.msra.mxu1 %v308_v31  ;;  %542 = vmatprep.subr.msk.bf16.mxu0 %vm243_vm0, %v573_v30 }
  0x27   :  { %550 = vmatprep.subr.msk.bf16.mxu1 %vm243_vm0, %v574_v32 }
  0x2d   :  { %512 = vmatpush3.bf16.xpose.msra.mxu0 %v263_v35 }
  0x2e   :  { %530 = vmatpush3.bf16.xpose.msra.mxu1 %v311_v37  ;;  %543 = vmatprep.subr.msk.bf16.mxu0 %vm243_vm0, %v577_v36 }
  0x2f   :  { %551 = vmatprep.subr.msk.bf16.mxu1 %vm243_vm0, %v578_v38 }
  0x35   :  { %514 = vmatpush3.bf16.xpose.msra.mxu0 %v266_v41 }
  0x36   :  { %532 = vmatpush3.bf16.xpose.msra.mxu1 %v314_v43  ;;  %544 = vmatprep.subr.msk.bf16.mxu0 %vm243_vm0, %v581_v42 }
  0x37   :  { %552 = vmatprep.subr.msk.bf16.mxu1 %vm243_vm0, %v582_v44 }
  0x3d   :  { %516 = vmatpush3.bf16.xpose.msra.mxu0 %v269_v47 }
  0x3e   :  { %534 = vmatpush3.bf16.xpose.msra.mxu1 %v317_v48 }
  0x44   :  { %518 = vmatmul.mubr.msk.bf16.vlgmr.msra.gmra.mrb[0].mxu0 %vm243_vm0, %v16_v28 }
  0x45   :  { %536 = vmatmul.mubr.msk.bf16.vlgmr.msra.gmra.mrb[0].mxu1 %vm243_vm0, %v16_v28 }
 0x117   :  { %v377_v50 = vpop.f32.mrb[0].mxu0 }
 0x118   :  { %v378_v51 = vadd.f32 %v377_v50, %v82_v49  ;;  %v418_v52 = vpop.f32.mrb[0].mxu1  ;;  %v379_v53 = vpop.f32.mrb[1].mxu0 }
 0x119   :  { %v419_v54 = vadd.f32 %v418_v52, %v82_v49  ;;  %v380_v55 = vadd.f32 %v379_v53, %v82_v49  ;;  %v420_v56 = vpop.f32.mrb[1].mxu1  ;;  %v381_v57 = vpop.f32.mrb[2].mxu0 }
 0x11a   :  { %v425_v58 = vsub.f32 0.0, %v378_v51  ;;  %v421_v59 = vadd.f32 %v420_v56, %v82_v49  ;;  %v422_v60 = vpop.f32.mrb[2].mxu1  ;;  %v382_v61 = vpop.f32.mrb[3].mxu0 }
 0x11b   :  { %v427_v62 = vsub.f32 0.0, %v419_v54  ;;  %v426_v63 = vsub.f32 0.0, %v380_v55  ;;  %v423_v0 = vpop.f32.mrb[3].mxu1 }
 0x11c   :  { %v429_v1 = vmul.f32 1.442695, %v425_v58  ;;  %v428_v2 = vsub.f32 0.0, %v421_v59 }
 0x11d   :  { %v433_v3 = vmul.f32 1.442695, %v427_v62  ;;  %v431_v4 = vmul.f32 1.442695, %v426_v63 }
 0x11e   :  { %585 = vpow2.f32 %v429_v1  ;;  %v435_v5 = vmul.f32 1.442695, %v428_v2 }
 0x11f   :  { %587 = vpow2.f32 %v433_v3 }
 0x120   :  { %589 = vpow2.f32 %v431_v4 }
 0x121   :  { %591 = vpow2.f32 %v435_v5 }
 0x128   :  { %v586_v6 = vpop.eup %585 }
 0x129   :  { %v588_v7 = vpop.eup %587  ;;  %v437_v8 = vadd.f32 1.0, %v586_v6 }
 0x12a   :  { %v590_v9 = vpop.eup %589  ;;  %v439_v10 = vadd.f32 1.0, %v588_v7 }
 0x12b   :  { %v592_v11 = vpop.eup %591  ;;  %593 = vrcp.f32 %v437_v8  ;;  %v438_v12 = vadd.f32 1.0, %v590_v9 }
 0x12c   :  { %595 = vrcp.f32 %v439_v10  ;;  %v440_v13 = vadd.f32 1.0, %v592_v11 }
 0x12d   :  { %597 = vrcp.f32 %v438_v12 }
 0x12e   :  { %599 = vrcp.f32 %v440_v13 }
 0x135   :  { %v594_v14 = vpop.eup %593 }
 0x136   :  { %v596_v15 = vpop.eup %595  ;;  %v445_v16 = vmax.f32 %v594_v14, 0.0 }
 0x137   :  { %v598_v17 = vpop.eup %597  ;;  %v447_v18 = vmax.f32 %v596_v15, 0.0 }
 0x138   :  { %v600_v19 = vpop.eup %599  ;;  %v449_v20 = vmin.f32 %v445_v16, 1.0  ;;  %v446_v21 = vmax.f32 %v598_v17, 0.0 }
 0x139   :  { %v451_v22 = vmin.f32 %v447_v18, 1.0  ;;  %v448_v23 = vmax.f32 %v600_v19, 0.0 }
 0x13a   :  { %v450_v24 = vmin.f32 %v446_v21, 1.0 }
 0x13b   :  { %v452_v25 = vmin.f32 %v448_v23, 1.0 }
 0x13c   :  { %v457_v26 = vcombine.low %v449_v20, %v450_v24 }
 0x13d   :  { %v458_v27 = vcombine.low %v451_v22, %v452_v25 }
 0x13e   :  { %461 = vst [vmem:[%s768_s3] sm:$0xff] %v457_v26 }
 0x13f   :  { %462 = vst [vmem:[%s768_s3 + $0x8] sm:$0xff] %v458_v27 }

</bundles_post_ra>
